<compile_context>
chip_gen: v6e
topology: v6e:2x2x1
jax: 0.10.0
libtpu: 0.0.40
codegen_flags: <defaults>
</compile_context>

<pallas_src>
import jax
import jax.numpy as jnp
from jax.experimental import pallas as pl
from jax.experimental.pallas import tpu as pltpu


# ------------------------------ fused kernel --------------------------------

def _shift_up(a, di):
    # result[r] = a[r + di] for r < R - di; wrapped tail rows are junk and are
    # discarded downstream by the pool row-selectors.
    if di == 0:
        return a
    return jnp.concatenate([a[di:, :], a[:di, :]], axis=0)


def _cnn_kernel(x_ref, m1_ref, b1_ref, m2_ref, b2_ref,
                s1_ref, c1_ref, s2_ref, c2_ref,
                fsel_ref, w3_ref, b3_ref, out_ref):
    f32 = jnp.float32
    x = x_ref[...]                                     # (28*B, 28)

    # ---- conv1 (1->6, k=5) + bias + ReLU :: (28B, 6*24), valid rows h<24/image ----
    a1 = jnp.dot(x, m1_ref[0], preferred_element_type=f32)
    for di in range(1, 5):
        a1 = a1 + jnp.dot(_shift_up(x, di), m1_ref[di], preferred_element_type=f32)
    a1 = jnp.maximum(a1 + b1_ref[...], 0.0)

    # ---- maxpool 2x2 via prep-built selector matmuls :: (12B, 6*12) ----
    rows1 = jnp.maximum(jnp.dot(s1_ref[0], a1, preferred_element_type=f32),
                        jnp.dot(s1_ref[1], a1, preferred_element_type=f32))
    p1 = jnp.maximum(jnp.dot(rows1, c1_ref[0], preferred_element_type=f32),
                     jnp.dot(rows1, c1_ref[1], preferred_element_type=f32))

    # ---- conv2 (6->12, k=5) + bias + ReLU :: (12B, 12*8), valid rows h<8/image ----
    a2 = jnp.dot(p1, m2_ref[0], preferred_element_type=f32)
    for di in range(1, 5):
        a2 = a2 + jnp.dot(_shift_up(p1, di), m2_ref[di], preferred_element_type=f32)
    a2 = jnp.maximum(a2 + b2_ref[...], 0.0)

    # ---- maxpool 2x2 :: (4B, 12*4) ----
    rows2 = jnp.maximum(jnp.dot(s2_ref[0], a2, preferred_element_type=f32),
                        jnp.dot(s2_ref[1], a2, preferred_element_type=f32))
    p2 = jnp.maximum(jnp.dot(rows2, c2_ref[0], preferred_element_type=f32),
                     jnp.dot(rows2, c2_ref[1], preferred_element_type=f32))

    # ---- linear 192 -> 10, batched: out (B, 10) written once per tile ----
    out = b3_ref[...]                                   # (1, 10), broadcasts
    for h in range(4):
        out = out + jnp.dot(fsel_ref[h],
                            jnp.dot(p2, w3_ref[h], preferred_element_type=f32),
                            preferred_element_type=f32)
    out_ref[...] = out


# --------------------------- one-time weight prep ---------------------------

def _conv_weight_slab(w, w_in):
    # w: (Cout, Cin, 5, 5) (PyTorch OIHW). Returns (5, Cin*W_in, Cout*W_out) with the
    # dj shift already folded (summed) into the slab:
    #   slab[di, c*W_in + (wo+dj), o*W_out + wo] += w[o, c, di, dj]
    # so that  sum_di shift_up(act, di) @ slab[di]  is the valid 5x5 conv of an
    # (rows, Cin*W) activation slab.
    cout, cin, k, _ = w.shape
    w_out = w_in - k + 1
    mats = []
    for di in range(k):
        acc = jnp.zeros((cin * w_in, cout * w_out), jnp.float32)
        for dj in range(k):
            s = jnp.eye(w_out, w_in, k=dj, dtype=jnp.float32)    # s[wo, wo+dj] = 1
            m = jnp.einsum("oc,wj->cjow", w[:, :, di, dj].astype(jnp.float32), s)
            acc = acc + m.reshape(cin * w_in, cout * w_out)
        mats.append(acc)
    return jnp.stack(mats, axis=0)


def _row_pool_selectors(b, rows_in, rows_out):
    # (2, b*rows_out, b*rows_in): pick rows (bb*rows_in + 2i) / (+1).
    r = jnp.arange(b * rows_out)
    base = (r // rows_out) * rows_in + 2 * (r % rows_out)
    s0 = jax.nn.one_hot(base, b * rows_in, dtype=jnp.float32)
    s1 = jax.nn.one_hot(base + 1, b * rows_in, dtype=jnp.float32)
    return jnp.stack([s0, s1], axis=0)


def _lane_pool_selectors(c, w):
    # (2, c*w, c*(w//2)): pick lanes (cc*w + 2j) / (+1) within each channel block.
    wp = w // 2
    r = jnp.arange(c * wp)
    base = (r // wp) * w + 2 * (r % wp)
    c0 = jax.nn.one_hot(base, c * w, dtype=jnp.float32).T
    c1 = jax.nn.one_hot(base + 1, c * w, dtype=jnp.float32).T
    return jnp.stack([c0, c1], axis=0)


def _fc_row_selectors(b):
    # (4, b, 4b): fsel[h, bb, bb*4+h] = 1 (picks spatial row h of image bb).
    rows = jnp.arange(b)
    return jnp.stack([jax.nn.one_hot(rows * 4 + h, 4 * b, dtype=jnp.float32)
                      for h in range(4)], axis=0)


def prepare_params(params, b_tile=8):
    # One-time re-layout of PyTorch-convention weights + pool/flatten selectors.
    m1 = _conv_weight_slab(params["w1"], 28)                    # (5, 28, 144)
    m2 = _conv_weight_slab(params["w2"], 12)                    # (5, 72, 96)
    b1 = jnp.repeat(params["b1"].astype(jnp.float32), 24)[None, :]   # (1, 144)
    b2 = jnp.repeat(params["b2"].astype(jnp.float32), 8)[None, :]    # (1, 96)
    # nn.Linear flattens (C,H,W) -> o*16 + h*4 + w; kernel p2 layout is [b*4+h, o*4+w]
    w3 = jnp.transpose(params["w3"].astype(jnp.float32).reshape(10, 12, 4, 4),
                       (2, 1, 3, 0)).reshape(4, 48, 10)          # [h, o*4+w, k]
    b3 = params["b3"].astype(jnp.float32)[None, :]               # (1, 10)
    return {
        "m1": m1, "b1": b1, "m2": m2, "b2": b2, "w3": w3, "b3": b3,
        "s1": _row_pool_selectors(b_tile, 28, 12),               # (2, 12B, 28B)
        "c1": _lane_pool_selectors(6, 24),                       # (2, 144, 72)
        "s2": _row_pool_selectors(b_tile, 12, 4),                # (2, 4B, 12B)
        "c2": _lane_pool_selectors(12, 8),                       # (2, 96, 48)
        "fsel": _fc_row_selectors(b_tile),                       # (4, B, 4B)
    }


# --------------------------------- forward ----------------------------------

@jax.jit
def cnn_forward(x_nchw, prepped):
    b_tile = prepped["fsel"].shape[1]
    n = x_nchw.shape[0]
    n_pad = ((n + b_tile - 1) // b_tile) * b_tile
    x = x_nchw[:, 0, :, :]                                       # (N, 28, 28), Cin == 1
    if n_pad != n:
        x = jnp.pad(x, ((0, n_pad - n), (0, 0), (0, 0)))
    x2 = x.reshape(n_pad * 28, 28)                               # lane-dense 2-D slab

    const3 = lambda i: (0, 0, 0)
    const2 = lambda i: (0, 0)
    out = pl.pallas_call(
        _cnn_kernel,
        out_shape=jax.ShapeDtypeStruct((n_pad, 10), jnp.float32),
        grid_spec=pltpu.PrefetchScalarGridSpec(
            num_scalar_prefetch=0,
            grid=(n_pad // b_tile,),
            in_specs=[
                pl.BlockSpec((28 * b_tile, 28), lambda i: (i, 0)),   # image tile
                pl.BlockSpec((5, 28, 144), const3),                  # conv1 slabs
                pl.BlockSpec((1, 144), const2),                      # bias1
                pl.BlockSpec((5, 72, 96), const3),                   # conv2 slabs
                pl.BlockSpec((1, 96), const2),                       # bias2
                pl.BlockSpec(prepped["s1"].shape, const3),           # pool1 row sel
                pl.BlockSpec(prepped["c1"].shape, const3),           # pool1 lane sel
                pl.BlockSpec(prepped["s2"].shape, const3),           # pool2 row sel
                pl.BlockSpec(prepped["c2"].shape, const3),           # pool2 lane sel
                pl.BlockSpec(prepped["fsel"].shape, const3),         # fc row sel
                pl.BlockSpec((4, 48, 10), const3),                   # fc weights
                pl.BlockSpec((1, 10), const2),                       # fc bias
            ],
            out_specs=pl.BlockSpec((b_tile, 10), lambda i: (i, 0)),
        ),
        compiler_params=pltpu.CompilerParams(
            dimension_semantics=("parallel",),
            vmem_limit_bytes=32 * 1024 * 1024,
        ),
    )(x2, prepped["m1"], prepped["b1"], prepped["m2"], prepped["b2"],
      prepped["s1"], prepped["c1"], prepped["s2"], prepped["c2"],
      prepped["fsel"], prepped["w3"], prepped["b3"])
    return out[:n]


# ------------------------------ reference / test -----------------------------

def cnn_reference(x_nchw, params):
    y = jax.lax.conv_general_dilated(x_nchw, params["w1"], (1, 1), "VALID",
                                     dimension_numbers=("NCHW", "OIHW", "NCHW"))
    y = jax.nn.relu(y + params["b1"][None, :, None, None])
    y = jax.lax.reduce_window(y, -jnp.inf, jax.lax.max, (1, 1, 2, 2), (1, 1, 2, 2), "VALID")
    y = jax.lax.conv_general_dilated(y, params["w2"], (1, 1), "VALID",
                                     dimension_numbers=("NCHW", "OIHW", "NCHW"))
    y = jax.nn.relu(y + params["b2"][None, :, None, None])
    y = jax.lax.reduce_window(y, -jnp.inf, jax.lax.max, (1, 1, 2, 2), (1, 1, 2, 2), "VALID")
    y = y.reshape(y.shape[0], -1)
    return y @ params["w3"].T + params["b3"]


def init_params(key):
    k1, k2, k3, k4, k5, k6 = jax.random.split(key, 6)
    return {
        "w1": 0.1 * jax.random.normal(k1, (6, 1, 5, 5), jnp.float32),
        "b1": 0.1 * jax.random.normal(k2, (6,), jnp.float32),
        "w2": 0.1 * jax.random.normal(k3, (12, 6, 5, 5), jnp.float32),
        "b2": 0.1 * jax.random.normal(k4, (12,), jnp.float32),
        "w3": 0.1 * jax.random.normal(k5, (10, 192), jnp.float32),
        "b3": 0.1 * jax.random.normal(k6, (10,), jnp.float32),
    }


if __name__ == "__main__":
    key = jax.random.PRNGKey(0)
    kx, kp = jax.random.split(key)
    params = init_params(kp)
    x = jax.random.normal(kx, (16, 1, 28, 28), jnp.float32)   # MNIST-like NCHW

    prepped = prepare_params(params, b_tile=8)                # one-time re-layout
    out = jax.block_until_ready(cnn_forward(x, prepped))
    ref = jax.block_until_ready(cnn_reference(x, params))

    assert out.shape == (16, 10), out.shape
    assert jnp.allclose(out, ref, rtol=1e-3, atol=1e-3), \
        f"max abs err {jnp.max(jnp.abs(out - ref))}"
    print("KERNEL_OK")
</pallas_src>

<mosaic_0001>
module attributes {stable_mosaic.version = 11 : i64} {
  func.func @_cnn_kernel(%arg0: i32, %arg1: memref<224x28xf32, #tpu.memory_space<vmem>>, %arg2: memref<5x28x144xf32, #tpu.memory_space<vmem>>, %arg3: memref<1x144xf32, #tpu.memory_space<vmem>>, %arg4: memref<5x72x96xf32, #tpu.memory_space<vmem>>, %arg5: memref<1x96xf32, #tpu.memory_space<vmem>>, %arg6: memref<2x96x224xf32, #tpu.memory_space<vmem>>, %arg7: memref<2x144x72xf32, #tpu.memory_space<vmem>>, %arg8: memref<2x32x96xf32, #tpu.memory_space<vmem>>, %arg9: memref<2x96x48xf32, #tpu.memory_space<vmem>>, %arg10: memref<4x8x32xf32, #tpu.memory_space<vmem>>, %arg11: memref<4x48x10xf32, #tpu.memory_space<vmem>>, %arg12: memref<1x10xf32, #tpu.memory_space<vmem>>, %arg13: memref<8x10xf32, #tpu.memory_space<vmem>>) attributes {dimension_semantics = [#tpu.dimension_semantics<parallel>], iteration_bounds = array<i64: 2>, scalar_prefetch = 0 : i64, scratch_operands = 0 : i64, tpu.core_type = #tpu.core_type<tc>, window_params = [{transform_indices = @transform_0, window_bounds = array<i64: 224, 28>}, {pipeline_mode = #tpu.pipeline_mode<synchronous>, transform_indices = @transform_1, window_bounds = array<i64: 5, 28, 144>}, {pipeline_mode = #tpu.pipeline_mode<synchronous>, transform_indices = @transform_2, window_bounds = array<i64: 1, 144>}, {pipeline_mode = #tpu.pipeline_mode<synchronous>, transform_indices = @transform_3, window_bounds = array<i64: 5, 72, 96>}, {pipeline_mode = #tpu.pipeline_mode<synchronous>, transform_indices = @transform_4, window_bounds = array<i64: 1, 96>}, {pipeline_mode = #tpu.pipeline_mode<synchronous>, transform_indices = @transform_5, window_bounds = array<i64: 2, 96, 224>}, {pipeline_mode = #tpu.pipeline_mode<synchronous>, transform_indices = @transform_6, window_bounds = array<i64: 2, 144, 72>}, {pipeline_mode = #tpu.pipeline_mode<synchronous>, transform_indices = @transform_7, window_bounds = array<i64: 2, 32, 96>}, {pipeline_mode = #tpu.pipeline_mode<synchronous>, transform_indices = @transform_8, window_bounds = array<i64: 2, 96, 48>}, {pipeline_mode = #tpu.pipeline_mode<synchronous>, transform_indices = @transform_9, window_bounds = array<i64: 4, 8, 32>}, {pipeline_mode = #tpu.pipeline_mode<synchronous>, transform_indices = @transform_10, window_bounds = array<i64: 4, 48, 10>}, {pipeline_mode = #tpu.pipeline_mode<synchronous>, transform_indices = @transform_11, window_bounds = array<i64: 1, 10>}, {transform_indices = @transform_12, window_bounds = array<i64: 8, 10>}]} {
    %c0 = arith.constant 0 : index
    %c0_0 = arith.constant 0 : index
    %0 = vector.load %arg1[%c0, %c0_0] : memref<224x28xf32, #tpu.memory_space<vmem>>, vector<224x28xf32>
    %c0_1 = arith.constant 0 : index
    %c0_2 = arith.constant 0 : index
    %c0_3 = arith.constant 0 : index
    %1 = vector.load %arg2[%c0_1, %c0_2, %c0_3] : memref<5x28x144xf32, #tpu.memory_space<vmem>>, vector<1x28x144xf32>
    %2 = vector.shape_cast %1 : vector<1x28x144xf32> to vector<28x144xf32>
    %cst = arith.constant dense<0.000000e+00> : vector<224x144xf32>
    %3 = tpu.matmul %0, %2, %cst {dimension_numbers = #tpu.dot_dimension_numbers<[1], [0], [0], [1], [0, 0, 1, 1], [], []>} : vector<224x28xf32>, vector<28x144xf32>, vector<224x144xf32> -> vector<224x144xf32>
    %4 = vector.extract_strided_slice %0 {offsets = [1, 0], sizes = [223, 28], strides = [1, 1]} : vector<224x28xf32> to vector<223x28xf32>
    %5 = vector.extract_strided_slice %0 {offsets = [0, 0], sizes = [1, 28], strides = [1, 1]} : vector<224x28xf32> to vector<1x28xf32>
    %6 = tpu.concatenate %4, %5 in 0 : vector<223x28xf32>, vector<1x28xf32> -> vector<224x28xf32>
    %c1 = arith.constant 1 : index
    %c0_4 = arith.constant 0 : index
    %c0_5 = arith.constant 0 : index
    %7 = vector.load %arg2[%c1, %c0_4, %c0_5] : memref<5x28x144xf32, #tpu.memory_space<vmem>>, vector<1x28x144xf32>
    %8 = vector.shape_cast %7 : vector<1x28x144xf32> to vector<28x144xf32>
    %cst_6 = arith.constant dense<0.000000e+00> : vector<224x144xf32>
    %9 = tpu.matmul %6, %8, %cst_6 {dimension_numbers = #tpu.dot_dimension_numbers<[1], [0], [0], [1], [0, 0, 1, 1], [], []>} : vector<224x28xf32>, vector<28x144xf32>, vector<224x144xf32> -> vector<224x144xf32>
    %10 = arith.addf %3, %9 : vector<224x144xf32>
    %11 = vector.extract_strided_slice %0 {offsets = [2, 0], sizes = [222, 28], strides = [1, 1]} : vector<224x28xf32> to vector<222x28xf32>
    %12 = vector.extract_strided_slice %0 {offsets = [0, 0], sizes = [2, 28], strides = [1, 1]} : vector<224x28xf32> to vector<2x28xf32>
    %13 = tpu.concatenate %11, %12 in 0 : vector<222x28xf32>, vector<2x28xf32> -> vector<224x28xf32>
    %c2 = arith.constant 2 : index
    %c0_7 = arith.constant 0 : index
    %c0_8 = arith.constant 0 : index
    %14 = vector.load %arg2[%c2, %c0_7, %c0_8] : memref<5x28x144xf32, #tpu.memory_space<vmem>>, vector<1x28x144xf32>
    %15 = vector.shape_cast %14 : vector<1x28x144xf32> to vector<28x144xf32>
    %cst_9 = arith.constant dense<0.000000e+00> : vector<224x144xf32>
    %16 = tpu.matmul %13, %15, %cst_9 {dimension_numbers = #tpu.dot_dimension_numbers<[1], [0], [0], [1], [0, 0, 1, 1], [], []>} : vector<224x28xf32>, vector<28x144xf32>, vector<224x144xf32> -> vector<224x144xf32>
    %17 = arith.addf %10, %16 : vector<224x144xf32>
    %18 = vector.extract_strided_slice %0 {offsets = [3, 0], sizes = [221, 28], strides = [1, 1]} : vector<224x28xf32> to vector<221x28xf32>
    %19 = vector.extract_strided_slice %0 {offsets = [0, 0], sizes = [3, 28], strides = [1, 1]} : vector<224x28xf32> to vector<3x28xf32>
    %20 = tpu.concatenate %18, %19 in 0 : vector<221x28xf32>, vector<3x28xf32> -> vector<224x28xf32>
    %c3 = arith.constant 3 : index
    %c0_10 = arith.constant 0 : index
    %c0_11 = arith.constant 0 : index
    %21 = vector.load %arg2[%c3, %c0_10, %c0_11] : memref<5x28x144xf32, #tpu.memory_space<vmem>>, vector<1x28x144xf32>
    %22 = vector.shape_cast %21 : vector<1x28x144xf32> to vector<28x144xf32>
    %cst_12 = arith.constant dense<0.000000e+00> : vector<224x144xf32>
    %23 = tpu.matmul %20, %22, %cst_12 {dimension_numbers = #tpu.dot_dimension_numbers<[1], [0], [0], [1], [0, 0, 1, 1], [], []>} : vector<224x28xf32>, vector<28x144xf32>, vector<224x144xf32> -> vector<224x144xf32>
    %24 = arith.addf %17, %23 : vector<224x144xf32>
    %25 = vector.extract_strided_slice %0 {offsets = [4, 0], sizes = [220, 28], strides = [1, 1]} : vector<224x28xf32> to vector<220x28xf32>
    %26 = vector.extract_strided_slice %0 {offsets = [0, 0], sizes = [4, 28], strides = [1, 1]} : vector<224x28xf32> to vector<4x28xf32>
    %27 = tpu.concatenate %25, %26 in 0 : vector<220x28xf32>, vector<4x28xf32> -> vector<224x28xf32>
    %c4 = arith.constant 4 : index
    %c0_13 = arith.constant 0 : index
    %c0_14 = arith.constant 0 : index
    %28 = vector.load %arg2[%c4, %c0_13, %c0_14] : memref<5x28x144xf32, #tpu.memory_space<vmem>>, vector<1x28x144xf32>
    %29 = vector.shape_cast %28 : vector<1x28x144xf32> to vector<28x144xf32>
    %cst_15 = arith.constant dense<0.000000e+00> : vector<224x144xf32>
    %30 = tpu.matmul %27, %29, %cst_15 {dimension_numbers = #tpu.dot_dimension_numbers<[1], [0], [0], [1], [0, 0, 1, 1], [], []>} : vector<224x28xf32>, vector<28x144xf32>, vector<224x144xf32> -> vector<224x144xf32>
    %31 = arith.addf %24, %30 : vector<224x144xf32>
    %c0_16 = arith.constant 0 : index
    %c0_17 = arith.constant 0 : index
    %32 = vector.load %arg3[%c0_16, %c0_17] : memref<1x144xf32, #tpu.memory_space<vmem>>, vector<1x144xf32>
    %33 = vector.broadcast %32 : vector<1x144xf32> to vector<224x144xf32>
    %34 = arith.addf %31, %33 : vector<224x144xf32>
    %cst_18 = arith.constant 0.000000e+00 : f32
    %35 = vector.broadcast %cst_18 : f32 to vector<224x144xf32>
    %36 = arith.maximumf %34, %35 : vector<224x144xf32>
    %c0_19 = arith.constant 0 : index
    %c0_20 = arith.constant 0 : index
    %c0_21 = arith.constant 0 : index
    %37 = vector.load %arg6[%c0_19, %c0_20, %c0_21] : memref<2x96x224xf32, #tpu.memory_space<vmem>>, vector<1x96x224xf32>
    %38 = vector.shape_cast %37 : vector<1x96x224xf32> to vector<96x224xf32>
    %cst_22 = arith.constant dense<0.000000e+00> : vector<96x144xf32>
    %39 = tpu.matmul %38, %36, %cst_22 {dimension_numbers = #tpu.dot_dimension_numbers<[1], [0], [0], [1], [0, 0, 1, 1], [], []>} : vector<96x224xf32>, vector<224x144xf32>, vector<96x144xf32> -> vector<96x144xf32>
    %c1_23 = arith.constant 1 : index
    %c0_24 = arith.constant 0 : index
    %c0_25 = arith.constant 0 : index
    %40 = vector.load %arg6[%c1_23, %c0_24, %c0_25] : memref<2x96x224xf32, #tpu.memory_space<vmem>>, vector<1x96x224xf32>
    %41 = vector.shape_cast %40 : vector<1x96x224xf32> to vector<96x224xf32>
    %cst_26 = arith.constant dense<0.000000e+00> : vector<96x144xf32>
    %42 = tpu.matmul %41, %36, %cst_26 {dimension_numbers = #tpu.dot_dimension_numbers<[1], [0], [0], [1], [0, 0, 1, 1], [], []>} : vector<96x224xf32>, vector<224x144xf32>, vector<96x144xf32> -> vector<96x144xf32>
    %43 = arith.maximumf %39, %42 : vector<96x144xf32>
    %c0_27 = arith.constant 0 : index
    %c0_28 = arith.constant 0 : index
    %c0_29 = arith.constant 0 : index
    %44 = vector.load %arg7[%c0_27, %c0_28, %c0_29] : memref<2x144x72xf32, #tpu.memory_space<vmem>>, vector<1x144x72xf32>
    %45 = vector.shape_cast %44 : vector<1x144x72xf32> to vector<144x72xf32>
    %cst_30 = arith.constant dense<0.000000e+00> : vector<96x72xf32>
    %46 = tpu.matmul %43, %45, %cst_30 {dimension_numbers = #tpu.dot_dimension_numbers<[1], [0], [0], [1], [0, 0, 1, 1], [], []>} : vector<96x144xf32>, vector<144x72xf32>, vector<96x72xf32> -> vector<96x72xf32>
    %c1_31 = arith.constant 1 : index
    %c0_32 = arith.constant 0 : index
    %c0_33 = arith.constant 0 : index
    %47 = vector.load %arg7[%c1_31, %c0_32, %c0_33] : memref<2x144x72xf32, #tpu.memory_space<vmem>>, vector<1x144x72xf32>
    %48 = vector.shape_cast %47 : vector<1x144x72xf32> to vector<144x72xf32>
    %cst_34 = arith.constant dense<0.000000e+00> : vector<96x72xf32>
    %49 = tpu.matmul %43, %48, %cst_34 {dimension_numbers = #tpu.dot_dimension_numbers<[1], [0], [0], [1], [0, 0, 1, 1], [], []>} : vector<96x144xf32>, vector<144x72xf32>, vector<96x72xf32> -> vector<96x72xf32>
    %50 = arith.maximumf %46, %49 : vector<96x72xf32>
    %c0_35 = arith.constant 0 : index
    %c0_36 = arith.constant 0 : index
    %c0_37 = arith.constant 0 : index
    %51 = vector.load %arg4[%c0_35, %c0_36, %c0_37] : memref<5x72x96xf32, #tpu.memory_space<vmem>>, vector<1x72x96xf32>
    %52 = vector.shape_cast %51 : vector<1x72x96xf32> to vector<72x96xf32>
    %cst_38 = arith.constant dense<0.000000e+00> : vector<96x96xf32>
    %53 = tpu.matmul %50, %52, %cst_38 {dimension_numbers = #tpu.dot_dimension_numbers<[1], [0], [0], [1], [0, 0, 1, 1], [], []>} : vector<96x72xf32>, vector<72x96xf32>, vector<96x96xf32> -> vector<96x96xf32>
    %54 = vector.extract_strided_slice %50 {offsets = [1, 0], sizes = [95, 72], strides = [1, 1]} : vector<96x72xf32> to vector<95x72xf32>
    %55 = vector.extract_strided_slice %50 {offsets = [0, 0], sizes = [1, 72], strides = [1, 1]} : vector<96x72xf32> to vector<1x72xf32>
    %56 = tpu.concatenate %54, %55 in 0 : vector<95x72xf32>, vector<1x72xf32> -> vector<96x72xf32>
    %c1_39 = arith.constant 1 : index
    %c0_40 = arith.constant 0 : index
    %c0_41 = arith.constant 0 : index
    %57 = vector.load %arg4[%c1_39, %c0_40, %c0_41] : memref<5x72x96xf32, #tpu.memory_space<vmem>>, vector<1x72x96xf32>
    %58 = vector.shape_cast %57 : vector<1x72x96xf32> to vector<72x96xf32>
    %cst_42 = arith.constant dense<0.000000e+00> : vector<96x96xf32>
    %59 = tpu.matmul %56, %58, %cst_42 {dimension_numbers = #tpu.dot_dimension_numbers<[1], [0], [0], [1], [0, 0, 1, 1], [], []>} : vector<96x72xf32>, vector<72x96xf32>, vector<96x96xf32> -> vector<96x96xf32>
    %60 = arith.addf %53, %59 : vector<96x96xf32>
    %61 = vector.extract_strided_slice %50 {offsets = [2, 0], sizes = [94, 72], strides = [1, 1]} : vector<96x72xf32> to vector<94x72xf32>
    %62 = vector.extract_strided_slice %50 {offsets = [0, 0], sizes = [2, 72], strides = [1, 1]} : vector<96x72xf32> to vector<2x72xf32>
    %63 = tpu.concatenate %61, %62 in 0 : vector<94x72xf32>, vector<2x72xf32> -> vector<96x72xf32>
    %c2_43 = arith.constant 2 : index
    %c0_44 = arith.constant 0 : index
    %c0_45 = arith.constant 0 : index
    %64 = vector.load %arg4[%c2_43, %c0_44, %c0_45] : memref<5x72x96xf32, #tpu.memory_space<vmem>>, vector<1x72x96xf32>
    %65 = vector.shape_cast %64 : vector<1x72x96xf32> to vector<72x96xf32>
    %cst_46 = arith.constant dense<0.000000e+00> : vector<96x96xf32>
    %66 = tpu.matmul %63, %65, %cst_46 {dimension_numbers = #tpu.dot_dimension_numbers<[1], [0], [0], [1], [0, 0, 1, 1], [], []>} : vector<96x72xf32>, vector<72x96xf32>, vector<96x96xf32> -> vector<96x96xf32>
    %67 = arith.addf %60, %66 : vector<96x96xf32>
    %68 = vector.extract_strided_slice %50 {offsets = [3, 0], sizes = [93, 72], strides = [1, 1]} : vector<96x72xf32> to vector<93x72xf32>
    %69 = vector.extract_strided_slice %50 {offsets = [0, 0], sizes = [3, 72], strides = [1, 1]} : vector<96x72xf32> to vector<3x72xf32>
    %70 = tpu.concatenate %68, %69 in 0 : vector<93x72xf32>, vector<3x72xf32> -> vector<96x72xf32>
    %c3_47 = arith.constant 3 : index
    %c0_48 = arith.constant 0 : index
    %c0_49 = arith.constant 0 : index
    %71 = vector.load %arg4[%c3_47, %c0_48, %c0_49] : memref<5x72x96xf32, #tpu.memory_space<vmem>>, vector<1x72x96xf32>
    %72 = vector.shape_cast %71 : vector<1x72x96xf32> to vector<72x96xf32>
    %cst_50 = arith.constant dense<0.000000e+00> : vector<96x96xf32>
    %73 = tpu.matmul %70, %72, %cst_50 {dimension_numbers = #tpu.dot_dimension_numbers<[1], [0], [0], [1], [0, 0, 1, 1], [], []>} : vector<96x72xf32>, vector<72x96xf32>, vector<96x96xf32> -> vector<96x96xf32>
    %74 = arith.addf %67, %73 : vector<96x96xf32>
    %75 = vector.extract_strided_slice %50 {offsets = [4, 0], sizes = [92, 72], strides = [1, 1]} : vector<96x72xf32> to vector<92x72xf32>
    %76 = vector.extract_strided_slice %50 {offsets = [0, 0], sizes = [4, 72], strides = [1, 1]} : vector<96x72xf32> to vector<4x72xf32>
    %77 = tpu.concatenate %75, %76 in 0 : vector<92x72xf32>, vector<4x72xf32> -> vector<96x72xf32>
    %c4_51 = arith.constant 4 : index
    %c0_52 = arith.constant 0 : index
    %c0_53 = arith.constant 0 : index
    %78 = vector.load %arg4[%c4_51, %c0_52, %c0_53] : memref<5x72x96xf32, #tpu.memory_space<vmem>>, vector<1x72x96xf32>
    %79 = vector.shape_cast %78 : vector<1x72x96xf32> to vector<72x96xf32>
    %cst_54 = arith.constant dense<0.000000e+00> : vector<96x96xf32>
    %80 = tpu.matmul %77, %79, %cst_54 {dimension_numbers = #tpu.dot_dimension_numbers<[1], [0], [0], [1], [0, 0, 1, 1], [], []>} : vector<96x72xf32>, vector<72x96xf32>, vector<96x96xf32> -> vector<96x96xf32>
    %81 = arith.addf %74, %80 : vector<96x96xf32>
    %c0_55 = arith.constant 0 : index
    %c0_56 = arith.constant 0 : index
    %82 = vector.load %arg5[%c0_55, %c0_56] : memref<1x96xf32, #tpu.memory_space<vmem>>, vector<1x96xf32>
    %83 = vector.broadcast %82 : vector<1x96xf32> to vector<96x96xf32>
    %84 = arith.addf %81, %83 : vector<96x96xf32>
    %cst_57 = arith.constant 0.000000e+00 : f32
    %85 = vector.broadcast %cst_57 : f32 to vector<96x96xf32>
    %86 = arith.maximumf %84, %85 : vector<96x96xf32>
    %c0_58 = arith.constant 0 : index
    %c0_59 = arith.constant 0 : index
    %c0_60 = arith.constant 0 : index
    %87 = vector.load %arg8[%c0_58, %c0_59, %c0_60] : memref<2x32x96xf32, #tpu.memory_space<vmem>>, vector<1x32x96xf32>
    %88 = vector.shape_cast %87 : vector<1x32x96xf32> to vector<32x96xf32>
    %cst_61 = arith.constant dense<0.000000e+00> : vector<32x96xf32>
    %89 = tpu.matmul %88, %86, %cst_61 {dimension_numbers = #tpu.dot_dimension_numbers<[1], [0], [0], [1], [0, 0, 1, 1], [], []>} : vector<32x96xf32>, vector<96x96xf32>, vector<32x96xf32> -> vector<32x96xf32>
    %c1_62 = arith.constant 1 : index
    %c0_63 = arith.constant 0 : index
    %c0_64 = arith.constant 0 : index
    %90 = vector.load %arg8[%c1_62, %c0_63, %c0_64] : memref<2x32x96xf32, #tpu.memory_space<vmem>>, vector<1x32x96xf32>
    %91 = vector.shape_cast %90 : vector<1x32x96xf32> to vector<32x96xf32>
    %cst_65 = arith.constant dense<0.000000e+00> : vector<32x96xf32>
    %92 = tpu.matmul %91, %86, %cst_65 {dimension_numbers = #tpu.dot_dimension_numbers<[1], [0], [0], [1], [0, 0, 1, 1], [], []>} : vector<32x96xf32>, vector<96x96xf32>, vector<32x96xf32> -> vector<32x96xf32>
    %93 = arith.maximumf %89, %92 : vector<32x96xf32>
    %c0_66 = arith.constant 0 : index
    %c0_67 = arith.constant 0 : index
    %c0_68 = arith.constant 0 : index
    %94 = vector.load %arg9[%c0_66, %c0_67, %c0_68] : memref<2x96x48xf32, #tpu.memory_space<vmem>>, vector<1x96x48xf32>
    %95 = vector.shape_cast %94 : vector<1x96x48xf32> to vector<96x48xf32>
    %cst_69 = arith.constant dense<0.000000e+00> : vector<32x48xf32>
    %96 = tpu.matmul %93, %95, %cst_69 {dimension_numbers = #tpu.dot_dimension_numbers<[1], [0], [0], [1], [0, 0, 1, 1], [], []>} : vector<32x96xf32>, vector<96x48xf32>, vector<32x48xf32> -> vector<32x48xf32>
    %c1_70 = arith.constant 1 : index
    %c0_71 = arith.constant 0 : index
    %c0_72 = arith.constant 0 : index
    %97 = vector.load %arg9[%c1_70, %c0_71, %c0_72] : memref<2x96x48xf32, #tpu.memory_space<vmem>>, vector<1x96x48xf32>
    %98 = vector.shape_cast %97 : vector<1x96x48xf32> to vector<96x48xf32>
    %cst_73 = arith.constant dense<0.000000e+00> : vector<32x48xf32>
    %99 = tpu.matmul %93, %98, %cst_73 {dimension_numbers = #tpu.dot_dimension_numbers<[1], [0], [0], [1], [0, 0, 1, 1], [], []>} : vector<32x96xf32>, vector<96x48xf32>, vector<32x48xf32> -> vector<32x48xf32>
    %100 = arith.maximumf %96, %99 : vector<32x48xf32>
    %c0_74 = arith.constant 0 : index
    %c0_75 = arith.constant 0 : index
    %101 = vector.load %arg12[%c0_74, %c0_75] : memref<1x10xf32, #tpu.memory_space<vmem>>, vector<1x10xf32>
    %c0_76 = arith.constant 0 : index
    %c0_77 = arith.constant 0 : index
    %c0_78 = arith.constant 0 : index
    %102 = vector.load %arg10[%c0_76, %c0_77, %c0_78] : memref<4x8x32xf32, #tpu.memory_space<vmem>>, vector<1x8x32xf32>
    %103 = vector.shape_cast %102 : vector<1x8x32xf32> to vector<8x32xf32>
    %c0_79 = arith.constant 0 : index
    %c0_80 = arith.constant 0 : index
    %c0_81 = arith.constant 0 : index
    %104 = vector.load %arg11[%c0_79, %c0_80, %c0_81] : memref<4x48x10xf32, #tpu.memory_space<vmem>>, vector<1x48x10xf32>
    %105 = vector.shape_cast %104 : vector<1x48x10xf32> to vector<48x10xf32>
    %cst_82 = arith.constant dense<0.000000e+00> : vector<32x10xf32>
    %106 = tpu.matmul %100, %105, %cst_82 {dimension_numbers = #tpu.dot_dimension_numbers<[1], [0], [0], [1], [0, 0, 1, 1], [], []>} : vector<32x48xf32>, vector<48x10xf32>, vector<32x10xf32> -> vector<32x10xf32>
    %cst_83 = arith.constant dense<0.000000e+00> : vector<8x10xf32>
    %107 = tpu.matmul %103, %106, %cst_83 {dimension_numbers = #tpu.dot_dimension_numbers<[1], [0], [0], [1], [0, 0, 1, 1], [], []>} : vector<8x32xf32>, vector<32x10xf32>, vector<8x10xf32> -> vector<8x10xf32>
    %108 = vector.broadcast %101 : vector<1x10xf32> to vector<8x10xf32>
    %109 = arith.addf %108, %107 : vector<8x10xf32>
    %c1_84 = arith.constant 1 : index
    %c0_85 = arith.constant 0 : index
    %c0_86 = arith.constant 0 : index
    %110 = vector.load %arg10[%c1_84, %c0_85, %c0_86] : memref<4x8x32xf32, #tpu.memory_space<vmem>>, vector<1x8x32xf32>
    %111 = vector.shape_cast %110 : vector<1x8x32xf32> to vector<8x32xf32>
    %c1_87 = arith.constant 1 : index
    %c0_88 = arith.constant 0 : index
    %c0_89 = arith.constant 0 : index
    %112 = vector.load %arg11[%c1_87, %c0_88, %c0_89] : memref<4x48x10xf32, #tpu.memory_space<vmem>>, vector<1x48x10xf32>
    %113 = vector.shape_cast %112 : vector<1x48x10xf32> to vector<48x10xf32>
    %cst_90 = arith.constant dense<0.000000e+00> : vector<32x10xf32>
    %114 = tpu.matmul %100, %113, %cst_90 {dimension_numbers = #tpu.dot_dimension_numbers<[1], [0], [0], [1], [0, 0, 1, 1], [], []>} : vector<32x48xf32>, vector<48x10xf32>, vector<32x10xf32> -> vector<32x10xf32>
    %cst_91 = arith.constant dense<0.000000e+00> : vector<8x10xf32>
    %115 = tpu.matmul %111, %114, %cst_91 {dimension_numbers = #tpu.dot_dimension_numbers<[1], [0], [0], [1], [0, 0, 1, 1], [], []>} : vector<8x32xf32>, vector<32x10xf32>, vector<8x10xf32> -> vector<8x10xf32>
    %116 = arith.addf %109, %115 : vector<8x10xf32>
    %c2_92 = arith.constant 2 : index
    %c0_93 = arith.constant 0 : index
    %c0_94 = arith.constant 0 : index
    %117 = vector.load %arg10[%c2_92, %c0_93, %c0_94] : memref<4x8x32xf32, #tpu.memory_space<vmem>>, vector<1x8x32xf32>
    %118 = vector.shape_cast %117 : vector<1x8x32xf32> to vector<8x32xf32>
    %c2_95 = arith.constant 2 : index
    %c0_96 = arith.constant 0 : index
    %c0_97 = arith.constant 0 : index
    %119 = vector.load %arg11[%c2_95, %c0_96, %c0_97] : memref<4x48x10xf32, #tpu.memory_space<vmem>>, vector<1x48x10xf32>
    %120 = vector.shape_cast %119 : vector<1x48x10xf32> to vector<48x10xf32>
    %cst_98 = arith.constant dense<0.000000e+00> : vector<32x10xf32>
    %121 = tpu.matmul %100, %120, %cst_98 {dimension_numbers = #tpu.dot_dimension_numbers<[1], [0], [0], [1], [0, 0, 1, 1], [], []>} : vector<32x48xf32>, vector<48x10xf32>, vector<32x10xf32> -> vector<32x10xf32>
    %cst_99 = arith.constant dense<0.000000e+00> : vector<8x10xf32>
    %122 = tpu.matmul %118, %121, %cst_99 {dimension_numbers = #tpu.dot_dimension_numbers<[1], [0], [0], [1], [0, 0, 1, 1], [], []>} : vector<8x32xf32>, vector<32x10xf32>, vector<8x10xf32> -> vector<8x10xf32>
    %123 = arith.addf %116, %122 : vector<8x10xf32>
    %c3_100 = arith.constant 3 : index
    %c0_101 = arith.constant 0 : index
    %c0_102 = arith.constant 0 : index
    %124 = vector.load %arg10[%c3_100, %c0_101, %c0_102] : memref<4x8x32xf32, #tpu.memory_space<vmem>>, vector<1x8x32xf32>
    %125 = vector.shape_cast %124 : vector<1x8x32xf32> to vector<8x32xf32>
    %c3_103 = arith.constant 3 : index
    %c0_104 = arith.constant 0 : index
    %c0_105 = arith.constant 0 : index
    %126 = vector.load %arg11[%c3_103, %c0_104, %c0_105] : memref<4x48x10xf32, #tpu.memory_space<vmem>>, vector<1x48x10xf32>
    %127 = vector.shape_cast %126 : vector<1x48x10xf32> to vector<48x10xf32>
    %cst_106 = arith.constant dense<0.000000e+00> : vector<32x10xf32>
    %128 = tpu.matmul %100, %127, %cst_106 {dimension_numbers = #tpu.dot_dimension_numbers<[1], [0], [0], [1], [0, 0, 1, 1], [], []>} : vector<32x48xf32>, vector<48x10xf32>, vector<32x10xf32> -> vector<32x10xf32>
    %cst_107 = arith.constant dense<0.000000e+00> : vector<8x10xf32>
    %129 = tpu.matmul %125, %128, %cst_107 {dimension_numbers = #tpu.dot_dimension_numbers<[1], [0], [0], [1], [0, 0, 1, 1], [], []>} : vector<8x32xf32>, vector<32x10xf32>, vector<8x10xf32> -> vector<8x10xf32>
    %130 = arith.addf %123, %129 : vector<8x10xf32>
    %c0_108 = arith.constant 0 : index
    %c0_109 = arith.constant 0 : index
    %131 = vector.load %arg13[%c0_108, %c0_109] : memref<8x10xf32, #tpu.memory_space<vmem>>, vector<8x10xf32>
    tpu.vector_store %arg13[%c0_108, %c0_109], %130 {strides = array<i32>} : memref<8x10xf32, #tpu.memory_space<vmem>>, vector<8x10xf32>,
    return
  }
  func.func @transform_0(%arg0: i32) -> (i32, i32) {
    %c0_i32 = arith.constant 0 : i32
    %c0_i32_0 = arith.constant 0 : i32
    return %arg0, %c0_i32 : i32, i32
  }
  func.func @transform_1(%arg0: i32) -> (i32, i32, i32) {
    %c0_i32 = arith.constant 0 : i32
    %c0_i32_0 = arith.constant 0 : i32
    %c0_i32_1 = arith.constant 0 : i32
    %c0_i32_2 = arith.constant 0 : i32
    return %c0_i32, %c0_i32_0, %c0_i32_1 : i32, i32, i32
  }
  func.func @transform_2(%arg0: i32) -> (i32, i32) {
    %c0_i32 = arith.constant 0 : i32
    %c0_i32_0 = arith.constant 0 : i32
    %c0_i32_1 = arith.constant 0 : i32
    return %c0_i32, %c0_i32_0 : i32, i32
  }
  func.func @transform_3(%arg0: i32) -> (i32, i32, i32) {
    %c0_i32 = arith.constant 0 : i32
    %c0_i32_0 = arith.constant 0 : i32
    %c0_i32_1 = arith.constant 0 : i32
    %c0_i32_2 = arith.constant 0 : i32
    return %c0_i32, %c0_i32_0, %c0_i32_1 : i32, i32, i32
  }
  func.func @transform_4(%arg0: i32) -> (i32, i32) {
    %c0_i32 = arith.constant 0 : i32
    %c0_i32_0 = arith.constant 0 : i32
    %c0_i32_1 = arith.constant 0 : i32
    return %c0_i32, %c0_i32_0 : i32, i32
  }
  func.func @transform_5(%arg0: i32) -> (i32, i32, i32) {
    %c0_i32 = arith.constant 0 : i32
    %c0_i32_0 = arith.constant 0 : i32
    %c0_i32_1 = arith.constant 0 : i32
    %c0_i32_2 = arith.constant 0 : i32
    return %c0_i32, %c0_i32_0, %c0_i32_1 : i32, i32, i32
  }
  func.func @transform_6(%arg0: i32) -> (i32, i32, i32) {
    %c0_i32 = arith.constant 0 : i32
    %c0_i32_0 = arith.constant 0 : i32
    %c0_i32_1 = arith.constant 0 : i32
    %c0_i32_2 = arith.constant 0 : i32
    return %c0_i32, %c0_i32_0, %c0_i32_1 : i32, i32, i32
  }
  func.func @transform_7(%arg0: i32) -> (i32, i32, i32) {
    %c0_i32 = arith.constant 0 : i32
    %c0_i32_0 = arith.constant 0 : i32
    %c0_i32_1 = arith.constant 0 : i32
    %c0_i32_2 = arith.constant 0 : i32
    return %c0_i32, %c0_i32_0, %c0_i32_1 : i32, i32, i32
  }
  func.func @transform_8(%arg0: i32) -> (i32, i32, i32) {
    %c0_i32 = arith.constant 0 : i32
    %c0_i32_0 = arith.constant 0 : i32
    %c0_i32_1 = arith.constant 0 : i32
    %c0_i32_2 = arith.constant 0 : i32
    return %c0_i32, %c0_i32_0, %c0_i32_1 : i32, i32, i32
  }
  func.func @transform_9(%arg0: i32) -> (i32, i32, i32) {
    %c0_i32 = arith.constant 0 : i32
    %c0_i32_0 = arith.constant 0 : i32
    %c0_i32_1 = arith.constant 0 : i32
    %c0_i32_2 = arith.constant 0 : i32
    return %c0_i32, %c0_i32_0, %c0_i32_1 : i32, i32, i32
  }
  func.func @transform_10(%arg0: i32) -> (i32, i32, i32) {
    %c0_i32 = arith.constant 0 : i32
    %c0_i32_0 = arith.constant 0 : i32
    %c0_i32_1 = arith.constant 0 : i32
    %c0_i32_2 = arith.constant 0 : i32
    return %c0_i32, %c0_i32_0, %c0_i32_1 : i32, i32, i32
  }
  func.func @transform_11(%arg0: i32) -> (i32, i32) {
    %c0_i32 = arith.constant 0 : i32
    %c0_i32_0 = arith.constant 0 : i32
    %c0_i32_1 = arith.constant 0 : i32
    return %c0_i32, %c0_i32_0 : i32, i32
  }
  func.func @transform_12(%arg0: i32) -> (i32, i32) {
    %c0_i32 = arith.constant 0 : i32
    %c0_i32_0 = arith.constant 0 : i32
    return %arg0, %c0_i32 : i32, i32
  }
}

</mosaic_0001>

<bundles_post_ra>
// kernel: cnn_forward.1
= control target key start
LH: loop header
LB: loop body
LE: loop exit
PB: predicated region body
PF: predicated region fallthrough
CT: control target
= control target key end

     0   :  { %s9632_s0 = inlined_call_operand.vmem [shape: f32[448,28], index: 0, kind: input, shape index: {}]   ;;  %s9633_s1 = inlined_call_operand.hbm [shape: f32[5,28,144], index: 1, kind: input, shape index: {}]   ;;  %s9634_s2 = inlined_call_operand.vmem [shape: f32[1,144], index: 2, kind: input, shape index: {}]   ;;  %s9635_s3 = inlined_call_operand.hbm [shape: f32[5,72,96], index: 3, kind: input, shape index: {}]   ;;  %s9636_s4 = inlined_call_operand.vmem [shape: f32[1,96], index: 4, kind: input, shape index: {}]   ;;  %s9637_s5 = inlined_call_operand.hbm [shape: f32[2,96,224], index: 5, kind: input, shape index: {}]   ;;  %s9638_s6 = inlined_call_operand.hbm [shape: f32[2,144,72], index: 6, kind: input, shape index: {}]   ;;  %s9639_s7 = inlined_call_operand.vmem [shape: f32[2,32,96], index: 7, kind: input, shape index: {}]   ;;  %s9640_s8 = inlined_call_operand.vmem [shape: f32[2,96,48], index: 8, kind: input, shape index: {}]   ;;  %s9641_s9 = inlined_call_operand.hbm [shape: f32[4,8,32], index: 9, kind: input, shape index: {}]   ;;  %s9642_s10 = inlined_call_operand.vmem [shape: f32[4,48,10], index: 10, kind: input, shape index: {}]   ;;  %s9643_s11 = inlined_call_operand.vmem [shape: f32[1,10], index: 11, kind: input, shape index: {}]   ;;  %s9644_s12 = inlined_call_operand.hbm [shape: f32[16,10], index: 12, kind: output, shape index: {}]  }
   0x1   :  { %9721 = sst [smem:[#allocation143_spill]] %s9635_s3 }
   0x2   :  { %17 = vsyncpa [#allocation3], 0 }
   0x3   :  { %18 = vsyncpa [#allocation6], 0 }
   0x4   :  { %19 = vsyncpa [#allocation9], 0 }
   0x5   :  { %20 = vsyncpa [#allocation4], 0 }
   0x6   :  { %22 = vsyncpa [#allocation4 + $0x1], 0  ;;  %s6949_s21 = smov 0   ;;  %s6951_s22 = smov 0  }
   0x7   :  { %s6953_s23 = smov 0   ;;  %s6955_s24 = smov 0  }
   0x8 LB: > { %9722 = sst [smem:[#allocation16_spill]] %s6866_s23  ;;  %s6970_s25 = sadd.s32 4294967295, %s6870_s24   ;;  %s6870_s24 = sphi %s6955_s24, %s10114_s24   ;;  %s6866_s23 = sphi %s6953_s23, %s10116_s23   ;;  %s6862_s22 = sphi %s6951_s22, %s10118_s22   ;;  %s6858_s21 = sphi %s6949_s21, %s10117_s21  }
   0x9   : > { %s5567_s26 = sadd.s32 4294967294, %s6870_s24   ;;  %s6974_s27 = sadd.s32 1, %s6870_s24  }
   0xa   : > { %9723 = sst [smem:[#allocation17_spill]] %s6974_s27  ;;  %s292_s28 = sadd.s32 1, %s6866_s23 }
   0xb   : > { %s289_s29 = ssub.s32 %s6870_s24, %s6974_s27  ;;  %p302_p0 = scmp.ne.s32.totalorder %s6866_s23, %s6862_s22 }
   0xc   : > { %p290_p1 = scmp.eq.s32.totalorder %s289_s29, 0  ;;  %p303_p2 = scmp.eq.s32.totalorder %s6970_s25, 1 }
   0xd   : > { %p308_p3 = scmp.ne.s32.totalorder %s6862_s22, %s6858_s21  ;;  %p309_p4 = scmp.eq.s32.totalorder %s5567_s26, 1 }
   0xe   : > { %s6985_s30 = scalar_select %p290_p1, %s6866_s23, %s292_s28  }
   0xf   : > { %p6987_p5 = por %p303_p2, %p302_p0  ;;  %p6991_p6 = por %p309_p4, %p308_p3 }
  0x10   : > { %9724 = sst [smem:[#allocation18_spill]] %s6985_s30  ;;  %p5568_p7 = scmp.ge.s32.totalorder %s6870_s24, 1 }
  0x11   : > { %s9725_s13 = scalar_select %p6987_p5, 1, 0 }
  0x12   : > { %s9726_s14 = scalar_select %p6991_p6, 1, 0 }
  0x13   : > { %p316_p8 = scmp.lt.s32.totalorder %s6870_s24, 3  ;;  %p9649_p9 = scmp.eq.s32.totalorder %s6970_s25, 0 }
  0x14   : > { %9727 = sst [smem:[#allocation19_spill]] %s9726_s14  ;;  %s6872_s16 = smov [#allocation5]  }
  0x15   : > { %p6998_p10 = pnand %p5568_p7, %p316_p8  ;;  %s344_s17 = sshll.u32 %s6872_s16, 4  ;;  %s345_s17 = int_to_ptr.vmem [resolvable:$true] %s344_s17 }
  0x16   : > { %s6873_s19 = smov [#allocation8]   ;;  %s6874_s26 = smov [#allocation2]  }
  0x17   : > { %s9728_s15 = scalar_select %p6998_p10, 1, 0 }
  0x18   : > { %p6584_p11 = pneg %p6998_p10  ;;  %s373_s20 = sshll.u32 %s6873_s19, 4  ;;  %s374_s20 = int_to_ptr.vmem [resolvable:$true] %s373_s20 }
  0x19   : > { %s328_s28 = sshll.u32 %s6874_s26, 4  ;;  %s6679_s16 = scalar_lea.vmem %s345_s17, 5760  ;;  %s329_s28 = int_to_ptr.vmem [resolvable:$true] %s328_s28 }
  0x1a   : > { %p7006_p12 = pnand %p9649_p9, %p6584_p11  ;;  %p6680_p0 = scmp.ne.s32.totalorder %s345_s17, %s6679_s16 }
  0x1b   : > { %p6687_p3 = scmp.lt.s32.totalorder %s345_s17, %s345_s17  ;;  %p6688_p4 = scmp.lt.s32.totalorder %s6679_s16, %s6679_s16 }
  0x1c   : > { %p7012_p13 = pneg %p7006_p12 }
  0x1d   : > { %p6689_p7 = por %p6688_p4, %p6687_p3 }
  0x1e   : > { %p6682_p1 = pnand %p6680_p0, %p7012_p13 }
  0x20   : > { %p6683_p2 = pneg %p6682_p1 }
  0x22   : > { %p6690_p8 = pnand %p6689_p7, %p6683_p2 }
  0x24   : > { %6693 = shalt.err (!%p6690_p8)
}
  0x25   : > { %s9650_s19 = smov 128   ;;  %s9651_s26 = smov 8  }
  0x26   : > { %s9731_s3 = sld [smem:[#allocation143_spill]]  ;;  %s6705_s27 = scalar_lea.vmem %s374_s20, 4608 }
  0x27   : > { %p6706_p11 = scmp.ne.s32.totalorder %s374_s20, %s6705_s27  ;;  %p6713_p3 = scmp.lt.s32.totalorder %s374_s20, %s374_s20 }
  0x28   : > { %p6714_p2 = scmp.lt.s32.totalorder %s6705_s27, %s6705_s27 }
  0x29   : > { %p6708_p0 = pnand %p6706_p11, %p7012_p13 }
  0x2a   : > { %p6715_p4 = por %p6714_p2, %p6713_p3 }
  0x2b   : > { %p6709_p1 = pneg %p6708_p0 }
  0x2c   : > { %6590 = dma.hbm_to_vmem [thread:$0]  (!%p7006_p12), %s9731_s3, 5760, %s345_s17, [#allocation6], %s9650_s19, %s9650_s19, %s9651_s26  }
  0x2d   : > { %p6716_p7 = pnand %p6715_p4, %p6709_p1 }
  0x2f   : > { %6719 = shalt.err (!%p6716_p7)
}
  0x30   : > { %6596 = dma.hbm_to_vmem [thread:$0]  (!%p7006_p12), %s9638_s6, 4608, %s374_s20, [#allocation9], %s9650_s19, %s9650_s19, %s9651_s26  }
  0x31   : > { %s6731_s23 = scalar_lea.vmem %s329_s28, 5120  ;;  %p6739_p9 = scmp.lt.s32.totalorder %s329_s28, %s329_s28 }
  0x32   : > { %p6732_p8 = scmp.ne.s32.totalorder %s329_s28, %s6731_s23  ;;  %p6740_p3 = scmp.lt.s32.totalorder %s6731_s23, %s6731_s23 }
  0x34   : > { %p6734_p11 = pnand %p6732_p8, %p7012_p13  ;;  %p6741_p1 = por %p6740_p3, %p6739_p9 }
  0x36   : > { %p6735_p0 = pneg %p6734_p11 }
  0x38   : > { %p6742_p2 = pnand %p6741_p1, %p6735_p0 }
  0x3a   : > { %6745 = shalt.err (!%p6742_p2)
}
  0x3b   : > { %s6877_s27 = smov 256   ;;  %s6878_s30 = smov 16  }
  0x3c   : > { %6587 = dma.hbm_to_vmem [thread:$0]  (!%p7006_p12), %s9633_s1, 5120, %s329_s28, [#allocation3], %s6877_s27, %s6877_s27, %s6878_s30  }
  0x3d   : > { %s6879_s20 = smov [#allocation7]   ;;  %s6880_s19 = smov [#allocation10]  }
  0x3e   : > { %s360_s16 = sshll.u32 %s6879_s20, 4  ;;  %s392_s26 = sshll.u32 %s6880_s19, 4  ;;  %s361_s16 = int_to_ptr.vmem [resolvable:$true] %s360_s16  ;;  %s393_s26 = int_to_ptr.vmem [resolvable:$true] %s392_s26 }
  0x3f   : > { %s6757_s3 = scalar_lea.vmem %s361_s16, 6144  ;;  %p6765_p8 = scmp.lt.s32.totalorder %s361_s16, %s361_s16 }
  0x40   : > { %p6758_p4 = scmp.ne.s32.totalorder %s361_s16, %s6757_s3  ;;  %p6766_p11 = scmp.lt.s32.totalorder %s6757_s3, %s6757_s3 }
  0x42   : > { %p6760_p9 = pnand %p6758_p4, %p7012_p13  ;;  %p6767_p0 = por %p6766_p11, %p6765_p8 }
  0x44   : > { %p6761_p7 = pneg %p6760_p9 }
  0x46   : > { %p6768_p3 = pnand %p6767_p0, %p6761_p7 }
  0x48   : > { %6771 = shalt.err (!%p6768_p3)
}
  0x49   : > { %6593 = dma.hbm_to_vmem [thread:$0]  (!%p7006_p12), %s9637_s5, 6144, %s361_s16, [#allocation6], %s6877_s27, %s6877_s27, %s6878_s30  }
  0x4a   : > { %s6783_s28 = scalar_lea.vmem %s393_s26, 512  ;;  %p6791_p4 = scmp.lt.s32.totalorder %s393_s26, %s393_s26 }
  0x4b   : > { %p6784_p1 = scmp.ne.s32.totalorder %s393_s26, %s6783_s28  ;;  %p6792_p9 = scmp.lt.s32.totalorder %s6783_s28, %s6783_s28 }
  0x4d   : > { %p6786_p2 = pnand %p6784_p1, %p7012_p13  ;;  %p6793_p5 = por %p6792_p9, %p6791_p4 }
  0x4f   : > { %p6787_p6 = pneg %p6786_p2 }
  0x51   : > { %p6794_p10 = pnand %p6793_p5, %p6787_p6 }
  0x53   : > { %6797 = shalt.err (!%p6794_p10)
}
  0x54   : > { %s9732_s3 = smov 8   ;;  %s9733_s19 = smov 128  }
  0x55   : > { %6599 = dma.hbm_to_vmem [thread:$0]  (!%p7006_p12), %s9641_s9, 512, %s393_s26, [#allocation9], %s9733_s19, %s9733_s19, %s9732_s3  }
  0x56   : > { %p9734_p7 = scmp.ne.s32.totalorder %s9728_s15, 0 }
  0x58   : > { %423 = sbr.rel (%p9734_p7) target bundleno = 2688 (0xa80), region = 68 }
  0x5d   : > { %p9735_p13 = scmp.eq.s32.totalorder %s6970_s25, 0 }
  0x5f   : > { %6841 = dma.done.wait (%p9735_p13), [#allocation3], 5120   ;;  %p9736_p8 = pmov %p9735_p13 }
  0x61   : > { %6843 = vsyncadd (%p9736_p8), [#allocation3], 4294962176  ;;  %p9737_p5 = pmov %p9736_p8 }
  0x63   : > { %6845 = dma.done.wait (%p9737_p5), [#allocation6], 11904   ;;  %p9738_p6 = pmov %p9737_p5 }
  0x64   : > { %p9739_p10 = pmov %p9737_p5 }
  0x65   : > { %6847 = vsyncadd (%p9738_p6), [#allocation6], 4294955392 }
  0x66   : > { %6849 = dma.done.wait (%p9739_p10), [#allocation9], 5120   ;;  %p9740_p12 = pmov %p9737_p5 }
  0x67   : > { %s481_s15 = smul.u32 28, %s6970_s25  ;;  %v9655_v0 = vmov 0.0   ;;  %vm677_vm0 = vcmask 1043456   ;;  %v618_v1 = vld [vmem:[#allocation2 + $0x78] sm:$0xf]  ;;  %v616_v5 = vld [vmem:[#allocation2 + $0x68] sm:$0xff] }
  0x68   : > { %6851 = vsyncadd (%p9740_p12), [#allocation9], 4294962176  ;;  %748 = vmatprep.mubr.f32.mxu0 %v9655_v0  ;;  %1043 = vmatprep.mubr.f32.mxu1 %v9655_v0  ;;  %v522_v2 = vld [vmem:[#allocation2 + $0x38] sm:$0xf]  ;;  %v617_v3 = vld [vmem:[#allocation2 + $0x70] sm:$0xf] }
  0x69   : > { %p482_p11 = scmp.lt.s32.totalorder %s481_s15, 55  ;;  %5583 = vmatprep.subr.msk.mxu0 %vm677_vm0, %v618_v1  ;;  %5613 = vmatprep.subr.msk.mxu1 %vm677_vm0, %v522_v2  ;;  %v521_v4 = vld [vmem:[#allocation2 + $0x30] sm:$0xf]  ;;  %v520_v6 = vld [vmem:[#allocation2 + $0x28] sm:$0xff]  ;;  %v615_v7 = vld [vmem:[#allocation2 + $0x60] sm:$0xff]  ;;  %vm551_vm1 = vcmask 1046528  }
  0x6a   : > { %5584 = vmatpush1.msk.msra.mxu0 %vm677_vm0, %v617_v3  ;;  %5614 = vmatpush1.msk.msra.mxu1 %vm677_vm0, %v521_v4  ;;  %v519_v8 = vld [vmem:[#allocation2 + $0x20] sm:$0xff]  ;;  %v614_v9 = vld [vmem:[#allocation2 + $0x58] sm:$0xff]  ;;  %v613_v11 = vld [vmem:[#allocation2 + $0x50] sm:$0xff]  ;;  %vm619_vm2 = vcmask 228352   ;;  %vm1212_vm3 = vcmask 1045504   ;;  %vm1632_vm4 = vcmask 1044480  }
  0x6b   : > { %s10120_s15 = smov (!%p482_p11, %s481_s15), 55  ;;  %710 = vmatprep.subr.mxu0 %v616_v5  ;;  %1005 = vmatprep.subr.mxu1 %v520_v6  ;;  %v518_v10 = vld [vmem:[#allocation2 + $0x18] sm:$0xff]  ;;  %v517_v12 = vld [vmem:[#allocation2 + $0x10] sm:$0xff]  ;;  %v612_v13 = vld [vmem:[#allocation2 + $0x48] sm:$0xff]  ;;  %vm2619_vm5 = vcmask 785408   ;;  %vm3033_vm6 = vcmask 130048  }
  0x6c   : > { %s5582_s18 = sshll.u32 %s10120_s15, 3  ;;  %711 = vmatpush1.msra.mxu0 %v615_v7  ;;  %1006 = vmatpush1.msra.mxu1 %v519_v8  ;;  %v516_v14 = vld [vmem:[#allocation2 + $0x8] sm:$0xff]  ;;  %v611_v15 = vld [vmem:[#allocation2 + $0x40] sm:$0xff]  ;;  %v1279_v25 = vld [vmem:[#allocation2 + $0xb8] sm:$0xf]  ;;  %vm3408_vm7 = vcmask 588800  }
  0x6d   : > { %s7084_s27 = scalar_lea.vmem %s9632_s0, %s5582_s18  ;;  %712 = vmatprep.subr.mxu0 %v614_v9  ;;  %1007 = vmatprep.subr.mxu1 %v518_v10  ;;  %v515_v16 = vld [vmem:[#allocation2] sm:$0xff]  ;;  %v1278_v26 = vld [vmem:[#allocation2 + $0xb0] sm:$0xf]  ;;  %v1277_v30 = vld [vmem:[#allocation2 + $0xa8] sm:$0xff]  ;;  %vm4759_vm8 = vcmask 392192   ;;  %vm6882_vm9 = vmmov 0  }
  0x6e   : > { %v7087_v17 = vld [vmem:[%s7084_s27] sm:$0xff]  ;;  %v7090_v18 = vld [vmem:[%s7084_s27 + $0x8] sm:$0xff]  ;;  %713 = vmatpush1.msra.mxu0 %v613_v11  ;;  %1008 = vmatpush1.msra.mxu1 %v517_v12  ;;  %v7095_v21 = vld [vmem:[%s7084_s27 + $0x10] sm:$0xff]  ;;  %vm4857_vm10 = vcmask 261120   ;;  %s478_s19 = sand.u32 1, %s6862_s22   ;;  %s5914_s20 = sshll.u32 %s6970_s25, 7 }
  0x6f   : > { %v552_v19 = vrot.slane %v7087_v17, 1  ;;  %v553_v20 = vrot.slane %v7090_v18, 1  ;;  %714 = vmatprep.subr.mxu0 %v612_v13  ;;  %1009 = vmatprep.subr.mxu1 %v516_v14  ;;  %v555_v22 = vrot.slane %v7095_v21, 1  ;;  %v7099_v23 = vld [vmem:[%s7084_s27 + $0x18] sm:$0xff]  ;;  %v7112_v29 = vld [vmem:[%s7084_s27 + $0x20] sm:$0xff]  ;;  %v7124_v34 = vld [vmem:[%s7084_s27 + $0x28] sm:$0xff] }
  0x70   : > { %715 = vmatpush1.msra.mxu0 %v611_v15  ;;  %1010 = vmatpush1.msra.mxu1 %v515_v16  ;;  %v557_v28 = vrot.slane %v7099_v23, 1  ;;  %v1276_v31 = vld [vmem:[#allocation2 + $0xa0] sm:$0xff]  ;;  %v559_v33 = vrot.slane %v7112_v29, 1  ;;  %v1275_v35 = vld [vmem:[#allocation2 + $0x98] sm:$0xff]  ;;  %v1274_v36 = vld [vmem:[#allocation2 + $0x90] sm:$0xff]  ;;  %v561_v40 = vrot.slane %v7124_v34, 1 }
  0x71   : > { %v554_v24 = vsel %vm551_vm1, %v552_v19, %v553_v20  ;;  %5615 = vmatmul.mubr.msk.f32.vlgmr.msra.gmra.mxu1 %vm619_vm2, %v7087_v17  ;;  %v556_v27 = vsel %vm551_vm1, %v553_v20, %v555_v22  ;;  %5643 = vmatprep.subr.msk.mxu0 %vm677_vm0, %v1279_v25  ;;  %v1699_v37 = vld [vmem:[#allocation2 + $0xf8] sm:$0xf]  ;;  %v1698_v38 = vld [vmem:[#allocation2 + $0xf0] sm:$0xf]  ;;  %v1697_v42 = vld [vmem:[#allocation2 + $0xe8] sm:$0xff]  ;;  %s5581_s14 = sshll.u32 %s478_s19, 3 }
  0x72   : > { %5585 = vmatmul.mubr.msk.f32.vlgmr.msra.gmra.mxu0 %vm619_vm2, %v554_v24  ;;  %1049 = vmatprep.mubr.f32.mxu1 %v9655_v0  ;;  %v558_v32 = vsel %vm551_vm1, %v555_v22, %v557_v28  ;;  %v560_v39 = vsel %vm551_vm1, %v557_v28, %v559_v33  ;;  %v7134_v41 = vld [vmem:[%s7084_s27 + $0x30] sm:$0xff]  ;;  %v1273_v43 = vld [vmem:[#allocation2 + $0x88] sm:$0xff]  ;;  %v1696_v44 = vld [vmem:[#allocation2 + $0xe0] sm:$0xff]  ;;  %v562_v46 = vsel %vm551_vm1, %v559_v33, %v561_v40  ;;  %s480_s15 = scalar_lea.vmem [#allocation11], %s5581_s14  ;;  %vm5442_vm11 = vcmask 80896   ;;  %s5445_s30 = scalar_lea.sflag [#allocation4], %s478_s19 }
  0x73   : > { %754 = vmatprep.mubr.f32.mxu0 %v9655_v0  ;;  %5644 = vmatpush1.msk.msra.mxu0 %vm677_vm0, %v1278_v26  ;;  %v1272_v45 = vld [vmem:[#allocation2 + $0x80] sm:$0xff]  ;;  %v563_v47 = vrot.slane %v7134_v41, 1  ;;  %v7146_v48 = vld [vmem:[%s7084_s27 + $0x38] sm:$0xff]  ;;  %v1694_v50 = vld [vmem:[#allocation2 + $0xd0] sm:$0xff]  ;;  %s5458_s18 = sshll.u32 %s480_s15, 4  ;;  %p10111_p3 = scmp.ne.s32.totalorder %s9725_s13, 0  ;;  %s5459_s18 = int_to_ptr.vmem [resolvable:$true] %s5458_s18 }
  0x74   : > { %1369 = vmatprep.subr.mxu0 %v1277_v30  ;;  %5673 = vmatprep.subr.msk.mxu1 %vm677_vm0, %v1699_v37  ;;  %v1695_v49 = vld [vmem:[#allocation2 + $0xd8] sm:$0xff]  ;;  %v565_v52 = vrot.slane %v7146_v48, 1  ;;  %v7156_v53 = vld [vmem:[%s7084_s27 + $0x40] sm:$0xff]  ;;  %v1693_v54 = vld [vmem:[#allocation2 + $0xc8] sm:$0xff]  ;;  %s6798_s16 = scalar_lea.vmem %s5459_s18, 128  ;;  %s6883_s25 = smov [#allocation11]  }
  0x75   : > { %5616 = vmatmul.mubr.msk.f32.gmra.mxu1 %vm619_vm2, %v7090_v18  ;;  %1370 = vmatpush1.msra.mxu0 %v1276_v31  ;;  %v564_v51 = vsel %vm551_vm1, %v561_v40, %v563_v47  ;;  %v1692_v55 = vld [vmem:[#allocation2 + $0xc0] sm:$0xff]  ;;  %v567_v57 = vrot.slane %v7156_v53, 1  ;;  %v2118_v58 = vld [vmem:[#allocation2 + $0x138] sm:$0xf]  ;;  %v7166_v59 = vld [vmem:[%s7084_s27 + $0x48] sm:$0xff]  ;;  %p6799_p0 = scmp.ne.s32.totalorder %s5459_s18, %s6798_s16  ;;  %s6802_s23 = sshll.u32 %s6883_s25, 4  ;;  %s6803_s23 = int_to_ptr.vmem [resolvable:$false] %s6802_s23 }
  0x76   : > { %5586 = vmatmul.mubr.msk.f32.gmra.mxu0 %vm619_vm2, %v556_v27  ;;  %1055 = vmatprep.mubr.f32.mxu1 %v9655_v0  ;;  %v566_v56 = vsel %vm551_vm1, %v563_v47, %v565_v52  ;;  %v569_v61 = vrot.slane %v7166_v59, 1  ;;  %v7177_v62 = vld [vmem:[%s7084_s27 + $0x50] sm:$0xff]  ;;  %v7187_v2 = vld [vmem:[%s7084_s27 + $0x58] sm:$0xff]  ;;  %v7197_v5 = vld [vmem:[%s7084_s27 + $0x60] sm:$0xff]  ;;  %s6804_s17 = scalar_lea.vmem %s6803_s23, 256  ;;  %p6805_p4 = scmp.lt.s32.totalorder %s5459_s18, %s6803_s23 }
  0x77   : > { %760 = vmatprep.mubr.f32.mxu0 %v9655_v0  ;;  %1371 = vmatprep.subr.mxu0 %v1275_v35  ;;  %v568_v60 = vsel %vm551_vm1, %v565_v52, %v567_v57  ;;  %v571_v1 = vrot.slane %v7177_v62, 1  ;;  %v573_v4 = vrot.slane %v7187_v2, 1  ;;  %v575_v7 = vrot.slane %v7197_v5, 1  ;;  %v7207_v8 = vld [vmem:[%s7084_s27 + $0x68] sm:$0xff]  ;;  %v7217_v11 = vld [vmem:[%s7084_s27 + $0x70] sm:$0xff]  ;;  %v7227_v14 = vld [vmem:[%s7084_s27 + $0x78] sm:$0xff]  ;;  %p6800_p1 = pnand %p6799_p0, %p10111_p3  ;;  %p6806_p9 = scmp.lt.s32.totalorder %s6804_s17, %s6798_s16 }
  0x78   : > { %1372 = vmatpush1.msra.mxu0 %v1274_v36  ;;  %5674 = vmatpush1.msk.msra.mxu1 %vm677_vm0, %v1698_v38  ;;  %v570_v63 = vsel %vm551_vm1, %v567_v57, %v569_v61  ;;  %v577_v10 = vrot.slane %v7207_v8, 1  ;;  %v579_v13 = vrot.slane %v7217_v11, 1  ;;  %v581_v16 = vrot.slane %v7227_v14, 1  ;;  %v7237_v20 = vld [vmem:[%s7084_s27 + $0x80] sm:$0xff]  ;;  %v7247_v25 = vld [vmem:[%s7084_s27 + $0x88] sm:$0xff]  ;;  %v7257_v28 = vld [vmem:[%s7084_s27 + $0x90] sm:$0xff] }
  0x79   : > { %5617 = vmatmul.mubr.msk.f32.gmra.mxu1 %vm619_vm2, %v7095_v21  ;;  %1789 = vmatprep.subr.mxu1 %v1697_v42  ;;  %v572_v3 = vsel %vm551_vm1, %v569_v61, %v571_v1  ;;  %v574_v6 = vsel %vm551_vm1, %v571_v1, %v573_v4  ;;  %v576_v9 = vsel %vm551_vm1, %v573_v4, %v575_v7  ;;  %v583_v24 = vrot.slane %v7237_v20, 1  ;;  %v7277_v36 = vld [vmem:[%s7084_s27 + $0xa0] sm:$0xff]  ;;  %v7337_v57 = vld [vmem:[%s7084_s27 + $0xd0] sm:$0xff]  ;;  %v7347_v61 = vld [vmem:[%s7084_s27 + $0xd8] sm:$0xff]  ;;  %p6801_p2 = pneg %p6800_p1  ;;  %p6807_p7 = por %p6806_p9, %p6805_p4 }
  0x7a   : > { %5587 = vmatmul.mubr.msk.f32.gmra.mxu0 %vm619_vm2, %v558_v32  ;;  %1061 = vmatprep.mubr.f32.mxu1 %v9655_v0  ;;  %v578_v12 = vsel %vm551_vm1, %v575_v7, %v577_v10  ;;  %v580_v15 = vsel %vm551_vm1, %v577_v10, %v579_v13  ;;  %v582_v22 = vsel %vm551_vm1, %v579_v13, %v581_v16  ;;  %v585_v27 = vrot.slane %v7247_v25, 1  ;;  %v7267_v32 = vld [vmem:[%s7084_s27 + $0x98] sm:$0xff] }
  0x7b   : > { %766 = vmatprep.mubr.f32.mxu0 %v9655_v0  ;;  %1373 = vmatprep.subr.mxu0 %v1273_v43  ;;  %v584_v26 = vsel %vm551_vm1, %v581_v16, %v583_v24  ;;  %v587_v31 = vrot.slane %v7257_v28, 1  ;;  %v589_v35 = vrot.slane %v7267_v32, 1  ;;  %v591_v38 = vrot.slane %v7277_v36, 1  ;;  %v7297_v43 = vld [vmem:[%s7084_s27 + $0xb0] sm:$0xff]  ;;  %p6808_p13 = pnand %p6807_p7, %p6801_p2 }
  0x7c   : > { %1790 = vmatpush1.msra.mxu1 %v1696_v44  ;;  %1374 = vmatpush1.msra.mxu0 %v1272_v45  ;;  %v586_v30 = vsel %vm551_vm1, %v583_v24, %v585_v27  ;;  %v595_v45 = vrot.slane %v7297_v43, 1  ;;  %v605_v1 = vrot.slane %v7347_v61, 1  ;;  %v1213_v4 = vrot.slane %v7087_v17, 2  ;;  %v2117_v16 = vld [vmem:[#allocation2 + $0x130] sm:$0xf] }
  0x7d   : > { %5618 = vmatmul.mubr.msk.f32.gmra.mxu1 %vm619_vm2, %v7099_v23  ;;  %1791 = vmatprep.subr.mxu1 %v1695_v49  ;;  %v588_v33 = vsel %vm551_vm1, %v585_v27, %v587_v31  ;;  %v590_v37 = vsel %vm551_vm1, %v587_v31, %v589_v35  ;;  %v592_v40 = vsel %vm551_vm1, %v589_v35, %v591_v38  ;;  %v1214_v7 = vrot.slane %v7090_v18, 2  ;;  %v2115_v31 = vld [vmem:[#allocation2 + $0x120] sm:$0xff] }
  0x7e   : > { %5588 = vmatmul.mubr.msk.f32.gmra.mxu0 %vm619_vm2, %v560_v39  ;;  %1067 = vmatprep.mubr.f32.mxu1 %v9655_v0  ;;  %v7287_v39 = vld [vmem:[%s7084_s27 + $0xa8] sm:$0xff]  ;;  %v1634_v10 = vrot.slane %v7090_v18, 3  ;;  %v1216_v13 = vrot.slane %v7095_v21, 2  ;;  %v1218_v27 = vrot.slane %v7099_v23, 2 }
  0x7f   : > { %772 = vmatprep.mubr.f32.mxu0 %v9655_v0  ;;  %1792 = vmatpush1.msra.mxu1 %v1694_v50  ;;  %v593_v42 = vrot.slane %v7287_v39, 1  ;;  %v7317_v50 = vld [vmem:[%s7084_s27 + $0xc0] sm:$0xff] }
  0x80   : > { %1793 = vmatprep.subr.mxu1 %v1693_v54  ;;  %5703 = vmatprep.subr.msk.mxu0 %vm677_vm0, %v2118_v58  ;;  %v599_v52 = vrot.slane %v7317_v50, 1  ;;  %v7327_v54 = vld [vmem:[%s7084_s27 + $0xc8] sm:$0xff]  ;;  %v1217_v24 = vsel %vm1212_vm3, %v1214_v7, %v1216_v13  ;;  %v1219_v35 = vsel %vm1212_vm3, %v1216_v13, %v1218_v27  ;;  %v1230_v13 = vrot.slane %v7166_v59, 2 }
  0x81   : > { %5619 = vmatmul.mubr.msk.f32.gmra.mxu1 %vm619_vm2, %v7112_v29  ;;  %v594_v44 = vsel %vm551_vm1, %v591_v38, %v593_v42  ;;  %v596_v47 = vsel %vm551_vm1, %v593_v42, %v595_v45  ;;  %v1220_v38 = vrot.slane %v7112_v29, 2  ;;  %v2112_v42 = vld [vmem:[#allocation2 + $0x108] sm:$0xff] }
  0x82   : > { %5589 = vmatmul.mubr.msk.f32.gmra.mxu0 %vm619_vm2, %v562_v46  ;;  %1073 = vmatprep.mubr.f32.mxu1 %v9655_v0  ;;  %v7307_v46 = vld [vmem:[%s7084_s27 + $0xb8] sm:$0xff] }
  0x83   : > { %778 = vmatprep.mubr.f32.mxu0 %v9655_v0  ;;  %1794 = vmatpush1.msra.mxu1 %v1692_v55  ;;  %v597_v49 = vrot.slane %v7307_v46, 1 }
  0x85   : > { %5620 = vmatmul.mubr.msk.f32.gmra.mxu1 %vm619_vm2, %v7124_v34  ;;  %v600_v55 = vsel %vm551_vm1, %v597_v49, %v599_v52 }
  0x86   : > { %5590 = vmatmul.mubr.msk.f32.gmra.mxu0 %vm619_vm2, %v564_v51  ;;  %1079 = vmatprep.mubr.f32.mxu1 %v9655_v0  ;;  %v598_v51 = vsel %vm551_vm1, %v595_v45, %v597_v49  ;;  %v2111_v49 = vld [vmem:[#allocation2 + $0x100] sm:$0xff] }
  0x87   : > { %784 = vmatprep.mubr.f32.mxu0 %v9655_v0 }
  0x89   : > { %5621 = vmatmul.mubr.msk.f32.gmra.mxu1 %vm619_vm2, %v7134_v41 }
  0x8a   : > { %5591 = vmatmul.mubr.msk.f32.gmra.mxu0 %vm619_vm2, %v566_v56  ;;  %1085 = vmatprep.mubr.f32.mxu1 %v9655_v0  ;;  %v601_v56 = vrot.slane %v7327_v54, 1 }
  0x8b   : > { %790 = vmatprep.mubr.f32.mxu0 %v9655_v0 }
  0x8c   : > { %v602_v58 = vsel %vm551_vm1, %v599_v52, %v601_v56 }
  0x8d   : > { %5622 = vmatmul.mubr.msk.f32.gmra.mxu1 %vm619_vm2, %v7146_v48 }
  0x8e   : > { %5592 = vmatmul.mubr.msk.f32.gmra.mxu0 %vm619_vm2, %v568_v60  ;;  %1091 = vmatprep.mubr.f32.mxu1 %v9655_v0  ;;  %v603_v60 = vrot.slane %v7337_v57, 1 }
  0x8f   : > { %796 = vmatprep.mubr.f32.mxu0 %v9655_v0 }
  0x91   : > { %5623 = vmatmul.mubr.msk.f32.gmra.mxu1 %vm619_vm2, %v7156_v53 }
  0x92   : > { %5593 = vmatmul.mubr.msk.f32.gmra.mxu0 %vm619_vm2, %v570_v63  ;;  %1097 = vmatprep.mubr.f32.mxu1 %v9655_v0  ;;  %v604_v63 = vsel %vm551_vm1, %v601_v56, %v603_v60  ;;  %v1644_v56 = vrot.slane %v7134_v41, 3 }
  0x93   : > { %802 = vmatprep.mubr.f32.mxu0 %v9655_v0 }
  0x95   : > { %5624 = vmatmul.mubr.msk.f32.gmra.mxu1 %vm619_vm2, %v7166_v59 }
  0x96   : > { %5594 = vmatmul.mubr.msk.f32.gmra.mxu0 %vm619_vm2, %v572_v3  ;;  %1103 = vmatprep.mubr.f32.mxu1 %v9655_v0  ;;  %v606_v3 = vsel %vm551_vm1, %v603_v60, %v605_v1 }
  0x97   : > { %808 = vmatprep.mubr.f32.mxu0 %v9655_v0 }
  0x99   : > { %5625 = vmatmul.mubr.msk.f32.gmra.mxu1 %vm619_vm2, %v7177_v62 }
  0x9a   : > { %5595 = vmatmul.mubr.msk.f32.gmra.mxu0 %vm619_vm2, %v574_v6  ;;  %1109 = vmatprep.mubr.f32.mxu1 %v9655_v0  ;;  %v609_v6 = vsel %vm551_vm1, %v605_v1, %v552_v19  ;;  %v1646_v1 = vrot.slane %v7146_v48, 3 }
  0x9b   : > { %814 = vmatprep.mubr.f32.mxu0 %v9655_v0 }
  0x9d   : > { %5626 = vmatmul.mubr.msk.f32.gmra.mxu1 %vm619_vm2, %v7187_v2 }
  0x9e   : > { %5596 = vmatmul.mubr.msk.f32.gmra.mxu0 %vm619_vm2, %v576_v9  ;;  %1115 = vmatprep.mubr.f32.mxu1 %v9655_v0  ;;  %v1633_v9 = vrot.slane %v7087_v17, 3 }
  0x9f   : > { %820 = vmatprep.mubr.f32.mxu0 %v9655_v0 }
  0xa0   : > { %v1635_v19 = vsel %vm1632_vm4, %v1633_v9, %v1634_v10 }
  0xa1   : > { %5627 = vmatmul.mubr.msk.f32.gmra.mxu1 %vm619_vm2, %v7197_v5 }
  0xa2   : > { %5597 = vmatmul.mubr.msk.f32.gmra.mxu0 %vm619_vm2, %v578_v12  ;;  %1121 = vmatprep.mubr.f32.mxu1 %v9655_v0  ;;  %v1215_v12 = vsel %vm1212_vm3, %v1213_v4, %v1214_v7  ;;  %v1228_v7 = vrot.slane %v7156_v53, 2 }
  0xa3   : > { %826 = vmatprep.mubr.f32.mxu0 %v9655_v0 }
  0xa5   : > { %5628 = vmatmul.mubr.msk.f32.gmra.mxu1 %vm619_vm2, %v7207_v8 }
  0xa6   : > { %5598 = vmatmul.mubr.msk.f32.gmra.mxu0 %vm619_vm2, %v580_v15  ;;  %1127 = vmatprep.mubr.f32.mxu1 %v9655_v0  ;;  %v1636_v15 = vrot.slane %v7095_v21, 3 }
  0xa7   : > { %832 = vmatprep.mubr.f32.mxu0 %v9655_v0 }
  0xa9   : > { %5629 = vmatmul.mubr.msk.f32.gmra.mxu1 %vm619_vm2, %v7217_v11 }
  0xaa   : > { %5599 = vmatmul.mubr.msk.f32.gmra.mxu0 %vm619_vm2, %v582_v22  ;;  %1133 = vmatprep.mubr.f32.mxu1 %v9655_v0  ;;  %v2116_v22 = vld [vmem:[#allocation2 + $0x128] sm:$0xff] }
  0xab   : > { %838 = vmatprep.mubr.f32.mxu0 %v9655_v0 }
  0xad   : > { %5630 = vmatmul.mubr.msk.f32.gmra.mxu1 %vm619_vm2, %v7227_v14 }
  0xae   : > { %5600 = vmatmul.mubr.msk.f32.gmra.mxu0 %vm619_vm2, %v584_v26  ;;  %1139 = vmatprep.mubr.f32.mxu1 %v9655_v0  ;;  %v1637_v26 = vsel %vm1632_vm4, %v1634_v10, %v1636_v15  ;;  %v1648_v10 = vrot.slane %v7156_v53, 3 }
  0xaf   : > { %844 = vmatprep.mubr.f32.mxu0 %v9655_v0 }
  0xb1   : > { %5631 = vmatmul.mubr.msk.f32.gmra.mxu1 %vm619_vm2, %v7237_v20 }
  0xb2   : > { %5601 = vmatmul.mubr.msk.f32.gmra.mxu0 %vm619_vm2, %v586_v30  ;;  %1145 = vmatprep.mubr.f32.mxu1 %v9655_v0  ;;  %v1638_v30 = vrot.slane %v7099_v23, 3  ;;  %v1640_v23 = vrot.slane %v7112_v29, 3  ;;  %v1642_v29 = vrot.slane %v7124_v34, 3 }
  0xb3   : > { %850 = vmatprep.mubr.f32.mxu0 %v9655_v0 }
  0xb4   : > { %v1641_v45 = vsel %vm1632_vm4, %v1638_v30, %v1640_v23  ;;  %v1643_v52 = vsel %vm1632_vm4, %v1640_v23, %v1642_v29  ;;  %v1645_v60 = vsel %vm1632_vm4, %v1642_v29, %v1644_v56  ;;  %v1656_v23 = vrot.slane %v7197_v5, 3 }
  0xb5   : > { %5632 = vmatmul.mubr.msk.f32.gmra.mxu1 %vm619_vm2, %v7247_v25 }
  0xb6   : > { %5602 = vmatmul.mubr.msk.f32.gmra.mxu0 %vm619_vm2, %v588_v33  ;;  %1151 = vmatprep.mubr.f32.mxu1 %v9655_v0  ;;  %v2114_v33 = vld [vmem:[#allocation2 + $0x118] sm:$0xff] }
  0xb7   : > { %856 = vmatprep.mubr.f32.mxu0 %v9655_v0 }
  0xb9   : > { %5633 = vmatmul.mubr.msk.f32.gmra.mxu1 %vm619_vm2, %v7257_v28 }
  0xba   : > { %5603 = vmatmul.mubr.msk.f32.gmra.mxu0 %vm619_vm2, %v590_v37  ;;  %1157 = vmatprep.mubr.f32.mxu1 %v9655_v0  ;;  %v1639_v37 = vsel %vm1632_vm4, %v1636_v15, %v1638_v30  ;;  %v1650_v15 = vrot.slane %v7166_v59, 3 }
  0xbb   : > { %862 = vmatprep.mubr.f32.mxu0 %v9655_v0 }
  0xbd   : > { %5634 = vmatmul.mubr.msk.f32.gmra.mxu1 %vm619_vm2, %v7267_v32 }
  0xbe   : > { %5604 = vmatmul.mubr.msk.f32.gmra.mxu0 %vm619_vm2, %v592_v40  ;;  %1163 = vmatprep.mubr.f32.mxu1 %v9655_v0  ;;  %v2113_v40 = vld [vmem:[#allocation2 + $0x110] sm:$0xff] }
  0xbf   : > { %868 = vmatprep.mubr.f32.mxu0 %v9655_v0 }
  0xc1   : > { %5635 = vmatmul.mubr.msk.f32.gmra.mxu1 %vm619_vm2, %v7277_v36 }
  0xc2   : > { %5605 = vmatmul.mubr.msk.f32.gmra.mxu0 %vm619_vm2, %v594_v44  ;;  %1169 = vmatprep.mubr.f32.mxu1 %v9655_v0  ;;  %v1221_v44 = vsel %vm1212_vm3, %v1218_v27, %v1220_v38 }
  0xc3   : > { %874 = vmatprep.mubr.f32.mxu0 %v9655_v0 }
  0xc5   : > { %5636 = vmatmul.mubr.msk.f32.gmra.mxu1 %vm619_vm2, %v7287_v39 }
  0xc6   : > { %5606 = vmatmul.mubr.msk.f32.gmra.mxu0 %vm619_vm2, %v596_v47  ;;  %1175 = vmatprep.mubr.f32.mxu1 %v9655_v0  ;;  %v1222_v47 = vrot.slane %v7124_v34, 2 }
  0xc7   : > { %880 = vmatprep.mubr.f32.mxu0 %v9655_v0 }
  0xc9   : > { %5637 = vmatmul.mubr.msk.f32.gmra.mxu1 %vm619_vm2, %v7297_v43 }
  0xca   : > { %5607 = vmatmul.mubr.msk.f32.gmra.mxu0 %vm619_vm2, %v598_v51  ;;  %1181 = vmatprep.mubr.f32.mxu1 %v9655_v0  ;;  %v1223_v51 = vsel %vm1212_vm3, %v1220_v38, %v1222_v47  ;;  %v1236_v38 = vrot.slane %v7197_v5, 2 }
  0xcb   : > { %886 = vmatprep.mubr.f32.mxu0 %v9655_v0 }
  0xcd   : > { %5638 = vmatmul.mubr.msk.f32.gmra.mxu1 %vm619_vm2, %v7307_v46 }
  0xce   : > { %5608 = vmatmul.mubr.msk.f32.gmra.mxu0 %vm619_vm2, %v600_v55  ;;  %1187 = vmatprep.mubr.f32.mxu1 %v9655_v0  ;;  %v1224_v55 = vrot.slane %v7134_v41, 2 }
  0xcf   : > { %892 = vmatprep.mubr.f32.mxu0 %v9655_v0 }
  0xd1   : > { %5639 = vmatmul.mubr.msk.f32.gmra.mxu1 %vm619_vm2, %v7317_v50 }
  0xd2   : > { %5609 = vmatmul.mubr.msk.f32.gmra.mxu0 %vm619_vm2, %v602_v58  ;;  %1193 = vmatprep.mubr.f32.mxu1 %v9655_v0  ;;  %v1225_v58 = vsel %vm1212_vm3, %v1222_v47, %v1224_v55 }
  0xd3   : > { %898 = vmatprep.mubr.f32.mxu0 %v9655_v0 }
  0xd5   : > { %5640 = vmatmul.mubr.msk.f32.gmra.mxu1 %vm619_vm2, %v7327_v54 }
  0xd6   : > { %5610 = vmatmul.mubr.msk.f32.gmra.mxu0 %vm619_vm2, %v604_v63  ;;  %1199 = vmatprep.mubr.f32.mxu1 %v9655_v0  ;;  %v1226_v63 = vrot.slane %v7146_v48, 2 }
  0xd7   : > { %904 = vmatprep.mubr.f32.mxu0 %v9655_v0 }
  0xd9   : > { %5641 = vmatmul.mubr.msk.f32.gmra.mxu1 %vm619_vm2, %v7337_v57 }
  0xda   : > { %5611 = vmatmul.mubr.msk.f32.gmra.mxu0 %vm619_vm2, %v606_v3  ;;  %1205 = vmatprep.mubr.f32.mxu1 %v9655_v0  ;;  %v1227_v3 = vsel %vm1212_vm3, %v1224_v55, %v1226_v63 }
  0xdb   : > { %910 = vmatprep.mubr.f32.mxu0 %v9655_v0 }
  0xdd   : > { %5642 = vmatmul.mubr.msk.f32.gmra.mxu1 %vm619_vm2, %v7347_v61 }
  0xde   : > { %5612 = vmatmul.mubr.msk.f32.gmra.mxu0 %vm619_vm2, %v609_v6  ;;  %1827 = vmatprep.mubr.f32.mxu1 %v9655_v0  ;;  %v1647_v6 = vsel %vm1632_vm4, %v1644_v56, %v1646_v1  ;;  %v1242_v56 = vrot.slane %v7227_v14, 2 }
  0xdf   : > { %1407 = vmatprep.mubr.f32.mxu0 %v9655_v0 }
  0xe1   : > { %5675 = vmatmul.mubr.msk.f32.vlgmr.msra.gmra.mxu1 %vm619_vm2, %v1635_v19  ;;  %v1649_v19 = vsel %vm1632_vm4, %v1646_v1, %v1648_v10  ;;  %v1244_v1 = vrot.slane %v7237_v20, 2 }
  0xe2   : > { %5645 = vmatmul.mubr.msk.f32.vlgmr.msra.gmra.mxu0 %vm619_vm2, %v1215_v12  ;;  %1833 = vmatprep.mubr.f32.mxu1 %v9655_v0  ;;  %v1229_v12 = vsel %vm1212_vm3, %v1226_v63, %v1228_v7 }
  0xe3   : > { %1413 = vmatprep.mubr.f32.mxu0 %v9655_v0  ;;  %5704 = vmatpush1.msk.msra.mxu0 %vm677_vm0, %v2117_v16  ;;  %v1231_v16 = vsel %vm1212_vm3, %v1228_v7, %v1230_v13 }
  0xe4   : > { %2208 = vmatprep.subr.mxu0 %v2116_v22  ;;  %v1651_v22 = vsel %vm1632_vm4, %v1648_v10, %v1650_v15  ;;  %v1246_v10 = vrot.slane %v7247_v25, 2 }
  0xe5   : > { %5676 = vmatmul.mubr.msk.f32.gmra.mxu1 %vm619_vm2, %v1637_v26  ;;  %2209 = vmatpush1.msra.mxu0 %v2115_v31  ;;  %v1652_v26 = vrot.slane %v7177_v62, 3  ;;  %v1234_v31 = vrot.slane %v7187_v2, 2 }
  0xe6   : > { %5646 = vmatmul.mubr.msk.f32.gmra.mxu0 %vm619_vm2, %v1217_v24  ;;  %1839 = vmatprep.mubr.f32.mxu1 %v9655_v0  ;;  %v1232_v24 = vrot.slane %v7177_v62, 2 }
  0xe7   : > { %1419 = vmatprep.mubr.f32.mxu0 %v9655_v0  ;;  %2210 = vmatprep.subr.mxu0 %v2114_v33  ;;  %v1653_v30 = vsel %vm1632_vm4, %v1650_v15, %v1652_v26  ;;  %v1654_v33 = vrot.slane %v7187_v2, 3  ;;  %v1248_v15 = vrot.slane %v7257_v28, 2 }
  0xe8   : > { %2211 = vmatpush1.msra.mxu0 %v2113_v40  ;;  %v1233_v27 = vsel %vm1212_vm3, %v1230_v13, %v1232_v24  ;;  %v1237_v40 = vsel %vm1212_vm3, %v1234_v31, %v1236_v38 }
  0xe9   : > { %5677 = vmatmul.mubr.msk.f32.gmra.mxu1 %vm619_vm2, %v1639_v37  ;;  %2212 = vmatprep.subr.mxu0 %v2112_v42  ;;  %v1655_v37 = vsel %vm1632_vm4, %v1652_v26, %v1654_v33  ;;  %v1657_v42 = vsel %vm1632_vm4, %v1654_v33, %v1656_v23  ;;  %v1250_v26 = vrot.slane %v7267_v32, 2  ;;  %v1252_v33 = vrot.slane %v7277_v36, 2 }
  0xea   : > { %5647 = vmatmul.mubr.msk.f32.gmra.mxu0 %vm619_vm2, %v1219_v35  ;;  %1845 = vmatprep.mubr.f32.mxu1 %v9655_v0  ;;  %v1235_v35 = vsel %vm1212_vm3, %v1232_v24, %v1234_v31 }
  0xeb   : > { %1425 = vmatprep.mubr.f32.mxu0 %v9655_v0  ;;  %2213 = vmatpush1.msra.mxu0 %v2111_v49  ;;  %v1240_v49 = vrot.slane %v7217_v11, 2 }
  0xec   : > { %3214 = vmatprep.subr.mxu0 %v9655_v0 }
  0xed   : > { %5678 = vmatmul.mubr.msk.f32.gmra.mxu1 %vm619_vm2, %v1641_v45  ;;  %v1658_v45 = vrot.slane %v7207_v8, 3 }
  0xee   : > { %5648 = vmatmul.mubr.msk.f32.gmra.mxu0 %vm619_vm2, %v1221_v44  ;;  %1851 = vmatprep.mubr.f32.mxu1 %v9655_v0  ;;  %v1238_v44 = vrot.slane %v7207_v8, 2 }
  0xef   : > { %1431 = vmatprep.mubr.f32.mxu0 %v9655_v0  ;;  %v1659_v29 = vsel %vm1632_vm4, %v1656_v23, %v1658_v45  ;;  %v1254_v23 = vrot.slane %v7287_v39, 2 }
  0xf0   : > { %v1239_v47 = vsel %vm1212_vm3, %v1236_v38, %v1238_v44 }
  0xf1   : > { %5679 = vmatmul.mubr.msk.f32.gmra.mxu1 %vm619_vm2, %v1643_v52  ;;  %v1241_v52 = vsel %vm1212_vm3, %v1238_v44, %v1240_v49 }
  0xf2   : > { %5649 = vmatmul.mubr.msk.f32.gmra.mxu0 %vm619_vm2, %v1223_v51  ;;  %1857 = vmatprep.mubr.f32.mxu1 %v9655_v0  ;;  %v1660_v51 = vrot.slane %v7217_v11, 3 }
  0xf3   : > { %1437 = vmatprep.mubr.f32.mxu0 %v9655_v0 }
  0xf4   : > { %v1661_v55 = vsel %vm1632_vm4, %v1658_v45, %v1660_v51  ;;  %v1676_v45 = vrot.slane %v7297_v43, 3 }
  0xf5   : > { %5680 = vmatmul.mubr.msk.f32.gmra.mxu1 %vm619_vm2, %v1645_v60  ;;  %v1243_v60 = vsel %vm1212_vm3, %v1240_v49, %v1242_v56 }
  0xf6   : > { %5650 = vmatmul.mubr.msk.f32.gmra.mxu0 %vm619_vm2, %v1225_v58  ;;  %1863 = vmatprep.mubr.f32.mxu1 %v9655_v0  ;;  %v1662_v58 = vrot.slane %v7227_v14, 3 }
  0xf7   : > { %1443 = vmatprep.mubr.f32.mxu0 %v9655_v0 }
  0xf8   : > { %v1663_v63 = vsel %vm1632_vm4, %v1660_v51, %v1662_v58 }
  0xf9   : > { %5681 = vmatmul.mubr.msk.f32.gmra.mxu1 %vm619_vm2, %v1647_v6  ;;  %v1245_v6 = vsel %vm1212_vm3, %v1242_v56, %v1244_v1 }
  0xfa   : > { %5651 = vmatmul.mubr.msk.f32.gmra.mxu0 %vm619_vm2, %v1227_v3  ;;  %1869 = vmatprep.mubr.f32.mxu1 %v9655_v0  ;;  %v1664_v3 = vrot.slane %v7237_v20, 3 }
  0xfb   : > { %1449 = vmatprep.mubr.f32.mxu0 %v9655_v0 }
  0xfc   : > { %v1665_v7 = vsel %vm1632_vm4, %v1662_v58, %v1664_v3 }
  0xfd   : > { %5682 = vmatmul.mubr.msk.f32.gmra.mxu1 %vm619_vm2, %v1649_v19  ;;  %v1247_v19 = vsel %vm1212_vm3, %v1244_v1, %v1246_v10 }
  0xfe   : > { %5652 = vmatmul.mubr.msk.f32.gmra.mxu0 %vm619_vm2, %v1229_v12  ;;  %1875 = vmatprep.mubr.f32.mxu1 %v9655_v0  ;;  %v1666_v12 = vrot.slane %v7247_v25, 3 }
  0xff   : > { %1455 = vmatprep.mubr.f32.mxu0 %v9655_v0 }
 0x100   : > { %v1667_v13 = vsel %vm1632_vm4, %v1664_v3, %v1666_v12 }
 0x101   : > { %5683 = vmatmul.mubr.msk.f32.gmra.mxu1 %vm619_vm2, %v1651_v22  ;;  %v1249_v22 = vsel %vm1212_vm3, %v1246_v10, %v1248_v15 }
 0x102   : > { %5653 = vmatmul.mubr.msk.f32.gmra.mxu0 %vm619_vm2, %v1231_v16  ;;  %1881 = vmatprep.mubr.f32.mxu1 %v9655_v0  ;;  %v1668_v16 = vrot.slane %v7257_v28, 3 }
 0x103   : > { %1461 = vmatprep.mubr.f32.mxu0 %v9655_v0 }
 0x104   : > { %v1669_v24 = vsel %vm1632_vm4, %v1666_v12, %v1668_v16 }
 0x105   : > { %5684 = vmatmul.mubr.msk.f32.gmra.mxu1 %vm619_vm2, %v1653_v30  ;;  %v1251_v30 = vsel %vm1212_vm3, %v1248_v15, %v1250_v26 }
 0x106   : > { %5654 = vmatmul.mubr.msk.f32.gmra.mxu0 %vm619_vm2, %v1233_v27  ;;  %1887 = vmatprep.mubr.f32.mxu1 %v9655_v0  ;;  %v1670_v27 = vrot.slane %v7267_v32, 3 }
 0x107   : > { %1467 = vmatprep.mubr.f32.mxu0 %v9655_v0 }
 0x108   : > { %v1671_v31 = vsel %vm1632_vm4, %v1668_v16, %v1670_v27  ;;  %v1262_v16 = vrot.slane %v7327_v54, 2 }
 0x109   : > { %5685 = vmatmul.mubr.msk.f32.gmra.mxu1 %vm619_vm2, %v1655_v37  ;;  %v1253_v37 = vsel %vm1212_vm3, %v1250_v26, %v1252_v33 }
 0x10a   : > { %5655 = vmatmul.mubr.msk.f32.gmra.mxu0 %vm619_vm2, %v1235_v35  ;;  %1893 = vmatprep.mubr.f32.mxu1 %v9655_v0  ;;  %v1672_v35 = vrot.slane %v7277_v36, 3  ;;  %v1256_v36 = vrot.slane %v7297_v43, 2  ;;  %v1678_v43 = vrot.slane %v7307_v46, 3 }
 0x10b   : > { %1473 = vmatprep.mubr.f32.mxu0 %v9655_v0 }
 0x10c   : > { %v1673_v38 = vsel %vm1632_vm4, %v1670_v27, %v1672_v35 }
 0x10d   : > { %5686 = vmatmul.mubr.msk.f32.gmra.mxu1 %vm619_vm2, %v1657_v42  ;;  %v1255_v42 = vsel %vm1212_vm3, %v1252_v33, %v1254_v23 }
 0x10e   : > { %5656 = vmatmul.mubr.msk.f32.gmra.mxu0 %vm619_vm2, %v1237_v40  ;;  %1899 = vmatprep.mubr.f32.mxu1 %v9655_v0  ;;  %v1674_v40 = vrot.slane %v7287_v39, 3  ;;  %v1257_v39 = vsel %vm1212_vm3, %v1254_v23, %v1256_v36 }
 0x10f   : > { %1479 = vmatprep.mubr.f32.mxu0 %v9655_v0 }
 0x110   : > { %v1675_v44 = vsel %vm1632_vm4, %v1672_v35, %v1674_v40  ;;  %v1677_v51 = vsel %vm1632_vm4, %v1674_v40, %v1676_v45 }
 0x111   : > { %5687 = vmatmul.mubr.msk.f32.gmra.mxu1 %vm619_vm2, %v1659_v29 }
 0x112   : > { %5657 = vmatmul.mubr.msk.f32.gmra.mxu0 %vm619_vm2, %v1239_v47  ;;  %1905 = vmatprep.mubr.f32.mxu1 %v9655_v0 }
 0x113   : > { %1485 = vmatprep.mubr.f32.mxu0 %v9655_v0 }
 0x115   : > { %5688 = vmatmul.mubr.msk.f32.gmra.mxu1 %vm619_vm2, %v1661_v55 }
 0x116   : > { %5658 = vmatmul.mubr.msk.f32.gmra.mxu0 %vm619_vm2, %v1241_v52  ;;  %1911 = vmatprep.mubr.f32.mxu1 %v9655_v0  ;;  %v1258_v52 = vrot.slane %v7307_v46, 2  ;;  %v1679_v46 = vsel %vm1632_vm4, %v1676_v45, %v1678_v43  ;;  %v1266_v45 = vrot.slane %v7347_v61, 2 }
 0x117   : > { %1491 = vmatprep.mubr.f32.mxu0 %v9655_v0 }
 0x118   : > { %v1259_v3 = vsel %vm1212_vm3, %v1256_v36, %v1258_v52 }
 0x119   : > { %5689 = vmatmul.mubr.msk.f32.gmra.mxu1 %vm619_vm2, %v1663_v63  ;;  %v1260_v63 = vrot.slane %v7317_v50, 2 }
 0x11a   : > { %5659 = vmatmul.mubr.msk.f32.gmra.mxu0 %vm619_vm2, %v1243_v60  ;;  %1917 = vmatprep.mubr.f32.mxu1 %v9655_v0 }
 0x11b   : > { %1497 = vmatprep.mubr.f32.mxu0 %v9655_v0  ;;  %v1263_v35 = vsel %vm1212_vm3, %v1260_v63, %v1262_v16 }
 0x11d   : > { %5690 = vmatmul.mubr.msk.f32.gmra.mxu1 %vm619_vm2, %v1665_v7 }
 0x11e   : > { %5660 = vmatmul.mubr.msk.f32.gmra.mxu0 %vm619_vm2, %v1245_v6  ;;  %1923 = vmatprep.mubr.f32.mxu1 %v9655_v0  ;;  %v1680_v6 = vrot.slane %v7317_v50, 3 }
 0x11f   : > { %1503 = vmatprep.mubr.f32.mxu0 %v9655_v0 }
 0x120   : > { %v1681_v50 = vsel %vm1632_vm4, %v1678_v43, %v1680_v6 }
 0x121   : > { %5691 = vmatmul.mubr.msk.f32.gmra.mxu1 %vm619_vm2, %v1667_v13  ;;  %v1261_v13 = vsel %vm1212_vm3, %v1258_v52, %v1260_v63 }
 0x122   : > { %5661 = vmatmul.mubr.msk.f32.gmra.mxu0 %vm619_vm2, %v1247_v19  ;;  %1929 = vmatprep.mubr.f32.mxu1 %v9655_v0 }
 0x123   : > { %1509 = vmatprep.mubr.f32.mxu0 %v9655_v0 }
 0x125   : > { %5692 = vmatmul.mubr.msk.f32.gmra.mxu1 %vm619_vm2, %v1669_v24 }
 0x126   : > { %5662 = vmatmul.mubr.msk.f32.gmra.mxu0 %vm619_vm2, %v1249_v22  ;;  %1935 = vmatprep.mubr.f32.mxu1 %v9655_v0  ;;  %v1682_v22 = vrot.slane %v7327_v54, 3 }
 0x127   : > { %1515 = vmatprep.mubr.f32.mxu0 %v9655_v0 }
 0x128   : > { %v1683_v54 = vsel %vm1632_vm4, %v1680_v6, %v1682_v22  ;;  %v1270_v6 = vsel %vm1212_vm3, %v1266_v45, %v1213_v4 }
 0x129   : > { %5693 = vmatmul.mubr.msk.f32.gmra.mxu1 %vm619_vm2, %v1671_v31  ;;  %v1264_v31 = vrot.slane %v7337_v57, 2 }
 0x12a   : > { %5663 = vmatmul.mubr.msk.f32.gmra.mxu0 %vm619_vm2, %v1251_v30  ;;  %1941 = vmatprep.mubr.f32.mxu1 %v9655_v0 }
 0x12b   : > { %1521 = vmatprep.mubr.f32.mxu0 %v9655_v0 }
 0x12d   : > { %5694 = vmatmul.mubr.msk.f32.gmra.mxu1 %vm619_vm2, %v1673_v38 }
 0x12e   : > { %5664 = vmatmul.mubr.msk.f32.gmra.mxu0 %vm619_vm2, %v1253_v37  ;;  %1947 = vmatprep.mubr.f32.mxu1 %v9655_v0  ;;  %v1684_v37 = vrot.slane %v7337_v57, 3 }
 0x12f   : > { %1527 = vmatprep.mubr.f32.mxu0 %v9655_v0 }
 0x130   : > { %v1685_v57 = vsel %vm1632_vm4, %v1682_v22, %v1684_v37 }
 0x131   : > { %v1045_v29 = vpop.f32.mrf.mxu1  ;;  %5695 = vmatmul.mubr.msk.f32.gmra.mxu1 %vm619_vm2, %v1675_v44 }
 0x132   : > { %v750_v47 = vpop.f32.mrf.mxu0  ;;  %5665 = vmatmul.mubr.msk.f32.gmra.mxu0 %vm619_vm2, %v1255_v42  ;;  %1953 = vmatprep.mubr.f32.mxu1 %v9655_v0  ;;  %v1265_v42 = vsel %vm1212_vm3, %v1262_v16, %v1264_v31 }
 0x133   : > { %v7552_v49 = vadd.f32 %v1045_v29, %v750_v47  ;;  %1533 = vmatprep.mubr.f32.mxu0 %v9655_v0  ;;  %v7561_v56 = vpop.f32.mrf.mxu1  ;;  %v1686_v47 = vrot.slane %v7347_v61, 3 }
 0x134   : > { %v7559_v55 = vpop.f32.mrf.mxu0 }
 0x135   : > { %v1051_v60 = vpop.f32.mrf.mxu1  ;;  %5696 = vmatmul.mubr.msk.f32.gmra.mxu1 %vm619_vm2, %v1677_v51  ;;  %v1687_v61 = vsel %vm1632_vm4, %v1684_v37, %v1686_v47 }
 0x136   : > { %v756_v58 = vpop.f32.mrf.mxu0  ;;  %5666 = vmatmul.mubr.msk.f32.gmra.mxu0 %vm619_vm2, %v1257_v39  ;;  %1959 = vmatprep.mubr.f32.mxu1 %v9655_v0 }
 0x137   : > { %v7566_v1 = vadd.f32 %v1051_v60, %v756_v58  ;;  %1539 = vmatprep.mubr.f32.mxu0 %v9655_v0  ;;  %v7575_v10 = vpop.f32.mrf.mxu1  ;;  %v1267_v58 = vsel %vm1212_vm3, %v1264_v31, %v1266_v45 }
 0x138   : > { %v7573_v7 = vpop.f32.mrf.mxu0 }
 0x139   : > { %v1057_v19 = vpop.f32.mrf.mxu1  ;;  %5697 = vmatmul.mubr.msk.f32.gmra.mxu1 %vm619_vm2, %v1679_v46 }
 0x13a   : > { %v762_v12 = vpop.f32.mrf.mxu0  ;;  %5667 = vmatmul.mubr.msk.f32.gmra.mxu0 %vm619_vm2, %v1259_v3  ;;  %1965 = vmatprep.mubr.f32.mxu1 %v9655_v0 }
 0x13b   : > { %v7580_v15 = vadd.f32 %v1057_v19, %v762_v12  ;;  %1545 = vmatprep.mubr.f32.mxu0 %v9655_v0  ;;  %v7589_v26 = vpop.f32.mrf.mxu1  ;;  %v1690_v19 = vsel %vm1632_vm4, %v1686_v47, %v1633_v9 }
 0x13c   : > { %v7587_v24 = vpop.f32.mrf.mxu0 }
 0x13d   : > { %v1063_v30 = vpop.f32.mrf.mxu1  ;;  %5698 = vmatmul.mubr.msk.f32.gmra.mxu1 %vm619_vm2, %v1681_v50  ;;  %v2053_v50 = vrot.slane %v7090_v18, 4  ;;  %v2055_v18 = vrot.slane %v7095_v21, 4 }
 0x13e   : > { %v768_v27 = vpop.f32.mrf.mxu0  ;;  %5668 = vmatmul.mubr.msk.f32.gmra.mxu0 %vm619_vm2, %v1261_v13  ;;  %1971 = vmatprep.mubr.f32.mxu1 %v9655_v0  ;;  %v9654_v13 = vrot.slane %v7087_v17, 4 }
 0x13f   : > { %v7594_v33 = vadd.f32 %v1063_v30, %v768_v27  ;;  %1551 = vmatprep.mubr.f32.mxu0 %v9655_v0  ;;  %v7603_v23 = vpop.f32.mrf.mxu1 }
 0x140   : > { %v7601_v38 = vpop.f32.mrf.mxu0  ;;  %v2054_v9 = vsel %vm677_vm0, %v9654_v13, %v2053_v50 }
 0x141   : > { %v1069_v36 = vpop.f32.mrf.mxu1  ;;  %5699 = vmatmul.mubr.msk.f32.gmra.mxu1 %vm619_vm2, %v1683_v54 }
 0x142   : > { %v774_v40 = vpop.f32.mrf.mxu0  ;;  %5669 = vmatmul.mubr.msk.f32.gmra.mxu0 %vm619_vm2, %v1263_v35  ;;  %1977 = vmatprep.mubr.f32.mxu1 %v9655_v0 }
 0x143   : > { %v7608_v44 = vadd.f32 %v1069_v36, %v774_v40  ;;  %1557 = vmatprep.mubr.f32.mxu0 %v9655_v0  ;;  %v7617_v39 = vpop.f32.mrf.mxu1  ;;  %v2056_v36 = vsel %vm677_vm0, %v2053_v50, %v2055_v18 }
 0x144   : > { %v7615_v29 = vpop.f32.mrf.mxu0 }
 0x145   : > { %v1075_v52 = vpop.f32.mrf.mxu1  ;;  %5700 = vmatmul.mubr.msk.f32.gmra.mxu1 %vm619_vm2, %v1685_v57 }
 0x146   : > { %v780_v51 = vpop.f32.mrf.mxu0  ;;  %5670 = vmatmul.mubr.msk.f32.gmra.mxu0 %vm619_vm2, %v1265_v42  ;;  %1983 = vmatprep.mubr.f32.mxu1 %v9655_v0  ;;  %v6658_v42 = vld [vmem:[%s7084_s27 + $0x18] sm:$0xff] }
 0x147   : > { %v7621_v43 = vadd.f32 %v1075_v52, %v780_v51  ;;  %1563 = vmatprep.mubr.f32.mxu0 %v9655_v0  ;;  %v7629_v63 = vpop.f32.mrf.mxu1  ;;  %v2057_v57 = vrot.slane %v6658_v42, 4 }
 0x148   : > { %v7627_v60 = vpop.f32.mrf.mxu0 }
 0x149   : > { %v1081_v46 = vpop.f32.mrf.mxu1  ;;  %5701 = vmatmul.mubr.msk.f32.gmra.mxu1 %vm619_vm2, %v1687_v61  ;;  %v6659_v61 = vld [vmem:[%s7084_s27 + $0x20] sm:$0xff] }
 0x14a   : > { %v786_v3 = vpop.f32.mrf.mxu0  ;;  %5671 = vmatmul.mubr.msk.f32.gmra.mxu0 %vm619_vm2, %v1267_v58  ;;  %1989 = vmatprep.mubr.f32.mxu1 %v9655_v0  ;;  %v2058_v58 = vsel %vm677_vm0, %v2055_v18, %v2057_v57 }
 0x14b   : > { %v7636_v12 = vadd.f32 %v1081_v46, %v786_v3  ;;  %1569 = vmatprep.mubr.f32.mxu0 %v9655_v0  ;;  %v7647_v22 = vpop.f32.mrf.mxu1  ;;  %v2059_v3 = vrot.slane %v6659_v61, 4 }
 0x14c   : > { %v7645_v16 = vpop.f32.mrf.mxu0 }
 0x14d   : > { %v1087_v4 = vpop.f32.mrf.mxu1  ;;  %5702 = vmatmul.mubr.msk.f32.gmra.mxu1 %vm619_vm2, %v1690_v19 }
 0x14e   : > { %v792_v27 = vpop.f32.mrf.mxu0  ;;  %5672 = vmatmul.mubr.msk.f32.gmra.mxu0 %vm619_vm2, %v1270_v6 }
 0x14f   : > { %v7651_v30 = vadd.f32 %v1087_v4, %v792_v27  ;;  %2246 = vmatprep.mubr.f32.mxu0 %v9655_v0  ;;  %v7660_v35 = vpop.f32.mrf.mxu1  ;;  %v2060_v4 = vsel %vm677_vm0, %v2057_v57, %v2059_v3 }
 0x150   : > { %v7658_v31 = vpop.f32.mrf.mxu0 }
 0x151   : > { %v1093_v37 = vpop.f32.mrf.mxu1 }
 0x152   : > { %v798_v54 = vpop.f32.mrf.mxu0  ;;  %5705 = vmatmul.mubr.msk.f32.vlgmr.msra.gmra.mxu0 %vm619_vm2, %v2054_v9  ;;  %v2061_v9 = vrot.slane %v7124_v34, 4 }
 0x153   : > { %v7663_v40 = vadd.f32 %v1093_v37, %v798_v54  ;;  %2252 = vmatprep.mubr.f32.mxu0 %v9655_v0  ;;  %v7670_v21 = vpop.f32.mrf.mxu1 }
 0x154   : > { %v7668_v45 = vpop.f32.mrf.mxu0  ;;  %9741 = vst [vmem:[#allocation20_spill] sm:$0xff] %v7670_v21 }
 0x155   : > { %v1099_v51 = vpop.f32.mrf.mxu1 }
 0x156   : > { %v804_v47 = vpop.f32.mrf.mxu0  ;;  %5706 = vmatmul.mubr.msk.f32.gmra.mxu0 %vm619_vm2, %v2056_v36 }
 0x157   : > { %v7673_v52 = vadd.f32 %v1099_v51, %v804_v47  ;;  %2258 = vmatprep.mubr.f32.mxu0 %v9655_v0  ;;  %v7680_v6 = vpop.f32.mrf.mxu1  ;;  %v2062_v47 = vsel %vm677_vm0, %v2059_v3, %v2061_v9  ;;  %v2063_v51 = vrot.slane %v7134_v41, 4 }
 0x158   : > { %v7678_v46 = vpop.f32.mrf.mxu0  ;;  %9743 = vst [vmem:[#allocation22_spill] sm:$0xff] %v7680_v6 }
 0x159   : > { %9742 = vst [vmem:[#allocation21_spill] sm:$0xff] %v7678_v46  ;;  %v1105_v50 = vpop.f32.mrf.mxu1 }
 0x15a   : > { %v810_v19 = vpop.f32.mrf.mxu0  ;;  %5707 = vmatmul.mubr.msk.f32.gmra.mxu0 %vm619_vm2, %v2058_v58 }
 0x15b   : > { %v7683_v27 = vadd.f32 %v1105_v50, %v810_v19  ;;  %2264 = vmatprep.mubr.f32.mxu0 %v9655_v0  ;;  %v7690_v18 = vpop.f32.mrf.mxu1  ;;  %v2064_v50 = vsel %vm677_vm0, %v2061_v9, %v2063_v51 }
 0x15c   : > { %v7688_v54 = vpop.f32.mrf.mxu0  ;;  %9745 = vst [vmem:[#allocation24_spill] sm:$0xff] %v7690_v18 }
 0x15d   : > { %9744 = vst [vmem:[#allocation23_spill] sm:$0xff] %v7688_v54  ;;  %v1111_v36 = vpop.f32.mrf.mxu1 }
 0x15e   : > { %v816_v37 = vpop.f32.mrf.mxu0  ;;  %5708 = vmatmul.mubr.msk.f32.gmra.mxu0 %vm619_vm2, %v2060_v4  ;;  %v2065_v4 = vrot.slane %v7146_v48, 4 }
 0x15f   : > { %v7693_v42 = vadd.f32 %v1111_v36, %v816_v37  ;;  %2270 = vmatprep.mubr.f32.mxu0 %v9655_v0  ;;  %v7700_v57 = vpop.f32.mrf.mxu1 }
 0x160   : > { %v7698_v58 = vpop.f32.mrf.mxu0  ;;  %9747 = vst [vmem:[#allocation26_spill] sm:$0xff] %v7700_v57 }
 0x161   : > { %9746 = vst [vmem:[#allocation25_spill] sm:$0xff] %v7698_v58  ;;  %v1117_v61 = vpop.f32.mrf.mxu1 }
 0x162   : > { %v822_v34 = vpop.f32.mrf.mxu0  ;;  %5709 = vmatmul.mubr.msk.f32.gmra.mxu0 %vm619_vm2, %v2062_v47  ;;  %v2066_v47 = vsel %vm677_vm0, %v2063_v51, %v2065_v4 }
 0x163   : > { %v7703_v19 = vadd.f32 %v1117_v61, %v822_v34  ;;  %2276 = vmatprep.mubr.f32.mxu0 %v9655_v0  ;;  %v7710_v3 = vpop.f32.mrf.mxu1  ;;  %v2067_v34 = vrot.slane %v7156_v53, 4 }
 0x164   : > { %v7708_v37 = vpop.f32.mrf.mxu0  ;;  %9749 = vst [vmem:[#allocation28_spill] sm:$0xff] %v7710_v3 }
 0x165   : > { %9748 = vst [vmem:[#allocation27_spill] sm:$0xff] %v7708_v37  ;;  %v1123_v36 = vpop.f32.mrf.mxu1 }
 0x166   : > { %v828_v41 = vpop.f32.mrf.mxu0  ;;  %5710 = vmatmul.mubr.msk.f32.gmra.mxu0 %vm619_vm2, %v2064_v50  ;;  %v2068_v50 = vsel %vm677_vm0, %v2065_v4, %v2067_v34 }
 0x167   : > { %v7713_v13 = vadd.f32 %v1123_v36, %v828_v41  ;;  %2282 = vmatprep.mubr.f32.mxu0 %v9655_v0  ;;  %v7720_v9 = vpop.f32.mrf.mxu1  ;;  %v2069_v41 = vrot.slane %v7166_v59, 4 }
 0x168   : > { %v7718_v61 = vpop.f32.mrf.mxu0  ;;  %9751 = vst [vmem:[#allocation30_spill] sm:$0xff] %v7720_v9 }
 0x169   : > { %9750 = vst [vmem:[#allocation29_spill] sm:$0xff] %v7718_v61  ;;  %v1129_v37 = vpop.f32.mrf.mxu1 }
 0x16a   : > { %v834_v48 = vpop.f32.mrf.mxu0  ;;  %5711 = vmatmul.mubr.msk.f32.gmra.mxu0 %vm619_vm2, %v2066_v47  ;;  %v2071_v47 = vrot.slane %v7177_v62, 4 }
 0x16b   : > { %v7723_v3 = vadd.f32 %v1129_v37, %v834_v48  ;;  %2288 = vmatprep.mubr.f32.mxu0 %v9655_v0  ;;  %v7730_v51 = vpop.f32.mrf.mxu1  ;;  %v2070_v37 = vsel %vm677_vm0, %v2067_v34, %v2069_v41 }
 0x16c   : > { %v7728_v36 = vpop.f32.mrf.mxu0 }
 0x16d   : > { %v1135_v57 = vpop.f32.mrf.mxu1 }
 0x16e   : > { %v840_v53 = vpop.f32.mrf.mxu0  ;;  %5712 = vmatmul.mubr.msk.f32.gmra.mxu0 %vm619_vm2, %v2068_v50  ;;  %v2073_v50 = vrot.slane %v7187_v2, 4 }
 0x16f   : > { %v7733_v58 = vadd.f32 %v1135_v57, %v840_v53  ;;  %2294 = vmatprep.mubr.f32.mxu0 %v9655_v0  ;;  %v7740_v4 = vpop.f32.mrf.mxu1  ;;  %v2072_v57 = vsel %vm677_vm0, %v2069_v41, %v2071_v47 }
 0x170   : > { %v7738_v48 = vpop.f32.mrf.mxu0  ;;  %9753 = vst [vmem:[#allocation32_spill] sm:$0xff] %v7740_v4 }
 0x171   : > { %9752 = vst [vmem:[#allocation31_spill] sm:$0xff] %v7738_v48  ;;  %v1141_v9 = vpop.f32.mrf.mxu1 }
 0x172   : > { %v846_v59 = vpop.f32.mrf.mxu0  ;;  %5713 = vmatmul.mubr.msk.f32.gmra.mxu0 %vm619_vm2, %v2070_v37  ;;  %v2075_v37 = vrot.slane %v7197_v5, 4 }
 0x173   : > { %v7743_v61 = vadd.f32 %v1141_v9, %v846_v59  ;;  %2300 = vmatprep.mubr.f32.mxu0 %v9655_v0  ;;  %v7750_v34 = vpop.f32.mrf.mxu1  ;;  %v2074_v9 = vsel %vm677_vm0, %v2071_v47, %v2073_v50 }
 0x174   : > { %v7748_v53 = vpop.f32.mrf.mxu0  ;;  %9755 = vst [vmem:[#allocation34_spill] sm:$0xff] %v7750_v34 }
 0x175   : > { %9754 = vst [vmem:[#allocation33_spill] sm:$0xff] %v7748_v53  ;;  %v1147_v48 = vpop.f32.mrf.mxu1 }
 0x176   : > { %v852_v62 = vpop.f32.mrf.mxu0  ;;  %5714 = vmatmul.mubr.msk.f32.gmra.mxu0 %vm619_vm2, %v2072_v57  ;;  %v2077_v57 = vrot.slane %v7207_v8, 4 }
 0x177   : > { %v7753_v4 = vadd.f32 %v1147_v48, %v852_v62  ;;  %2306 = vmatprep.mubr.f32.mxu0 %v9655_v0  ;;  %v7760_v41 = vpop.f32.mrf.mxu1  ;;  %v2076_v48 = vsel %vm677_vm0, %v2073_v50, %v2075_v37 }
 0x178   : > { %v7758_v59 = vpop.f32.mrf.mxu0  ;;  %9757 = vst [vmem:[#allocation36_spill] sm:$0xff] %v7760_v41 }
 0x179   : > { %9756 = vst [vmem:[#allocation35_spill] sm:$0xff] %v7758_v59  ;;  %v1153_v53 = vpop.f32.mrf.mxu1 }
 0x17a   : > { %v858_v2 = vpop.f32.mrf.mxu0  ;;  %5715 = vmatmul.mubr.msk.f32.gmra.mxu0 %vm619_vm2, %v2074_v9  ;;  %v2079_v9 = vrot.slane %v7217_v11, 4 }
 0x17b   : > { %v7763_v34 = vadd.f32 %v1153_v53, %v858_v2  ;;  %2312 = vmatprep.mubr.f32.mxu0 %v9655_v0  ;;  %v7770_v47 = vpop.f32.mrf.mxu1  ;;  %v2078_v53 = vsel %vm677_vm0, %v2075_v37, %v2077_v57 }
 0x17c   : > { %v7768_v62 = vpop.f32.mrf.mxu0  ;;  %9759 = vst [vmem:[#allocation38_spill] sm:$0xff] %v7770_v47 }
 0x17d   : > { %9758 = vst [vmem:[#allocation37_spill] sm:$0xff] %v7768_v62  ;;  %v1159_v59 = vpop.f32.mrf.mxu1 }
 0x17e   : > { %v864_v5 = vpop.f32.mrf.mxu0  ;;  %5716 = vmatmul.mubr.msk.f32.gmra.mxu0 %vm619_vm2, %v2076_v48  ;;  %v2081_v48 = vrot.slane %v7227_v14, 4 }
 0x17f   : > { %v7773_v41 = vadd.f32 %v1159_v59, %v864_v5  ;;  %2318 = vmatprep.mubr.f32.mxu0 %v9655_v0  ;;  %v7780_v50 = vpop.f32.mrf.mxu1  ;;  %v2080_v59 = vsel %vm677_vm0, %v2077_v57, %v2079_v9 }
 0x180   : > { %v7778_v2 = vpop.f32.mrf.mxu0  ;;  %9761 = vst [vmem:[#allocation40_spill] sm:$0xff] %v7780_v50 }
 0x181   : > { %9760 = vst [vmem:[#allocation39_spill] sm:$0xff] %v7778_v2  ;;  %v1165_v62 = vpop.f32.mrf.mxu1 }
 0x182   : > { %v870_v8 = vpop.f32.mrf.mxu0  ;;  %5717 = vmatmul.mubr.msk.f32.gmra.mxu0 %vm619_vm2, %v2078_v53  ;;  %v2083_v53 = vrot.slane %v7237_v20, 4 }
 0x183   : > { %v7783_v47 = vadd.f32 %v1165_v62, %v870_v8  ;;  %2324 = vmatprep.mubr.f32.mxu0 %v9655_v0  ;;  %v7790_v37 = vpop.f32.mrf.mxu1  ;;  %v2082_v62 = vsel %vm677_vm0, %v2079_v9, %v2081_v48 }
 0x184   : > { %v7788_v5 = vpop.f32.mrf.mxu0  ;;  %9763 = vst [vmem:[#allocation42_spill] sm:$0xff] %v7790_v37 }
 0x185   : > { %9762 = vst [vmem:[#allocation41_spill] sm:$0xff] %v7788_v5  ;;  %v1171_v2 = vpop.f32.mrf.mxu1 }
 0x186   : > { %v876_v11 = vpop.f32.mrf.mxu0  ;;  %5718 = vmatmul.mubr.msk.f32.gmra.mxu0 %vm619_vm2, %v2080_v59  ;;  %v2085_v59 = vrot.slane %v7247_v25, 4 }
 0x187   : > { %v7793_v50 = vadd.f32 %v1171_v2, %v876_v11  ;;  %2330 = vmatprep.mubr.f32.mxu0 %v9655_v0  ;;  %v7800_v57 = vpop.f32.mrf.mxu1  ;;  %v2084_v2 = vsel %vm677_vm0, %v2081_v48, %v2083_v53 }
 0x188   : > { %v7798_v8 = vpop.f32.mrf.mxu0  ;;  %9765 = vst [vmem:[#allocation44_spill] sm:$0xff] %v7800_v57 }
 0x189   : > { %9764 = vst [vmem:[#allocation43_spill] sm:$0xff] %v7798_v8  ;;  %v1177_v5 = vpop.f32.mrf.mxu1 }
 0x18a   : > { %v882_v14 = vpop.f32.mrf.mxu0  ;;  %5719 = vmatmul.mubr.msk.f32.gmra.mxu0 %vm619_vm2, %v2082_v62  ;;  %v2087_v62 = vrot.slane %v7257_v28, 4 }
 0x18b   : > { %v7803_v37 = vadd.f32 %v1177_v5, %v882_v14  ;;  %2336 = vmatprep.mubr.f32.mxu0 %v9655_v0  ;;  %v7810_v9 = vpop.f32.mrf.mxu1  ;;  %v2086_v5 = vsel %vm677_vm0, %v2083_v53, %v2085_v59 }
 0x18c   : > { %v7808_v11 = vpop.f32.mrf.mxu0  ;;  %9767 = vst [vmem:[#allocation46_spill] sm:$0xff] %v7810_v9 }
 0x18d   : > { %9766 = vst [vmem:[#allocation45_spill] sm:$0xff] %v7808_v11  ;;  %v1183_v8 = vpop.f32.mrf.mxu1 }
 0x18e   : > { %v888_v20 = vpop.f32.mrf.mxu0  ;;  %5720 = vmatmul.mubr.msk.f32.gmra.mxu0 %vm619_vm2, %v2084_v2  ;;  %v2089_v2 = vrot.slane %v7267_v32, 4 }
 0x18f   : > { %v7813_v57 = vadd.f32 %v1183_v8, %v888_v20  ;;  %2342 = vmatprep.mubr.f32.mxu0 %v9655_v0  ;;  %v7820_v48 = vpop.f32.mrf.mxu1  ;;  %v2088_v8 = vsel %vm677_vm0, %v2085_v59, %v2087_v62 }
 0x190   : > { %v7818_v14 = vpop.f32.mrf.mxu0  ;;  %9769 = vst [vmem:[#allocation48_spill] sm:$0xff] %v7820_v48 }
 0x191   : > { %9768 = vst [vmem:[#allocation47_spill] sm:$0xff] %v7818_v14  ;;  %v1189_v11 = vpop.f32.mrf.mxu1 }
 0x192   : > { %v894_v25 = vpop.f32.mrf.mxu0  ;;  %5721 = vmatmul.mubr.msk.f32.gmra.mxu0 %vm619_vm2, %v2086_v5  ;;  %v6660_v5 = vld [vmem:[%s7084_s27 + $0xa0] sm:$0xff] }
 0x193   : > { %v7823_v9 = vadd.f32 %v1189_v11, %v894_v25  ;;  %2348 = vmatprep.mubr.f32.mxu0 %v9655_v0  ;;  %v7830_v28 = vpop.f32.mrf.mxu1  ;;  %v2090_v11 = vsel %vm677_vm0, %v2087_v62, %v2089_v2  ;;  %v2091_v25 = vrot.slane %v6660_v5, 4 }
 0x194   : > { %v7828_v53 = vpop.f32.mrf.mxu0  ;;  %9771 = vst [vmem:[#allocation50_spill] sm:$0xff] %v7830_v28 }
 0x195   : > { %9770 = vst [vmem:[#allocation49_spill] sm:$0xff] %v7828_v53  ;;  %v1195_v48 = vpop.f32.mrf.mxu1 }
 0x196   : > { %v900_v20 = vpop.f32.mrf.mxu0  ;;  %5722 = vmatmul.mubr.msk.f32.gmra.mxu0 %vm619_vm2, %v2088_v8  ;;  %v6661_v8 = vld [vmem:[%s7084_s27 + $0xa8] sm:$0xff] }
 0x197   : > { %v7833_v14 = vadd.f32 %v1195_v48, %v900_v20  ;;  %2354 = vmatprep.mubr.f32.mxu0 %v9655_v0  ;;  %v7840_v32 = vpop.f32.mrf.mxu1  ;;  %v2092_v48 = vsel %vm677_vm0, %v2089_v2, %v2091_v25  ;;  %v2093_v20 = vrot.slane %v6661_v8, 4 }
 0x198   : > { %v7838_v59 = vpop.f32.mrf.mxu0  ;;  %9773 = vst [vmem:[#allocation52_spill] sm:$0xff] %v7840_v32 }
 0x199   : > { %9772 = vst [vmem:[#allocation51_spill] sm:$0xff] %v7838_v59  ;;  %v1201_v28 = vpop.f32.mrf.mxu1 }
 0x19a   : > { %v906_v53 = vpop.f32.mrf.mxu0  ;;  %5723 = vmatmul.mubr.msk.f32.gmra.mxu0 %vm619_vm2, %v2090_v11 }
 0x19b   : > { %v7843_v18 = vadd.f32 %v1201_v28, %v906_v53  ;;  %2360 = vmatprep.mubr.f32.mxu0 %v9655_v0  ;;  %v7850_v5 = vpop.f32.mrf.mxu1  ;;  %v2094_v53 = vsel %vm677_vm0, %v2091_v25, %v2093_v20  ;;  %v6662_v28 = vld [vmem:[%s7084_s27 + $0xb0] sm:$0xff] }
 0x19c   : > { %v7848_v62 = vpop.f32.mrf.mxu0  ;;  %9775 = vst [vmem:[#allocation54_spill] sm:$0xff] %v7850_v5  ;;  %v2095_v11 = vrot.slane %v6662_v28, 4 }
 0x19d   : > { %9774 = vst [vmem:[#allocation53_spill] sm:$0xff] %v7848_v62  ;;  %v1207_v32 = vpop.f32.mrf.mxu1 }
 0x19e   : > { %v912_v59 = vpop.f32.mrf.mxu0  ;;  %5724 = vmatmul.mubr.msk.f32.gmra.mxu0 %vm619_vm2, %v2092_v48 }
 0x19f   : > { %v7853_v54 = vadd.f32 %v1207_v32, %v912_v59  ;;  %2366 = vmatprep.mubr.f32.mxu0 %v9655_v0  ;;  %v7860_v8 = vpop.f32.mrf.mxu1  ;;  %v2096_v59 = vsel %vm677_vm0, %v2093_v20, %v2095_v11  ;;  %v6663_v32 = vld [vmem:[%s7084_s27 + $0xb8] sm:$0xff]  ;;  %v6664_v20 = vld [vmem:[%s7084_s27 + $0xc0] sm:$0xff] }
 0x1a0   : > { %v7858_v2 = vpop.f32.mrf.mxu0  ;;  %9777 = vst [vmem:[#allocation56_spill] sm:$0xff] %v7860_v8  ;;  %v2097_v48 = vrot.slane %v6663_v32, 4 }
 0x1a1   : > { %9776 = vst [vmem:[#allocation55_spill] sm:$0xff] %v7858_v2  ;;  %v1829_v5 = vpop.f32.mrf.mxu1 }
 0x1a2   : > { %v1409_v62 = vpop.f32.mrf.mxu0  ;;  %5725 = vmatmul.mubr.msk.f32.gmra.mxu0 %vm619_vm2, %v2094_v53 }
 0x1a3   : > { %v1576_v6 = vadd.f32 %v1409_v62, %v7552_v49  ;;  %2372 = vmatprep.mubr.f32.mxu0 %v9655_v0  ;;  %v7869_v28 = vpop.f32.mrf.mxu1  ;;  %v2098_v49 = vsel %vm677_vm0, %v2095_v11, %v2097_v48  ;;  %v2099_v62 = vrot.slane %v6664_v20, 4  ;;  %v6665_v11 = vld [vmem:[%s7084_s27 + $0xc8] sm:$0xff] }
 0x1a4   : > { %v7867_v25 = vpop.f32.mrf.mxu0  ;;  %9779 = vst [vmem:[#allocation58_spill] sm:$0xff] %v7869_v28 }
 0x1a5   : > { %9778 = vst [vmem:[#allocation57_spill] sm:$0xff] %v7867_v25  ;;  %v7871_v2 = vadd.f32 %v1829_v5, %v1576_v6  ;;  %v1835_v53 = vpop.f32.mrf.mxu1 }
 0x1a6   : > { %v1415_v8 = vpop.f32.mrf.mxu0  ;;  %5726 = vmatmul.mubr.msk.f32.gmra.mxu0 %vm619_vm2, %v2096_v59 }
 0x1a7   : > { %v1578_v46 = vadd.f32 %v1415_v8, %v7566_v1  ;;  %2378 = vmatprep.mubr.f32.mxu0 %v9655_v0  ;;  %v7880_v25 = vpop.f32.mrf.mxu1  ;;  %v2100_v1 = vsel %vm677_vm0, %v2097_v48, %v2099_v62  ;;  %v2101_v8 = vrot.slane %v6665_v11, 4  ;;  %v6666_v48 = vld [vmem:[%s7084_s27 + $0xd0] sm:$0xff] }
 0x1a8   : > { %v7878_v32 = vpop.f32.mrf.mxu0  ;;  %9781 = vst [vmem:[#allocation60_spill] sm:$0xff] %v7880_v25 }
 0x1a9   : > { %9780 = vst [vmem:[#allocation59_spill] sm:$0xff] %v7878_v32  ;;  %v7882_v28 = vadd.f32 %v1835_v53, %v1578_v46  ;;  %v1841_v5 = vpop.f32.mrf.mxu1 }
 0x1aa   : > { %v1421_v6 = vpop.f32.mrf.mxu0  ;;  %5727 = vmatmul.mubr.msk.f32.gmra.mxu0 %vm619_vm2, %v2098_v49 }
 0x1ab   : > { %v1580_v59 = vadd.f32 %v1421_v6, %v7580_v15  ;;  %2384 = vmatprep.mubr.f32.mxu0 %v9655_v0  ;;  %v7891_v32 = vpop.f32.mrf.mxu1  ;;  %v2102_v15 = vsel %vm677_vm0, %v2099_v62, %v2101_v8  ;;  %v2103_v6 = vrot.slane %v6666_v48, 4 }
 0x1ac   : > { %v7889_v20 = vpop.f32.mrf.mxu0  ;;  %9783 = vst [vmem:[#allocation62_spill] sm:$0xff] %v7891_v32 }
 0x1ad   : > { %9782 = vst [vmem:[#allocation61_spill] sm:$0xff] %v7889_v20  ;;  %v7893_v25 = vadd.f32 %v1841_v5, %v1580_v59  ;;  %v1847_v53 = vpop.f32.mrf.mxu1 }
 0x1ae   : > { %v1427_v46 = vpop.f32.mrf.mxu0  ;;  %5728 = vmatmul.mubr.msk.f32.gmra.mxu0 %vm619_vm2, %v2100_v1 }
 0x1af   : > { %v1582_v49 = vadd.f32 %v1427_v46, %v7594_v33  ;;  %2390 = vmatprep.mubr.f32.mxu0 %v9655_v0  ;;  %v7902_v20 = vpop.f32.mrf.mxu1  ;;  %v2104_v33 = vsel %vm677_vm0, %v2101_v8, %v2103_v6  ;;  %v6667_v46 = vld [vmem:[%s7084_s27 + $0xd8] sm:$0xff]  ;;  %s9597_s27 = scalar_lea.hbm %s9644_s12, %s5914_s20 }
 0x1b0   : > { %v7900_v11 = vpop.f32.mrf.mxu0  ;;  %9785 = vst [vmem:[#allocation64_spill] sm:$0xff] %v7902_v20  ;;  %v2105_v62 = vrot.slane %v6667_v46, 4 }
 0x1b1   : > { %9784 = vst [vmem:[#allocation63_spill] sm:$0xff] %v7900_v11  ;;  %v7904_v32 = vadd.f32 %v1847_v53, %v1582_v49  ;;  %v1853_v59 = vpop.f32.mrf.mxu1 }
 0x1b2   : > { %v1433_v5 = vpop.f32.mrf.mxu0  ;;  %5729 = vmatmul.mubr.msk.f32.gmra.mxu0 %vm619_vm2, %v2102_v15 }
 0x1b3   : > { %v1584_v1 = vadd.f32 %v1433_v5, %v7608_v44  ;;  %2396 = vmatprep.mubr.f32.mxu0 %v9655_v0  ;;  %v7913_v48 = vpop.f32.mrf.mxu1  ;;  %v2106_v44 = vsel %vm677_vm0, %v2103_v6, %v2105_v62 }
 0x1b4   : > { %v7911_v21 = vpop.f32.mrf.mxu0  ;;  %9786 = vst [vmem:[#allocation65_spill] sm:$0xff] %v7913_v48 }
 0x1b5   : > { %v7915_v11 = vadd.f32 %v1853_v59, %v1584_v1  ;;  %v7918_v49 = vpop.f32.mrf.mxu1 }
 0x1b6   : > { %v1439_v53 = vpop.f32.mrf.mxu0  ;;  %5730 = vmatmul.mubr.msk.f32.gmra.mxu0 %vm619_vm2, %v2104_v33  ;;  %9787 = vst [vmem:[#allocation66_spill] sm:$0xff] %v7918_v49 }
 0x1b7   : > { %v7921_v15 = vadd.f32 %v1439_v53, %v7621_v43  ;;  %2402 = vmatprep.mubr.f32.mxu0 %v9655_v0  ;;  %v7927_v5 = vpop.f32.mrf.mxu1  ;;  %v9792_v43 = vrot.slane %v7087_v17, 4 }
 0x1b8   : > { %v7925_v8 = vpop.f32.mrf.mxu0  ;;  %9789 = vst [vmem:[#allocation68_spill] sm:$0xff] %v7927_v5 }
 0x1b9   : > { %9788 = vst [vmem:[#allocation67_spill] sm:$0xff] %v7921_v15  ;;  %v7930_v59 = vpop.f32.mrf.mxu1  ;;  %v2109_v33 = vsel %vm677_vm0, %v2105_v62, %v9792_v43 }
 0x1ba   : > { %v1445_v46 = vpop.f32.mrf.mxu0  ;;  %5731 = vmatmul.mubr.msk.f32.gmra.mxu0 %vm619_vm2, %v2106_v44  ;;  %9790 = vst [vmem:[#allocation69_spill] sm:$0xff] %v7930_v59 }
 0x1bb   : > { %v7933_v1 = vadd.f32 %v1445_v46, %v7636_v12  ;;  %2408 = vmatprep.mubr.f32.mxu0 %v9655_v0  ;;  %v7941_v6 = vpop.f32.mrf.mxu1 }
 0x1bc   : > { %v7939_v53 = vpop.f32.mrf.mxu0  ;;  %9793 = vst [vmem:[#allocation71_spill] sm:$0xff] %v7941_v6 }
 0x1bd   : > { %9791 = vst [vmem:[#allocation70_spill] sm:$0xff] %v7933_v1  ;;  %v7944_v48 = vpop.f32.mrf.mxu1 }
 0x1be   : > { %v1451_v20 = vpop.f32.mrf.mxu0  ;;  %5732 = vmatmul.mubr.msk.f32.gmra.mxu0 %vm619_vm2, %v2109_v33  ;;  %9794 = vst [vmem:[#allocation72_spill] sm:$0xff] %v7944_v48 }
 0x1bf   : > { %v7947_v44 = vadd.f32 %v1451_v20, %v7651_v30  ;;  %v7951_v46 = vpop.f32.mrf.mxu1 }
 0x1c0   : > { %v7949_v12 = vpop.f32.mrf.mxu0  ;;  %9796 = vst [vmem:[#allocation74_spill] sm:$0xff] %v7951_v46 }
 0x1c1   : > { %9795 = vst [vmem:[#allocation73_spill] sm:$0xff] %v7947_v44  ;;  %v7953_v17 = vpop.f32.mrf.mxu1 }
 0x1c2   : > { %v1457_v0 = vpop.f32.mrf.mxu0  ;;  %9797 = vst [vmem:[#allocation75_spill] sm:$0xff] %v7953_v17 }
 0x1c3   : > { %v7956_v62 = vadd.f32 %v1457_v0, %v7663_v40  ;;  %v7960_v49 = vpop.f32.mrf.mxu1 }
 0x1c4   : > { %v7958_v43 = vpop.f32.mrf.mxu0  ;;  %9799 = vst [vmem:[#allocation77_spill] sm:$0xff] %v7960_v49 }
 0x1c5   : > { %9798 = vst [vmem:[#allocation76_spill] sm:$0xff] %v7956_v62  ;;  %v7962_v15 = vpop.f32.mrf.mxu1 }
 0x1c6   : > { %v1463_v33 = vpop.f32.mrf.mxu0  ;;  %9800 = vst [vmem:[#allocation78_spill] sm:$0xff] %v7962_v15 }
 0x1c7   : > { %v7965_v30 = vadd.f32 %v1463_v33, %v7673_v52  ;;  %v7969_v5 = vpop.f32.mrf.mxu1 }
 0x1c8   : > { %v7967_v20 = vpop.f32.mrf.mxu0  ;;  %9803 = vst [vmem:[#allocation81_spill] sm:$0xff] %v7969_v5 }
 0x1c9   : > { %9801 = vst [vmem:[#allocation79_spill] sm:$0xff] %v7965_v30  ;;  %9802 = vst [vmem:[#allocation80_spill] sm:$0xff] %v7967_v20  ;;  %v7971_v1 = vpop.f32.mrf.mxu1 }
 0x1ca   : > { %v1469_v59 = vpop.f32.mrf.mxu0  ;;  %9804 = vst [vmem:[#allocation82_spill] sm:$0xff] %v7971_v1 }
 0x1cb   : > { %v7974_v0 = vadd.f32 %v1469_v59, %v7683_v27  ;;  %v7978_v6 = vpop.f32.mrf.mxu1 }
 0x1cc   : > { %v7976_v40 = vpop.f32.mrf.mxu0  ;;  %9807 = vst [vmem:[#allocation85_spill] sm:$0xff] %v7978_v6 }
 0x1cd   : > { %9805 = vst [vmem:[#allocation83_spill] sm:$0xff] %v7974_v0  ;;  %9806 = vst [vmem:[#allocation84_spill] sm:$0xff] %v7976_v40  ;;  %v7980_v44 = vpop.f32.mrf.mxu1 }
 0x1ce   : > { %v1475_v48 = vpop.f32.mrf.mxu0  ;;  %9808 = vst [vmem:[#allocation86_spill] sm:$0xff] %v7980_v44 }
 0x1cf   : > { %v7983_v52 = vadd.f32 %v1475_v48, %v7693_v42  ;;  %v7987_v46 = vpop.f32.mrf.mxu1 }
 0x1d0   : > { %v7985_v33 = vpop.f32.mrf.mxu0  ;;  %9810 = vst [vmem:[#allocation88_spill] sm:$0xff] %v7987_v46 }
 0x1d1   : > { %9809 = vst [vmem:[#allocation87_spill] sm:$0xff] %v7983_v52  ;;  %v7989_v62 = vpop.f32.mrf.mxu1 }
 0x1d2   : > { %v1481_v17 = vpop.f32.mrf.mxu0  ;;  %9811 = vst [vmem:[#allocation89_spill] sm:$0xff] %v7989_v62 }
 0x1d3   : > { %v7992_v27 = vadd.f32 %v1481_v17, %v7703_v19  ;;  %v7996_v49 = vpop.f32.mrf.mxu1 }
 0x1d4   : > { %v7994_v59 = vpop.f32.mrf.mxu0  ;;  %9813 = vst [vmem:[#allocation91_spill] sm:$0xff] %v7996_v49 }
 0x1d5   : > { %9812 = vst [vmem:[#allocation90_spill] sm:$0xff] %v7992_v27  ;;  %v7998_v30 = vpop.f32.mrf.mxu1 }
 0x1d6   : > { %v1487_v15 = vpop.f32.mrf.mxu0  ;;  %9814 = vst [vmem:[#allocation92_spill] sm:$0xff] %v7998_v30 }
 0x1d7   : > { %v8001_v42 = vadd.f32 %v1487_v15, %v7713_v13  ;;  %v8005_v5 = vpop.f32.mrf.mxu1 }
 0x1d8   : > { %v8003_v48 = vpop.f32.mrf.mxu0  ;;  %9816 = vst [vmem:[#allocation94_spill] sm:$0xff] %v8005_v5 }
 0x1d9   : > { %9815 = vst [vmem:[#allocation93_spill] sm:$0xff] %v8001_v42  ;;  %v8007_v0 = vpop.f32.mrf.mxu1 }
 0x1da   : > { %v1493_v1 = vpop.f32.mrf.mxu0 }
 0x1db   : > { %v8010_v19 = vadd.f32 %v1493_v1, %v7723_v3  ;;  %v8014_v44 = vpop.f32.mrf.mxu1 }
 0x1dc   : > { %v8012_v17 = vpop.f32.mrf.mxu0 }
 0x1dd   : > { %v8016_v6 = vpop.f32.mrf.mxu1 }
 0x1de   : > { %v1499_v52 = vpop.f32.mrf.mxu0 }
 0x1df   : > { %v8019_v13 = vadd.f32 %v1499_v52, %v7733_v58  ;;  %v8023_v62 = vpop.f32.mrf.mxu1 }
 0x1e0   : > { %v8021_v15 = vpop.f32.mrf.mxu0  ;;  %9817 = vst [vmem:[#allocation95_spill] sm:$0xff] %v8023_v62 }
 0x1e1   : > { %v1925_v49 = vpop.f32.mrf.mxu1 }
 0x1e2   : > { %v1505_v27 = vpop.f32.mrf.mxu0 }
 0x1e3   : > { %v1608_v46 = vadd.f32 %v1505_v27, %v7743_v61 }
 0x1e4   : > { %v8026_v3 = vpop.f32.mrf.mxu0 }
 0x1e5   : > { %v8028_v1 = vadd.f32 %v1925_v49, %v1608_v46 }
 0x1e6   : > { %v1511_v30 = vpop.f32.mrf.mxu0 }
 0x1e7   : > { %v8031_v42 = vadd.f32 %v1511_v30, %v7753_v4 }
 0x1e8   : > { %v8033_v40 = vpop.f32.mrf.mxu0 }
 0x1e9   : > { %9818 = vst [vmem:[#allocation96_spill] sm:$0xff] %v8031_v42  ;;  %9819 = vst [vmem:[#allocation97_spill] sm:$0xff] %v8033_v40 }
 0x1ea   : > { %v1517_v58 = vpop.f32.mrf.mxu0 }
 0x1eb   : > { %v8036_v52 = vadd.f32 %v1517_v58, %v7763_v34 }
 0x1ec   : > { %v8038_v20 = vpop.f32.mrf.mxu0 }
 0x1ed   : > { %9820 = vst [vmem:[#allocation98_spill] sm:$0xff] %v8036_v52  ;;  %9821 = vst [vmem:[#allocation99_spill] sm:$0xff] %v8038_v20 }
 0x1ee   : > { %v1523_v62 = vpop.f32.mrf.mxu0 }
 0x1ef   : > { %v8041_v5 = vadd.f32 %v1523_v62, %v7773_v41 }
 0x1f0   : > { %v8043_v61 = vpop.f32.mrf.mxu0 }
 0x1f1   : > { %9822 = vst [vmem:[#allocation100_spill] sm:$0xff] %v8041_v5  ;;  %9823 = vst [vmem:[#allocation101_spill] sm:$0xff] %v8043_v61 }
 0x1f2   : > { %v1529_v49 = vpop.f32.mrf.mxu0 }
 0x1f3   : > { %v8046_v46 = vadd.f32 %v1529_v49, %v7783_v47 }
 0x1f4   : > { %v8048_v4 = vpop.f32.mrf.mxu0 }
 0x1f5   : > { %9824 = vst [vmem:[#allocation102_spill] sm:$0xff] %v8046_v46  ;;  %9825 = vst [vmem:[#allocation103_spill] sm:$0xff] %v8048_v4 }
 0x1f6   : > { %v1535_v30 = vpop.f32.mrf.mxu0 }
 0x1f7   : > { %v8051_v27 = vadd.f32 %v1535_v30, %v7793_v50 }
 0x1f8   : > { %v8053_v34 = vpop.f32.mrf.mxu0 }
 0x1f9   : > { %9826 = vst [vmem:[#allocation104_spill] sm:$0xff] %v8051_v27  ;;  %9827 = vst [vmem:[#allocation105_spill] sm:$0xff] %v8053_v34 }
 0x1fa   : > { %v1541_v58 = vpop.f32.mrf.mxu0 }
 0x1fb   : > { %v8056_v42 = vadd.f32 %v1541_v58, %v7803_v37 }
 0x1fc   : > { %v8058_v41 = vpop.f32.mrf.mxu0 }
 0x1fd   : > { %9828 = vst [vmem:[#allocation106_spill] sm:$0xff] %v8056_v42  ;;  %9829 = vst [vmem:[#allocation107_spill] sm:$0xff] %v8058_v41  ;;  %v8109_v41 = vpop.f32.mrf.mxu1 }
 0x1fe   : > { %v1547_v62 = vpop.f32.mrf.mxu0 }
 0x1ff   : > { %v8061_v52 = vadd.f32 %v1547_v62, %v7813_v57 }
 0x200   : > { %v8063_v47 = vpop.f32.mrf.mxu0 }
 0x201   : > { %9830 = vst [vmem:[#allocation108_spill] sm:$0xff] %v8061_v52  ;;  %9831 = vst [vmem:[#allocation109_spill] sm:$0xff] %v8063_v47 }
 0x202   : > { %v1553_v49 = vpop.f32.mrf.mxu0 }
 0x203   : > { %v8066_v5 = vadd.f32 %v1553_v49, %v7823_v9 }
 0x204   : > { %v8068_v50 = vpop.f32.mrf.mxu0 }
 0x205   : > { %9832 = vst [vmem:[#allocation110_spill] sm:$0xff] %v8066_v5  ;;  %9833 = vst [vmem:[#allocation111_spill] sm:$0xff] %v8068_v50 }
 0x206   : > { %v1559_v30 = vpop.f32.mrf.mxu0 }
 0x207   : > { %v8071_v46 = vadd.f32 %v1559_v30, %v7833_v14 }
 0x208   : > { %v8073_v37 = vpop.f32.mrf.mxu0 }
 0x209   : > { %9834 = vst [vmem:[#allocation112_spill] sm:$0xff] %v8071_v46  ;;  %9835 = vst [vmem:[#allocation113_spill] sm:$0xff] %v8073_v37  ;;  %v8115_v46 = vpop.f32.mrf.mxu1 }
 0x20a   : > { %v1565_v58 = vpop.f32.mrf.mxu0  ;;  %9851 = vst [vmem:[#allocation129_spill] sm:$0xff] %v8115_v46 }
 0x20b   : > { %v8076_v27 = vadd.f32 %v1565_v58, %v7843_v18 }
 0x20c   : > { %v8078_v57 = vpop.f32.mrf.mxu0 }
 0x20d   : > { %9836 = vst [vmem:[#allocation114_spill] sm:$0xff] %v8076_v27  ;;  %9837 = vst [vmem:[#allocation115_spill] sm:$0xff] %v8078_v57 }
 0x20e   : > { %v1571_v62 = vpop.f32.mrf.mxu0 }
 0x20f   : > { %v8081_v42 = vadd.f32 %v1571_v62, %v7853_v54  ;;  %v2596_v62 = vld [vmem:[#allocation7 + $0x8] sm:$0xff] }
 0x210   : > { %v8083_v9 = vpop.f32.mrf.mxu0  ;;  %5733 = vmatprep.mubr.msk.f32.mxu1 %vm2619_vm5, %v2596_v62 }
 0x211   : > { %9838 = vst [vmem:[#allocation116_spill] sm:$0xff] %v8081_v42  ;;  %9839 = vst [vmem:[#allocation117_spill] sm:$0xff] %v8083_v9 }
 0x212   : > { %v2248_v49 = vpop.f32.mrf.mxu0 }
 0x213   : > { %v8086_v52 = vadd.f32 %v2248_v49, %v7871_v2 }
 0x214   : > { %v8088_v14 = vpop.f32.mrf.mxu0 }
 0x215   : > { %9840 = vst [vmem:[#allocation118_spill] sm:$0xff] %v8086_v52  ;;  %9841 = vst [vmem:[#allocation119_spill] sm:$0xff] %v8088_v14 }
 0x216   : > { %v2254_v30 = vpop.f32.mrf.mxu0 }
 0x217   : > { %v8091_v4 = vadd.f32 %v2254_v30, %v7882_v28 }
 0x218   : > { %v8093_v18 = vpop.f32.mrf.mxu0 }
 0x219   : > { %9842 = vst [vmem:[#allocation120_spill] sm:$0xff] %v8091_v4  ;;  %9843 = vst [vmem:[#allocation121_spill] sm:$0xff] %v8093_v18 }
 0x21a   : > { %v2260_v58 = vpop.f32.mrf.mxu0 }
 0x21b   : > { %v8096_v5 = vadd.f32 %v2260_v58, %v7893_v25 }
 0x21c   : > { %v8098_v54 = vpop.f32.mrf.mxu0 }
 0x21d   : > { %9844 = vst [vmem:[#allocation122_spill] sm:$0xff] %v8096_v5  ;;  %9845 = vst [vmem:[#allocation123_spill] sm:$0xff] %v8098_v54  ;;  %v1078_v54 = vadd.f32 %v7629_v63, %v7627_v60 }
 0x21e   : > { %v2266_v34 = vpop.f32.mrf.mxu0 }
 0x21f   : > { %v8102_v2 = vadd.f32 %v2266_v34, %v7904_v32  ;;  %v8121_v32 = vpop.f32.mrf.mxu1 }
 0x220   : > { %v8104_v49 = vpop.f32.mrf.mxu0  ;;  %9854 = vst [vmem:[#allocation132_spill] sm:$0xff] %v8121_v32 }
 0x221   : > { %9846 = vst [vmem:[#allocation124_spill] sm:$0xff] %v8102_v2  ;;  %9847 = vst [vmem:[#allocation125_spill] sm:$0xff] %v8104_v49  ;;  %v8163_v2 = vadd.f32 %v7561_v56, %v7559_v55  ;;  %v1132_v55 = vadd.f32 %v7730_v51, %v7728_v36  ;;  %v2471_v56 = vld [vmem:[%s9634_s2] sm:$0x3]  ;;  %v9869_v36 = vld [vmem:[#allocation23_spill] sm:$0xff] }
 0x222   : > { %v2272_v28 = vpop.f32.mrf.mxu0  ;;  %v9870_v51 = vld [vmem:[#allocation24_spill] sm:$0xff] }
 0x223   : > { %v8107_v30 = vadd.f32 %v2272_v28, %v7915_v11  ;;  %v8127_v11 = vpop.f32.mrf.mxu1  ;;  %9863 = vst [vmem:[#allocation141_spill] sm:$0xff] %v8163_v2  ;;  %v1108_v49 = vadd.f32 %v9870_v51, %v9869_v36  ;;  %v9871_v2 = vld [vmem:[#allocation29_spill] sm:$0xff] }
 0x224   : > { %v8111_v25 = vpop.f32.mrf.mxu0  ;;  %9857 = vst [vmem:[#allocation135_spill] sm:$0xff] %v8127_v11  ;;  %v2473_v11 = vlaneseq  ;;  %v9881_v51 = vld [vmem:[#allocation61_spill] sm:$0xff] }
 0x225   : > { %9848 = vst [vmem:[#allocation126_spill] sm:$0xff] %v8107_v30  ;;  %9849 = vst [vmem:[#allocation127_spill] sm:$0xff] %v8111_v25  ;;  %v8133_v47 = vpop.f32.mrf.mxu1 }
 0x226   : > { %v8113_v58 = vpop.f32.mrf.mxu0  ;;  %9858 = vst [vmem:[#allocation136_spill] sm:$0xff] %v8133_v47  ;;  %v2474_v4 = vshrl.u32 %v2473_v11, 7  ;;  %v1066_v11 = vadd.f32 %v7603_v23, %v7601_v38  ;;  %v9866_v23 = vld [vmem:[#allocation21_spill] sm:$0xff] }
 0x227   : > { %9850 = vst [vmem:[#allocation128_spill] sm:$0xff] %v8113_v58  ;;  %v8139_v42 = vpop.f32.mrf.mxu1  ;;  %v9873_v58 = vld [vmem:[#allocation31_spill] sm:$0xff] }
 0x228   : > { %v8117_v61 = vpop.f32.mrf.mxu0  ;;  %9859 = vst [vmem:[#allocation137_spill] sm:$0xff] %v8139_v42  ;;  %v2475_v18 = vsub.s32 0, %v2474_v4 }
 0x229   : > { %9852 = vst [vmem:[#allocation130_spill] sm:$0xff] %v8117_v61  ;;  %v8145_v9 = vpop.f32.mrf.mxu1  ;;  %v9878_v61 = vld [vmem:[#allocation28_spill] sm:$0xff] }
 0x22a   : > { %v8119_v62 = vpop.f32.mrf.mxu0  ;;  %9860 = vst [vmem:[#allocation138_spill] sm:$0xff] %v8145_v9  ;;  %v8167_v9 = vadd.f32 %v7575_v10, %v7573_v7  ;;  %v2479_v7 = vsub.s32 1, %v2474_v4  ;;  %v1084_v10 = vadd.f32 %v7647_v22, %v7645_v16  ;;  %v9872_v4 = vld [vmem:[#allocation30_spill] sm:$0xff]  ;;  %v9874_v16 = vld [vmem:[#allocation32_spill] sm:$0xff] }
 0x22b   : > { %9853 = vst [vmem:[#allocation131_spill] sm:$0xff] %v8119_v62  ;;  %v8151_v52 = vpop.f32.mrf.mxu1  ;;  %v1126_v25 = vadd.f32 %v9872_v4, %v9871_v2  ;;  %v1138_v22 = vadd.f32 %v9874_v16, %v9873_v58  ;;  %v9885_v16 = vld [vmem:[#allocation80_spill] sm:$0xff] }
 0x22c   : > { %v8123_v34 = vpop.f32.mrf.mxu0  ;;  %9861 = vst [vmem:[#allocation139_spill] sm:$0xff] %v8151_v52  ;;  %9864 = vst [vmem:[#allocation142_spill] sm:$0xff] %v8167_v9  ;;  %v1060_v52 = vadd.f32 %v7589_v26, %v7587_v24  ;;  %v1090_v24 = vadd.f32 %v7660_v35, %v7658_v31  ;;  %v9865_v26 = vld [vmem:[#allocation20_spill] sm:$0xff]  ;;  %v1605_v31 = vadd.f32 %v8012_v17, %v1132_v55  ;;  %v9875_v35 = vld [vmem:[#allocation25_spill] sm:$0xff] }
 0x22d   : > { %9855 = vst [vmem:[#allocation133_spill] sm:$0xff] %v8123_v34  ;;  %v8157_v14 = vpop.f32.mrf.mxu1  ;;  %v1096_v38 = vadd.f32 %v9865_v26, %v7668_v45  ;;  %v9876_v9 = vld [vmem:[#allocation26_spill] sm:$0xff]  ;;  %v9877_v26 = vld [vmem:[#allocation27_spill] sm:$0xff]  ;;  %v8205_v34 = vrot.slane %v2471_v56, %v2475_v18  ;;  %v1603_v2 = vadd.f32 %v8003_v48, %v1126_v25  ;;  %v1607_v58 = vadd.f32 %v8021_v15, %v1138_v22 }
 0x22e   : > { %v8125_v20 = vpop.f32.mrf.mxu0  ;;  %9862 = vst [vmem:[#allocation140_spill] sm:$0xff] %v8157_v14  ;;  %v1072_v14 = vadd.f32 %v7617_v39, %v7615_v29  ;;  %v9867_v29 = vld [vmem:[#allocation22_spill] sm:$0xff]  ;;  %v1114_v45 = vadd.f32 %v9876_v9, %v9875_v35  ;;  %v8212_v17 = vrot.slane %v2471_v56, %v2479_v7  ;;  %v9882_v55 = vld [vmem:[#allocation63_spill] sm:$0xff]  ;;  %v8224_v18 = vadd.f32 %v7939_v53, %v1084_v10 }
 0x22f   : > { %9856 = vst [vmem:[#allocation134_spill] sm:$0xff] %v8125_v20  ;;  %v1102_v39 = vadd.f32 %v9867_v29, %v9866_v23  ;;  %v8190_v60 = vpop.f32.mrf.mxu1  ;;  %v1120_v23 = vadd.f32 %v9878_v61, %v9877_v26  ;;  %v9879_v29 = vld [vmem:[#allocation33_spill] sm:$0xff]  ;;  %v8208_v20 = vadd.f32 %v9881_v51, %v1060_v52  ;;  %v8215_v9 = vadd.f32 %v9882_v55, %v1066_v11  ;;  %v9883_v56 = vld [vmem:[#allocation94_spill] sm:$0xff]  ;;  %v9884_v7 = vld [vmem:[#allocation95_spill] sm:$0xff] }
 0x230   : > { %v8129_v28 = vpop.f32.mrf.mxu0  ;;  %9868 = vst [vmem:[#allocation20_spill] sm:$0xff] %v8190_v60  ;;  %v9880_v60 = vld [vmem:[#allocation34_spill] sm:$0xff]  ;;  %v8218_v61 = vadd.f32 %v7911_v21, %v1072_v14  ;;  %v1599_v48 = vadd.f32 %v7985_v33, %v1114_v45  ;;  %v2025_v25 = vadd.f32 %v8014_v44, %v1605_v31  ;;  %v2026_v11 = vadd.f32 %v8016_v6, %v8019_v13  ;;  %v9886_v6 = vld [vmem:[#allocation84_spill] sm:$0xff] }
 0x231   : > { %v1144_v62 = vadd.f32 %v9880_v60, %v9879_v29  ;;  %v8221_v60 = vadd.f32 %v7925_v8, %v1078_v54  ;;  %v8226_v52 = vpop.f32.mrf.mxu1  ;;  %v1601_v15 = vadd.f32 %v7994_v59, %v1120_v23  ;;  %v8234_v21 = vadd.f32 %v7949_v12, %v1090_v24  ;;  %v9887_v12 = vld [vmem:[#allocation93_spill] sm:$0xff]  ;;  %v9888_v24 = vld [vmem:[#allocation92_spill] sm:$0xff]  ;;  %v9891_v23 = vld [vmem:[#allocation90_spill] sm:$0xff] }
 0x232   : > { %v8131_v27 = vpop.f32.mrf.mxu0  ;;  %v1593_v8 = vadd.f32 %v7958_v43, %v1096_v38  ;;  %v2024_v53 = vadd.f32 %v8007_v0, %v8010_v19  ;;  %v2023_v33 = vadd.f32 %v9883_v56, %v1603_v2  ;;  %v2027_v59 = vadd.f32 %v9884_v7, %v1607_v58  ;;  %v9889_v19 = vld [vmem:[#allocation88_spill] sm:$0xff]  ;;  %v9892_v29 = vld [vmem:[#allocation89_spill] sm:$0xff]  ;;  %v9903_v7 = vld [vmem:[#allocation83_spill] sm:$0xff] }
 0x233   : > { %v1609_v14 = vadd.f32 %v8026_v3, %v1144_v62  ;;  %v1595_v22 = vadd.f32 %v9885_v16, %v1102_v39  ;;  %v1597_v13 = vadd.f32 %v9886_v6, %v1108_v49  ;;  %v2022_v31 = vadd.f32 %v9888_v24, %v9887_v12  ;;  %v8246_v43 = vpop.f32.mrf.mxu1  ;;  %v9890_v62 = vld [vmem:[#allocation91_spill] sm:$0xff] }
 0x234   : > { %v8135_v40 = vpop.f32.mrf.mxu0  ;;  %v2019_v3 = vadd.f32 %v9889_v19, %v1599_v48  ;;  %v2021_v35 = vadd.f32 %v9890_v62, %v1601_v15  ;;  %v2020_v51 = vadd.f32 %v9892_v29, %v9891_v23  ;;  %v9897_v48 = vld [vmem:[#allocation85_spill] sm:$0xff] }
 0x235   : > { %v2029_v39 = vadd.f32 %v8109_v41, %v1609_v14  ;;  %v2017_v15 = vadd.f32 %v9897_v48, %v1597_v13  ;;  %v9899_v41 = vld [vmem:[#allocation86_spill] sm:$0xff] }
 0x236   : > { %v8137_v46 = vpop.f32.mrf.mxu0 }
 0x238   : > { %v8141_v50 = vpop.f32.mrf.mxu0 }
 0x23a   : > { %v8143_v32 = vpop.f32.mrf.mxu0 }
 0x23c   : > { %v8147_v37 = vpop.f32.mrf.mxu0 }
 0x23d   : > { %v2436_v12 = vadd.f32 %v8147_v37, %v2017_v15 }
 0x23e   : > { %v8149_v57 = vpop.f32.mrf.mxu0 }
 0x240   : > { %v8153_v47 = vpop.f32.mrf.mxu0 }
 0x242   : > { %v8155_v5 = vpop.f32.mrf.mxu0 }
 0x244   : > { %v8159_v42 = vpop.f32.mrf.mxu0 }
 0x245   : > { %v2440_v55 = vadd.f32 %v8159_v42, %v2021_v35  ;;  %v9912_v35 = vld [vmem:[#allocation77_spill] sm:$0xff] }
 0x246   : > { %v2326_v30 = vpop.f32.mrf.mxu0 }
 0x247   : > { %v2441_v2 = vadd.f32 %v2326_v30, %v2022_v31  ;;  %v8294_v24 = vadd.f32 %v8212_v17, %v2440_v55 }
 0x248   : > { %v2328_v63 = vpop.f32.mrf.mxu0 }
 0x249   : > { %v2442_v45 = vadd.f32 %v2328_v63, %v2023_v33  ;;  %9908 = vst [vmem:[#allocation26_spill] sm:$0xff] %v8294_v24 }
 0x24a   : > { %v2332_v36 = vpop.f32.mrf.mxu0 }
 0x24b   : > { %v2443_v38 = vadd.f32 %v2332_v36, %v2024_v53  ;;  %v2439_v53 = vadd.f32 %v8155_v5, %v2020_v51  ;;  %v8277_v56 = vadd.f32 %v8212_v17, %v2442_v45  ;;  %v8286_v5 = vadd.f32 %v8205_v34, %v2441_v2  ;;  %v9915_v51 = vld [vmem:[#allocation75_spill] sm:$0xff] }
 0x24c   : > { %v2334_v4 = vpop.f32.mrf.mxu0  ;;  %v2013_v45 = vadd.f32 %v9912_v35, %v1593_v8 }
 0x24d   : > { %v2444_v10 = vadd.f32 %v2334_v4, %v2025_v25  ;;  %v9898_v25 = vld [vmem:[#allocation87_spill] sm:$0xff]  ;;  %v8273_v42 = vadd.f32 %v8205_v34, %v2443_v38  ;;  %9901 = vst [vmem:[#allocation30_spill] sm:$0xff] %v8277_v56  ;;  %9905 = vst [vmem:[#allocation32_spill] sm:$0xff] %v8286_v5  ;;  %v9910_v38 = vld [vmem:[#allocation78_spill] sm:$0xff]  ;;  %v8305_v62 = vadd.f32 %v8205_v34, %v2439_v53  ;;  %v9668_v29 = vmax.f32 %v8277_v56, 0.0 }
 0x24e   : > { %v2338_v54 = vpop.f32.mrf.mxu0  ;;  %v2018_v30 = vadd.f32 %v9899_v41, %v9898_v25  ;;  %v9666_v8 = vmax.f32 %v8286_v5, 0.0  ;;  %v2432_v15 = vadd.f32 %v8135_v40, %v2013_v45  ;;  %v8335_v25 = vadd.f32 %v8212_v17, %v2436_v12  ;;  %v9919_v41 = vld [vmem:[#allocation73_spill] sm:$0xff]  ;;  %v9993_v5 = vld [vmem:[#allocation48_spill] sm:$0xff] }
 0x24f   : > { %v2445_v44 = vadd.f32 %v2338_v54, %v2026_v11  ;;  %v8258_v36 = vadd.f32 %v8212_v17, %v2444_v10  ;;  %v8269_v11 = vpop.f32.mrf.mxu1  ;;  %9900 = vst [vmem:[#allocation29_spill] sm:$0xff] %v8273_v42  ;;  %v2438_v54 = vadd.f32 %v8153_v47, %v2019_v3  ;;  %v9907_v47 = vld [vmem:[#allocation81_spill] sm:$0xff]  ;;  %9911 = vst [vmem:[#allocation27_spill] sm:$0xff] %v8305_v62  ;;  %v9670_v37 = vmax.f32 %v8273_v42, 0.0  ;;  %v9994_v42 = vld [vmem:[#allocation43_spill] sm:$0xff] }
 0x250   : > { %v2340_v0 = vpop.f32.mrf.mxu0  ;;  %v2015_v13 = vadd.f32 %v9907_v47, %v1595_v22  ;;  %9918 = vst [vmem:[#allocation34_spill] sm:$0xff] %v8335_v25  ;;  %v9662_v40 = vmax.f32 %v8305_v62, 0.0  ;;  %v9925_v12 = vld [vmem:[#allocation69_spill] sm:$0xff] }
 0x251   : > { %v2446_v26 = vadd.f32 %v2340_v0, %v2027_v59  ;;  %v8254_v49 = vadd.f32 %v8205_v34, %v2445_v44  ;;  %9894 = vst [vmem:[#allocation22_spill] sm:$0xff] %v8258_v36  ;;  %v9904_v59 = vld [vmem:[#allocation82_spill] sm:$0xff]  ;;  %v2437_v44 = vadd.f32 %v8149_v57, %v2018_v30  ;;  %v9671_v31 = vmax.f32 %v8258_v36, 0.0  ;;  %v9909_v57 = vld [vmem:[#allocation79_spill] sm:$0xff]  ;;  %v8301_v19 = vpop.f32.mrf.mxu1  ;;  %v9920_v30 = vld [vmem:[#allocation72_spill] sm:$0xff] }
 0x252   : > { %v2344_v58 = vpop.f32.mrf.mxu0  ;;  %v2016_v10 = vadd.f32 %v9904_v59, %v9903_v7  ;;  %v2014_v0 = vadd.f32 %v9910_v38, %v9909_v57  ;;  %v8315_v23 = vadd.f32 %v8212_v17, %v2438_v54  ;;  %v2010_v53 = vadd.f32 %v9920_v30, %v9919_v41  ;;  %v9922_v59 = vld [vmem:[#allocation71_spill] sm:$0xff]  ;;  %v9926_v38 = vld [vmem:[#allocation134_spill] sm:$0xff] }
 0x253   : > { %9893 = vst [vmem:[#allocation21_spill] sm:$0xff] %v8254_v49  ;;  %v8261_v4 = vadd.f32 %v8212_v17, %v2446_v26  ;;  %v8264_v63 = vadd.f32 %v2344_v58, %v8028_v1  ;;  %v9672_v16 = vmax.f32 %v8254_v49, 0.0  ;;  %v2434_v26 = vadd.f32 %v8141_v50, %v2015_v13  ;;  %v9917_v50 = vld [vmem:[#allocation74_spill] sm:$0xff]  ;;  %v9933_v30 = vld [vmem:[#allocation131_spill] sm:$0xff] }
 0x254   : > { %v2346_v14 = vpop.f32.mrf.mxu0  ;;  %v2435_v3 = vadd.f32 %v8143_v32, %v2016_v10  ;;  %9913 = vst [vmem:[#allocation28_spill] sm:$0xff] %v8315_v23  ;;  %v9914_v32 = vld [vmem:[#allocation76_spill] sm:$0xff]  ;;  %v2433_v2 = vadd.f32 %v8137_v46, %v2014_v0  ;;  %v8324_v58 = vadd.f32 %v8205_v34, %v2437_v44  ;;  %v2011_v48 = vadd.f32 %v9917_v50, %v8234_v21  ;;  %v9924_v13 = vld [vmem:[#allocation70_spill] sm:$0xff] }
 0x255   : > { %9895 = vst [vmem:[#allocation23_spill] sm:$0xff] %v8261_v4  ;;  %9896 = vst [vmem:[#allocation24_spill] sm:$0xff] %v8264_v63  ;;  %v9675_v1 = vmax.f32 %v8261_v4, 0.0  ;;  %v8280_v33 = vadd.f32 %v2346_v14, %v2029_v39  ;;  %v2012_v39 = vadd.f32 %v9915_v51, %v9914_v32  ;;  %v9663_v46 = vmax.f32 %v8294_v24, 0.0  ;;  %v8342_v14 = vpop.f32.mrf.mxu1  ;;  %v9932_v50 = vld [vmem:[#allocation66_spill] sm:$0xff] }
 0x256   : > { %v8289_v6 = vpop.f32.mrf.mxu0  ;;  %9916 = vst [vmem:[#allocation33_spill] sm:$0xff] %v8324_v58  ;;  %v8346_v7 = vadd.f32 %v8205_v34, %v2435_v3  ;;  %v2009_v10 = vadd.f32 %v9922_v59, %v8224_v18  ;;  %v2430_v44 = vadd.f32 %v8129_v28, %v2011_v48  ;;  %v8357_v47 = vadd.f32 %v8212_v17, %v2434_v26  ;;  %v9928_v28 = vld [vmem:[#allocation68_spill] sm:$0xff]  ;;  %v9929_v26 = vld [vmem:[#allocation133_spill] sm:$0xff]  ;;  %v10002_v4 = vld [vmem:[#allocation114_spill] sm:$0xff] }
 0x257   : > { %9902 = vst [vmem:[#allocation31_spill] sm:$0xff] %v8280_v33  ;;  %9906 = vst [vmem:[#allocation25_spill] sm:$0xff] %v8289_v6  ;;  %2656 = vmatprep.subr.mxu1 %v9675_v1  ;;  %v2431_v54 = vadd.f32 %v8131_v27, %v2012_v39  ;;  %v9659_v27 = vmax.f32 %v8315_v23, 0.0  ;;  %v2008_v57 = vadd.f32 %v9925_v12, %v9924_v13  ;;  %v9657_v18 = vmax.f32 %v8324_v58, 0.0  ;;  %v8384_v41 = vpop.f32.mrf.mxu1  ;;  %v9936_v12 = vld [vmem:[#allocation130_spill] sm:$0xff]  ;;  %v9986_v58 = vld [vmem:[#allocation37_spill] sm:$0xff] }
 0x258   : > { %v8308_v22 = vpop.f32.mrf.mxu0  ;;  %2657 = vmatpush1.msra.mxu1 %v9672_v16  ;;  %9921 = vst [vmem:[#allocation61_spill] sm:$0xff] %v8346_v7  ;;  %9923 = vst [vmem:[#allocation63_spill] sm:$0xff] %v8357_v47  ;;  %v2429_v0 = vadd.f32 %v9926_v38, %v2010_v53  ;;  %v8366_v3 = vadd.f32 %v8205_v34, %v2433_v2  ;;  %v2007_v45 = vadd.f32 %v9928_v28, %v8221_v60  ;;  %v9931_v2 = vld [vmem:[#allocation67_spill] sm:$0xff]  ;;  %v9987_v23 = vld [vmem:[#allocation38_spill] sm:$0xff] }
 0x259   : > { %2658 = vmatprep.subr.mxu1 %v9671_v31  ;;  %v2428_v32 = vadd.f32 %v9929_v26, %v2009_v10  ;;  %v8377_v51 = vadd.f32 %v8212_v17, %v2432_v15  ;;  %v9658_v39 = vmax.f32 %v8335_v25, 0.0  ;;  %v2006_v48 = vadd.f32 %v9932_v50, %v9931_v2  ;;  %v9935_v15 = vld [vmem:[#allocation65_spill] sm:$0xff]  ;;  %v9939_v26 = vld [vmem:[#allocation59_spill] sm:$0xff]  ;;  %v9940_v50 = vld [vmem:[#allocation128_spill] sm:$0xff] }
 0x25a   : > { %v8327_v55 = vpop.f32.mrf.mxu0  ;;  %2659 = vmatpush1.msra.mxu1 %v9670_v37  ;;  %9927 = vst [vmem:[#allocation94_spill] sm:$0xff] %v8366_v3  ;;  %v2427_v53 = vadd.f32 %v9933_v30, %v2008_v57  ;;  %v8388_v59 = vadd.f32 %v8205_v34, %v2431_v54  ;;  %v9660_v60 = vmax.f32 %v8346_v7, 0.0  ;;  %v2005_v13 = vadd.f32 %v9935_v15, %v8218_v61  ;;  %v9938_v54 = vld [vmem:[#allocation142_spill] sm:$0xff]  ;;  %v9984_v7 = vld [vmem:[#allocation113_spill] sm:$0xff] }
 0x25b   : > { %2660 = vmatprep.subr.mxu1 %v9668_v29  ;;  %9930 = vst [vmem:[#allocation95_spill] sm:$0xff] %v8377_v51  ;;  %v2426_v38 = vadd.f32 %v9936_v12, %v2007_v45  ;;  %v8399_v28 = vadd.f32 %v8212_v17, %v2430_v44  ;;  %v9661_v57 = vmax.f32 %v8357_v47, 0.0  ;;  %v1579_v2 = vadd.f32 %v9939_v26, %v9938_v54  ;;  %v9942_v44 = vld [vmem:[#allocation64_spill] sm:$0xff]  ;;  %v9943_v12 = vld [vmem:[#allocation127_spill] sm:$0xff]  ;;  %v9946_v54 = vld [vmem:[#allocation57_spill] sm:$0xff] }
 0x25c   : > { %v8349_v21 = vpop.f32.mrf.mxu0  ;;  %2661 = vmatpush1.msra.mxu1 %v9666_v8  ;;  %9934 = vst [vmem:[#allocation80_spill] sm:$0xff] %v8388_v59  ;;  %v2425_v30 = vadd.f32 %v9940_v50, %v2006_v48  ;;  %v9665_v61 = vmax.f32 %v8366_v3, 0.0  ;;  %v2003_v45 = vadd.f32 %v9942_v44, %v8215_v9  ;;  %v9664_v48 = vmax.f32 %v8377_v51, 0.0  ;;  %v8426_v50 = vpop.f32.mrf.mxu1  ;;  %v9982_v47 = vld [vmem:[#allocation49_spill] sm:$0xff] }
 0x25d   : > { %2662 = vmatprep.subr.mxu1 %v9663_v46  ;;  %9937 = vst [vmem:[#allocation84_spill] sm:$0xff] %v8399_v28  ;;  %v9667_v9 = vmax.f32 %v8388_v59, 0.0  ;;  %v1156_v62 = vadd.f32 %v9987_v23, %v9986_v58  ;;  %v9998_v23 = vld [vmem:[#allocation45_spill] sm:$0xff]  ;;  %v9999_v58 = vld [vmem:[#allocation46_spill] sm:$0xff] }
 0x25e   : > { %v8369_v35 = vpop.f32.mrf.mxu0  ;;  %2663 = vmatpush1.msra.mxu1 %v9662_v40  ;;  %v8440_v40 = vadd.f32 %v8212_v17, %v2426_v38  ;;  %v1180_v49 = vadd.f32 %v9999_v58, %v9998_v23  ;;  %v10006_v23 = vld [vmem:[#allocation107_spill] sm:$0xff] }
 0x25f   : > { %2664 = vmatprep.subr.mxu1 %v9659_v27  ;;  %v8419_v27 = vadd.f32 %v8212_v17, %v2428_v32  ;;  %v9948_v32 = vld [vmem:[#allocation62_spill] sm:$0xff] }
 0x260   : > { %v8391_v10 = vpop.f32.mrf.mxu0  ;;  %2665 = vmatpush1.msra.mxu1 %v9657_v18  ;;  %v8408_v18 = vadd.f32 %v8205_v34, %v2429_v0  ;;  %v9945_v0 = vld [vmem:[#allocation141_spill] sm:$0xff]  ;;  %9950 = vst [vmem:[#allocation91_spill] sm:$0xff] %v8440_v40  ;;  %v1621_v58 = vadd.f32 %v10006_v23, %v1180_v49  ;;  %v10017_v23 = vld [vmem:[#allocation139_spill] sm:$0xff] }
 0x261   : > { %2666 = vmatprep.subr.mxu1 %v9658_v39  ;;  %v2424_v39 = vadd.f32 %v9943_v12, %v2005_v13  ;;  %9944 = vst [vmem:[#allocation92_spill] sm:$0xff] %v8419_v27  ;;  %v1577_v26 = vadd.f32 %v9946_v54, %v9945_v0  ;;  %v2001_v13 = vadd.f32 %v9948_v32, %v8208_v20  ;;  %v9949_v12 = vld [vmem:[#allocation125_spill] sm:$0xff]  ;;  %v9669_v0 = vmax.f32 %v8399_v28, 0.0  ;;  %v9952_v20 = vld [vmem:[#allocation60_spill] sm:$0xff]  ;;  %v9953_v32 = vld [vmem:[#allocation123_spill] sm:$0xff] }
 0x262   : > { %9941 = vst [vmem:[#allocation93_spill] sm:$0xff] %v8408_v18  ;;  %v8411_v15 = vpop.f32.mrf.mxu0  ;;  %2667 = vmatpush1.msra.mxu1 %v9660_v60  ;;  %v8429_v60 = vadd.f32 %v8205_v34, %v2427_v53  ;;  %v8446_v53 = vadd.f32 %v8205_v34, %v2425_v30  ;;  %v9674_v54 = vmax.f32 %v8408_v18, 0.0  ;;  %v9673_v30 = vmax.f32 %v8419_v27, 0.0  ;;  %v9977_v18 = vld [vmem:[#allocation55_spill] sm:$0xff]  ;;  %v9978_v28 = vld [vmem:[#allocation56_spill] sm:$0xff] }
 0x263   : > { %2668 = vmatprep.subr.mxu1 %v9661_v57  ;;  %v2422_v57 = vadd.f32 %v9949_v12, %v2003_v45  ;;  %v1999_v45 = vadd.f32 %v9952_v20, %v1579_v2  ;;  %v2420_v38 = vadd.f32 %v9953_v32, %v2001_v13  ;;  %v8456_v12 = vadd.f32 %v8212_v17, %v2424_v39  ;;  %v9957_v39 = vld [vmem:[#allocation58_spill] sm:$0xff]  ;;  %v9958_v13 = vld [vmem:[#allocation121_spill] sm:$0xff] }
 0x264   : > { %9947 = vst [vmem:[#allocation88_spill] sm:$0xff] %v8429_v60  ;;  %v8432_v44 = vpop.f32.mrf.mxu0  ;;  %2669 = vmatpush1.msra.mxu1 %v9665_v61  ;;  %9951 = vst [vmem:[#allocation90_spill] sm:$0xff] %v8446_v53  ;;  %v9955_v61 = vld [vmem:[#allocation126_spill] sm:$0xff]  ;;  %v1997_v2 = vadd.f32 %v9957_v39, %v1577_v26  ;;  %v9678_v31 = vmax.f32 %v8446_v53, 0.0  ;;  %v9962_v26 = vld [vmem:[#allocation119_spill] sm:$0xff]  ;;  %v1210_v59 = vadd.f32 %v9978_v28, %v9977_v18 }
 0x265   : > { %2670 = vmatprep.subr.mxu1 %v9664_v48  ;;  %9954 = vst [vmem:[#allocation89_spill] sm:$0xff] %v8456_v12  ;;  %v8461_v48 = vpop.f32.mrf.mxu1  ;;  %v8465_v8 = vadd.f32 %v8205_v34, %v9955_v61  ;;  %v2418_v20 = vadd.f32 %v9958_v13, %v1999_v45  ;;  %v8475_v32 = vadd.f32 %v8212_v17, %v2422_v57  ;;  %v9676_v61 = vmax.f32 %v8440_v40, 0.0  ;;  %v9975_v40 = vld [vmem:[#allocation51_spill] sm:$0xff]  ;;  %v9990_v18 = vld [vmem:[#allocation41_spill] sm:$0xff]  ;;  %v9991_v28 = vld [vmem:[#allocation42_spill] sm:$0xff] }
 0x266   : > { %v8449_v46 = vpop.f32.mrf.mxu0  ;;  %2671 = vmatpush1.msra.mxu1 %v9667_v9  ;;  %v9677_v9 = vmax.f32 %v8429_v60, 0.0  ;;  %v2416_v45 = vadd.f32 %v9962_v26, %v1997_v2  ;;  %v8491_v57 = vadd.f32 %v8212_v17, %v2420_v38  ;;  %v9679_v39 = vmax.f32 %v8456_v12, 0.0  ;;  %v9967_v26 = vld [vmem:[#allocation120_spill] sm:$0xff]  ;;  %v9970_v12 = vld [vmem:[#allocation118_spill] sm:$0xff] }
 0x267   : > { %2672 = vmatprep.subr.mxu1 %v9669_v0  ;;  %9956 = vst [vmem:[#allocation85_spill] sm:$0xff] %v8465_v8  ;;  %9959 = vst [vmem:[#allocation87_spill] sm:$0xff] %v8475_v32  ;;  %v9960_v0 = vld [vmem:[#allocation124_spill] sm:$0xff]  ;;  %v1981_v13 = vpop.f32.mrf.mxu1  ;;  %v8506_v38 = vadd.f32 %v8212_v17, %v2418_v20  ;;  %v9683_v2 = vmax.f32 %v8475_v32, 0.0 }
 0x268   : > { %v8468_v29 = vpop.f32.mrf.mxu0  ;;  %2673 = vmatpush1.msra.mxu1 %v9674_v54  ;;  %v8482_v37 = vadd.f32 %v8205_v34, %v9960_v0  ;;  %9963 = vst [vmem:[#allocation83_spill] sm:$0xff] %v8491_v57  ;;  %v9964_v0 = vld [vmem:[#allocation122_spill] sm:$0xff]  ;;  %v9684_v54 = vmax.f32 %v8465_v8, 0.0  ;;  %v9687_v20 = vmax.f32 %v8491_v57, 0.0  ;;  %v9976_v60 = vld [vmem:[#allocation52_spill] sm:$0xff] }
 0x269   : > { %2674 = vmatprep.subr.mxu1 %v9673_v30  ;;  %v8498_v30 = vadd.f32 %v8205_v34, %v9964_v0  ;;  %9966 = vst [vmem:[#allocation81_spill] sm:$0xff] %v8506_v38  ;;  %v1198_v27 = vadd.f32 %v9976_v60, %v9975_v40  ;;  %v9988_v40 = vld [vmem:[#allocation39_spill] sm:$0xff]  ;;  %v9989_v60 = vld [vmem:[#allocation40_spill] sm:$0xff] }
 0x26a   : > { %9961 = vst [vmem:[#allocation86_spill] sm:$0xff] %v8482_v37  ;;  %v8485_v16 = vpop.f32.mrf.mxu0  ;;  %2675 = vmatpush1.msra.mxu1 %v9677_v9  ;;  %v9972_v8 = vmax.f32 %v8482_v37, 0.0  ;;  %v1162_v24 = vadd.f32 %v9989_v60, %v9988_v40  ;;  %v10000_v40 = vld [vmem:[#allocation97_spill] sm:$0xff] }
 0x26b   : > { %2676 = vmatprep.subr.mxu1 %v9676_v61  ;;  %9965 = vst [vmem:[#allocation82_spill] sm:$0xff] %v8498_v30  ;;  %v8513_v61 = vadd.f32 %v8205_v34, %v9967_v26  ;;  %v8528_v26 = vadd.f32 %v8205_v34, %v9970_v12  ;;  %v9688_v0 = vmax.f32 %v8498_v30, 0.0  ;;  %v9974_v30 = vld [vmem:[#allocation54_spill] sm:$0xff]  ;;  %v1627_v25 = vadd.f32 %v9984_v7, %v1198_v27  ;;  %v9996_v7 = vld [vmem:[#allocation111_spill] sm:$0xff] }
 0x26c   : > { %v8501_v1 = vpop.f32.mrf.mxu0  ;;  %2677 = vmatpush1.msra.mxu1 %v9678_v31  ;;  %v8521_v31 = vadd.f32 %v8212_v17, %v2416_v45  ;;  %v9691_v45 = vmax.f32 %v8506_v38, 0.0 }
 0x26d   : > { %2678 = vmatprep.subr.mxu1 %v9679_v39  ;;  %9968 = vst [vmem:[#allocation79_spill] sm:$0xff] %v8513_v61  ;;  %v1985_v39 = vpop.f32.mrf.mxu1  ;;  %9971 = vst [vmem:[#allocation77_spill] sm:$0xff] %v8528_v26  ;;  %v9707_v37 = vmax.f32 %v8528_v26, 0.0  ;;  %v9983_v26 = vld [vmem:[#allocation50_spill] sm:$0xff]  ;;  %v2047_v63 = vadd.f32 %v1981_v13, %v1627_v25  ;;  %v10007_v25 = vld [vmem:[#allocation105_spill] sm:$0xff] }
 0x26e   : > { %v8516_v9 = vpop.f32.mrf.mxu0  ;;  %2679 = vmatpush1.msra.mxu1 %v9684_v54  ;;  %9969 = vst [vmem:[#allocation78_spill] sm:$0xff] %v8521_v31  ;;  %v9703_v12 = vmax.f32 %v8521_v31, 0.0  ;;  %v9980_v31 = vld [vmem:[#allocation35_spill] sm:$0xff] }
 0x26f   : > { %2680 = vmatprep.subr.mxu1 %v9683_v2  ;;  %v9700_v2 = vmax.f32 %v8513_v61, 0.0  ;;  %v1987_v32 = vpop.f32.mrf.mxu1  ;;  %v9979_v61 = vld [vmem:[#allocation115_spill] sm:$0xff] }
 0x270   : > { %v8531_v53 = vpop.f32.mrf.mxu0  ;;  %2681 = vmatpush1.msra.mxu1 %v9972_v8 }
 0x271   : > { %2682 = vmatprep.subr.mxu1 %v9687_v20 }
 0x272   : > { %v2392_v54 = vpop.f32.mrf.mxu0  ;;  %2683 = vmatpush1.msra.mxu1 %v9688_v0  ;;  %v9973_v0 = vld [vmem:[#allocation53_spill] sm:$0xff] }
 0x273   : > { %2684 = vmatprep.subr.mxu1 %v9691_v45  ;;  %v1204_v38 = vadd.f32 %v9974_v30, %v9973_v0  ;;  %v1991_v45 = vpop.f32.mrf.mxu1  ;;  %v9985_v30 = vld [vmem:[#allocation117_spill] sm:$0xff] }
 0x274   : > { %v2394_v8 = vpop.f32.mrf.mxu0  ;;  %2685 = vmatpush1.msra.mxu1 %v9700_v2  ;;  %v1631_v0 = vadd.f32 %v9985_v30, %v1210_v59  ;;  %v9997_v30 = vld [vmem:[#allocation116_spill] sm:$0xff] }
 0x275   : > { %2686 = vmatprep.subr.mxu1 %v9703_v12  ;;  %v1629_v2 = vadd.f32 %v9979_v61, %v1204_v38  ;;  %v9981_v12 = vld [vmem:[#allocation36_spill] sm:$0xff]  ;;  %v1168_v61 = vadd.f32 %v9991_v28, %v9990_v18  ;;  %v9992_v38 = vld [vmem:[#allocation47_spill] sm:$0xff]  ;;  %v2050_v36 = vadd.f32 %v1991_v45, %v9997_v30  ;;  %v10001_v18 = vld [vmem:[#allocation109_spill] sm:$0xff] }
 0x276   : > { %v2398_v20 = vpop.f32.mrf.mxu0  ;;  %2687 = vmatpush1.msra.mxu1 %v9707_v37  ;;  %v1150_v3 = vadd.f32 %v9981_v12, %v9980_v31  ;;  %v1192_v37 = vadd.f32 %v9983_v26, %v9982_v47  ;;  %v1186_v56 = vadd.f32 %v9993_v5, %v9992_v38  ;;  %v1993_v31 = vpop.f32.mrf.mxu1  ;;  %v9995_v47 = vld [vmem:[#allocation44_spill] sm:$0xff]  ;;  %v2048_v5 = vadd.f32 %v1985_v39, %v10002_v4 }
 0x277   : > { %v1174_v26 = vadd.f32 %v9995_v47, %v9994_v42  ;;  %v2049_v59 = vadd.f32 %v1987_v32, %v1629_v2  ;;  %v2051_v33 = vadd.f32 %v1993_v31, %v1631_v0  ;;  %v10003_v47 = vld [vmem:[#allocation99_spill] sm:$0xff]  ;;  %v10004_v32 = vld [vmem:[#allocation101_spill] sm:$0xff]  ;;  %v10005_v45 = vld [vmem:[#allocation112_spill] sm:$0xff] }
 0x278   : > { %v2400_v57 = vpop.f32.mrf.mxu0  ;;  %v1625_v27 = vadd.f32 %v9996_v7, %v1192_v37  ;;  %v8579_v60 = vadd.f32 %v10000_v40, %v1150_v3  ;;  %v1623_v28 = vadd.f32 %v10001_v18, %v1186_v56  ;;  %v8584_v37 = vadd.f32 %v10003_v47, %v1156_v62  ;;  %v10008_v0 = vld [vmem:[#allocation110_spill] sm:$0xff] }
 0x279   : > { %v1615_v2 = vadd.f32 %v10004_v32, %v1162_v24  ;;  %v2046_v7 = vadd.f32 %v8461_v48, %v10005_v45  ;;  %v2466_v4 = vadd.f32 %v2400_v57, %v2047_v63  ;;  %v1619_v13 = vadd.f32 %v10007_v25, %v1174_v26  ;;  %v3211_v63 = vld [vmem:[#allocation8 + $0x108] sm:$0xff]  ;;  %v10012_v40 = vld [vmem:[#allocation106_spill] sm:$0xff] }
 0x27a   : > { %v2404_v51 = vpop.f32.mrf.mxu0  ;;  %v2045_v56 = vadd.f32 %v8426_v50, %v1625_v27  ;;  %v2043_v24 = vadd.f32 %v8342_v14, %v1623_v28  ;;  %v10009_v50 = vld [vmem:[#allocation103_spill] sm:$0xff]  ;;  %3215 = vmatpush1.msra.mxu0 %v3211_v63  ;;  %v2041_v14 = vadd.f32 %v8269_v11, %v1621_v58 }
 0x27b   : > { %v2467_v30 = vadd.f32 %v2404_v51, %v2048_v5  ;;  %v2465_v62 = vadd.f32 %v2398_v20, %v2046_v7  ;;  %v1617_v57 = vadd.f32 %v10009_v50, %v1168_v61  ;;  %v3209_v61 = vld [vmem:[#allocation8 + $0xf8] sm:$0xff] }
 0x27c   : > { %v2406_v12 = vpop.f32.mrf.mxu0  ;;  %v2464_v48 = vadd.f32 %v2394_v8, %v2045_v56  ;;  %v8613_v8 = vadd.f32 %v8212_v17, %v2466_v4  ;;  %v2460_v28 = vadd.f32 %v8501_v1, %v2041_v14  ;;  %v10015_v1 = vld [vmem:[#allocation140_spill] sm:$0xff] }
 0x27d   : > { %v2468_v6 = vadd.f32 %v2406_v12, %v2049_v59  ;;  %v10010_v12 = vld [vmem:[#allocation108_spill] sm:$0xff]  ;;  %v8608_v26 = vadd.f32 %v8205_v34, %v2467_v30  ;;  %v10011_v59 = vmov 0.0   ;;  %v8621_v18 = vadd.f32 %v8205_v34, %v2465_v62  ;;  %v10020_v62 = vld [vmem:[#allocation137_spill] sm:$0xff] }
 0x27e   : > { %v2410_v38 = vpop.f32.mrf.mxu0  ;;  %3216 = vmatprep.subr.mxu0 %v10011_v59  ;;  %v8627_v5 = vadd.f32 %v8212_v17, %v2464_v48  ;;  %v2037_v45 = vadd.f32 %v10015_v1, %v1617_v57  ;;  %v10027_v1 = vld [vmem:[#allocation25_spill] sm:$0xff] }
 0x27f   : > { %v2469_v42 = vadd.f32 %v2410_v38, %v2050_v36  ;;  %v2044_v36 = vadd.f32 %v8384_v41, %v10008_v0  ;;  %v8599_v51 = vadd.f32 %v8212_v17, %v2468_v6  ;;  %v2042_v41 = vadd.f32 %v8301_v19, %v10010_v12 }
 0x280   : > { %v2412_v3 = vpop.f32.mrf.mxu0  ;;  %v2462_v6 = vadd.f32 %v8531_v53, %v2043_v24  ;;  %v2040_v19 = vadd.f32 %v8246_v43, %v10012_v40  ;;  %v2039_v53 = vadd.f32 %v8226_v52, %v1619_v13  ;;  %v10013_v43 = vld [vmem:[#allocation104_spill] sm:$0xff]  ;;  %v2591_v52 = vmax.f32 %v8608_v26, 0.0  ;;  %v2795_v26 = vld [vmem:[#allocation7 + $0xc8] sm:$0xff] }
 0x281   : > { %v2470_v39 = vadd.f32 %v2412_v3, %v2051_v33  ;;  %v8595_v31 = vadd.f32 %v8205_v34, %v2469_v42  ;;  %v3210_v33 = vld [vmem:[#allocation8 + $0x100] sm:$0xff]  ;;  %v2463_v20 = vadd.f32 %v2392_v54, %v2044_v36  ;;  %v2461_v54 = vadd.f32 %v8516_v9, %v2042_v41  ;;  %v10014_v9 = vld [vmem:[#allocation20_spill] sm:$0xff]  ;;  %v10023_v41 = vld [vmem:[#allocation135_spill] sm:$0xff] }
 0x282   : > { %3217 = vmatpush1.msra.mxu0 %v3210_v33  ;;  %v2592_v38 = vmax.f32 %v8599_v51, 0.0  ;;  %v2038_v42 = vadd.f32 %v10014_v9, %v10013_v43  ;;  %v2459_v47 = vadd.f32 %v8485_v16, %v2040_v19  ;;  %v2458_v7 = vadd.f32 %v8468_v29, %v2039_v53  ;;  %v10016_v16 = vld [vmem:[#allocation102_spill] sm:$0xff]  ;;  %v10026_v53 = vld [vmem:[#allocation129_spill] sm:$0xff]  ;;  %v2617_v51 = vld [vmem:[#allocation7 + $0xb0] sm:$0xff] }
 0x283   : > { %v8602_v49 = vadd.f32 %v8212_v17, %v2470_v39  ;;  %v2593_v11 = vmax.f32 %v8595_v31, 0.0  ;;  %3218 = vmatprep.subr.mxu0 %v10011_v59  ;;  %v8637_v32 = vadd.f32 %v8205_v34, %v2463_v20  ;;  %v8645_v30 = vadd.f32 %v8212_v17, %v2462_v6  ;;  %v10018_v39 = vld [vmem:[#allocation138_spill] sm:$0xff] }
 0x284   : > { %3219 = vmatpush1.msra.mxu0 %v3209_v61  ;;  %v2590_v3 = vmax.f32 %v8613_v8, 0.0  ;;  %v2036_v58 = vadd.f32 %v10017_v23, %v10016_v16  ;;  %v2457_v56 = vadd.f32 %v8449_v46, %v2038_v42  ;;  %v8655_v4 = vadd.f32 %v8205_v34, %v2461_v54  ;;  %v10019_v46 = vld [vmem:[#allocation100_spill] sm:$0xff]  ;;  %v2615_v31 = vld [vmem:[#allocation7 + $0xa0] sm:$0xff] }
 0x285   : > { %v2594_v27 = vmax.f32 %v8602_v49, 0.0  ;;  %3220 = vmatprep.subr.mxu0 %v10011_v59  ;;  %v2589_v29 = vmax.f32 %v8621_v18, 0.0  ;;  %v2035_v25 = vadd.f32 %v10018_v39, %v1615_v2  ;;  %v2456_v13 = vadd.f32 %v8432_v44, %v2037_v45  ;;  %v10021_v44 = vld [vmem:[#allocation136_spill] sm:$0xff]  ;;  %v2618_v49 = vld [vmem:[#allocation7 + $0xb8] sm:$0xff]  ;;  %v2794_v8 = vld [vmem:[#allocation7 + $0xc0] sm:$0xff] }
 0x286   : > { %v8663_v0 = vadd.f32 %v8212_v17, %v2460_v28  ;;  %v2588_v36 = vmax.f32 %v8627_v5, 0.0  ;;  %v2034_v24 = vadd.f32 %v10020_v62, %v10019_v46  ;;  %v2455_v48 = vadd.f32 %v8411_v15, %v2036_v58  ;;  %v10022_v15 = vld [vmem:[#allocation98_spill] sm:$0xff]  ;;  %v10028_v46 = vld [vmem:[#allocation31_spill] sm:$0xff]  ;;  %v2796_v18 = vld [vmem:[#allocation7 + $0xd0] sm:$0xff] }
 0x287   : > { %2696 = vmatprep.subr.mxu1 %v2594_v27  ;;  %v8672_v63 = vadd.f32 %v8205_v34, %v2459_v47  ;;  %v2587_v2 = vmax.f32 %v8637_v32, 0.0  ;;  %v2033_v33 = vadd.f32 %v10021_v44, %v8584_v37  ;;  %v2454_v50 = vadd.f32 %v8391_v10, %v2035_v25  ;;  %v10024_v10 = vld [vmem:[#allocation132_spill] sm:$0xff]  ;;  %v2798_v5 = vld [vmem:[#allocation7 + $0xe0] sm:$0xff] }
 0x288   : > { %2697 = vmatpush2.msra.mxu1 %v2593_v11  ;;  %v8681_v57 = vadd.f32 %v8212_v17, %v2458_v7  ;;  %v2586_v12 = vmax.f32 %v8645_v30, 0.0  ;;  %v2032_v20 = vadd.f32 %v10023_v41, %v10022_v15  ;;  %v2453_v14 = vadd.f32 %v8369_v35, %v2034_v24  ;;  %v10025_v35 = vld [vmem:[#allocation96_spill] sm:$0xff]  ;;  %v2595_v41 = vld [vmem:[#allocation7] sm:$0xff]  ;;  %v2803_v30 = vld [vmem:[#allocation7 + $0x108] sm:$0xff] }
 0x289   : > { %2698 = vmatprep.subr.mxu1 %v2592_v38  ;;  %v8690_v6 = vadd.f32 %v8205_v34, %v2457_v56  ;;  %v2585_v37 = vmax.f32 %v8655_v4, 0.0  ;;  %v2031_v61 = vadd.f32 %v10024_v10, %v8579_v60  ;;  %v2452_v40 = vadd.f32 %v8349_v21, %v2033_v33  ;;  %v3208_v32 = vld [vmem:[#allocation8 + $0xf0] sm:$0xff]  ;;  %v2805_v4 = vld [vmem:[#allocation7 + $0x118] sm:$0xff] }
 0x28a   : > { %2699 = vmatpush2.msra.mxu1 %v2591_v52  ;;  %v8699_v19 = vadd.f32 %v8212_v17, %v2456_v13  ;;  %v2584_v54 = vmax.f32 %v8663_v0, 0.0  ;;  %v2030_v28 = vadd.f32 %v10026_v53, %v10025_v35  ;;  %v2451_v43 = vadd.f32 %v8327_v55, %v2032_v20  ;;  %v2598_v20 = vld [vmem:[#allocation7 + $0x18] sm:$0xff]  ;;  %v2597_v35 = vld [vmem:[#allocation7 + $0x10] sm:$0xff]  ;;  %v10034_v53 = vld [vmem:[#allocation22_spill] sm:$0xff]  ;;  %3221 = vmatpush1.msra.mxu0 %v3208_v32 }
 0x28b   : > { %2700 = vmatprep.subr.mxu1 %v2590_v3  ;;  %v8708_v9 = vadd.f32 %v8205_v34, %v2455_v48  ;;  %v2583_v60 = vmax.f32 %v8672_v63, 0.0  ;;  %v2450_v21 = vadd.f32 %v8308_v22, %v2031_v61  ;;  %v8715_v42 = vadd.f32 %v8212_v17, %v2454_v50  ;;  %v10029_v48 = vld [vmem:[#allocation24_spill] sm:$0xff]  ;;  %v10032_v61 = vld [vmem:[#allocation21_spill] sm:$0xff]  ;;  %3222 = vmatprep.subr.mxu0 %v10011_v59  ;;  %v2806_v63 = vld [vmem:[#allocation7 + $0x120] sm:$0xff] }
 0x28c   : > { %2701 = vmatpush2.msra.mxu1 %v2589_v29  ;;  %v2582_v47 = vmax.f32 %v8681_v57, 0.0  ;;  %v2449_v55 = vadd.f32 %v10027_v1, %v2030_v28  ;;  %v8722_v45 = vadd.f32 %v8205_v34, %v2453_v14  ;;  %v2581_v7 = vmax.f32 %v8690_v6, 0.0  ;;  %v10030_v14 = vld [vmem:[#allocation23_spill] sm:$0xff]  ;;  %v2804_v0 = vld [vmem:[#allocation7 + $0x110] sm:$0xff]  ;;  %v3206_v57 = vld [vmem:[#allocation8 + $0xe0] sm:$0xff] }
 0x28d   : > { %2702 = vmatprep.subr.mxu1 %v2588_v36  ;;  %v8728_v22 = vadd.f32 %v8212_v17, %v2452_v40  ;;  %v2580_v16 = vmax.f32 %v8699_v19, 0.0  ;;  %v8734_v23 = vadd.f32 %v8205_v34, %v2451_v43  ;;  %v2579_v58 = vmax.f32 %v8708_v9, 0.0  ;;  %v2600_v43 = vld [vmem:[#allocation7 + $0x28] sm:$0xff]  ;;  %v3205_v19 = vld [vmem:[#allocation8 + $0xd8] sm:$0xff]  ;;  %v2810_v9 = vld [vmem:[#allocation7 + $0x140] sm:$0xff] }
 0x28e   : > { %2703 = vmatpush2.msra.mxu1 %v2587_v2  ;;  %v8740_v56 = vadd.f32 %v8212_v17, %v2450_v21  ;;  %v2578_v39 = vmax.f32 %v8715_v42, 0.0  ;;  %v8746_v25 = vadd.f32 %v8205_v34, %v2449_v55  ;;  %v2577_v13 = vmax.f32 %v8722_v45, 0.0  ;;  %v10036_v21 = vld [vmem:[#allocation29_spill] sm:$0xff]  ;;  %v10038_v55 = vld [vmem:[#allocation30_spill] sm:$0xff]  ;;  %v2811_v6 = vld [vmem:[#allocation7 + $0x148] sm:$0xff] }
 0x28f   : > { %2704 = vmatprep.subr.mxu1 %v2586_v12  ;;  %v8753_v62 = vadd.f32 %v8212_v17, %v10028_v46  ;;  %v2576_v24 = vmax.f32 %v8728_v22, 0.0  ;;  %v8760_v44 = vadd.f32 %v8205_v34, %v10029_v48  ;;  %v2575_v33 = vmax.f32 %v8734_v23, 0.0  ;;  %v10040_v48 = vld [vmem:[#allocation32_spill] sm:$0xff]  ;;  %v3028_v42 = vld [vmem:[#allocation8 + $0x68] sm:$0xff] }
 0x290   : > { %2705 = vmatpush2.msra.mxu1 %v2585_v37  ;;  %v2574_v50 = vmax.f32 %v8740_v56, 0.0  ;;  %v2573_v17 = vmax.f32 %v8746_v25, 0.0  ;;  %v10031_v10 = vmax.f32 %v10030_v14, 0.0  ;;  %v10033_v40 = vmax.f32 %v10032_v61, 0.0  ;;  %v2602_v61 = vld [vmem:[#allocation7 + $0x38] sm:$0xff]  ;;  %v2812_v45 = vld [vmem:[#allocation7 + $0x150] sm:$0xff] }
 0x291   : > { %2706 = vmatprep.subr.mxu1 %v2584_v54  ;;  %v2572_v15 = vmax.f32 %v8753_v62, 0.0  ;;  %v2571_v34 = vmax.f32 %v8760_v44, 0.0  ;;  %v10035_v28 = vmax.f32 %v10034_v53, 0.0  ;;  %v10037_v1 = vmax.f32 %v10036_v21, 0.0  ;;  %v3204_v22 = vld [vmem:[#allocation8 + $0xd0] sm:$0xff]  ;;  %v2817_v56 = vld [vmem:[#allocation7 + $0x178] sm:$0xff] }
 0x292   : > { %2707 = vmatpush2.msra.mxu1 %v2583_v60  ;;  %v10039_v46 = vmax.f32 %v10038_v55, 0.0  ;;  %v10041_v14 = vmax.f32 %v10040_v48, 0.0  ;;  %v2604_v48 = vld [vmem:[#allocation7 + $0x48] sm:$0xff]  ;;  %v3025_v23 = vld [vmem:[#allocation8 + $0x50] sm:$0xff] }
 0x293   : > { %2708 = vmatprep.subr.mxu1 %v2582_v47  ;;  %v3203_v25 = vld [vmem:[#allocation8 + $0xc8] sm:$0xff]  ;;  %v2816_v62 = vld [vmem:[#allocation7 + $0x170] sm:$0xff] }
 0x294   : > { %2709 = vmatpush2.msra.mxu1 %v2581_v7  ;;  %v3021_v44 = vld [vmem:[#allocation8 + $0x30] sm:$0xff] }
 0x295   : > { %2710 = vmatprep.subr.mxu1 %v2580_v16 }
 0x296   : > { %2711 = vmatpush2.msra.mxu1 %v2579_v58 }
 0x297   : > { %2712 = vmatprep.subr.mxu1 %v2578_v39 }
 0x298   : > { %2713 = vmatpush2.msra.mxu1 %v2577_v13 }
 0x299   : > { %2714 = vmatprep.subr.mxu1 %v2576_v24 }
 0x29a   : > { %2715 = vmatpush2.msra.mxu1 %v2575_v33 }
 0x29b   : > { %2716 = vmatprep.subr.mxu1 %v2574_v50 }
 0x29c   : > { %2717 = vmatpush2.msra.mxu1 %v2573_v17 }
 0x29d   : > { %2718 = vmatprep.subr.mxu1 %v2572_v15 }
 0x29e   : > { %2719 = vmatpush2.msra.mxu1 %v2571_v34 }
 0x29f   : > { %2854 = vmatprep.subr.mxu1 %v10031_v10  ;;  %2721 = vmatmul.mubr.f32.vlgmr.msra.gmra.mxu1 %v2595_v41  ;;  %v2599_v41 = vld [vmem:[#allocation7 + $0x20] sm:$0xff] }
 0x2a0   : > { %2855 = vmatpush1.msra.mxu1 %v10033_v40  ;;  %5734 = vmatprep.mubr.msk.f32.mxu1 %vm2619_vm5, %v2598_v20  ;;  %v10042_v10 = vld [vmem:[#allocation26_spill] sm:$0xff]  ;;  %v10044_v40 = vld [vmem:[#allocation27_spill] sm:$0xff] }
 0x2a1   : > { %2856 = vmatprep.subr.mxu1 %v10035_v28  ;;  %v10043_v20 = vmax.f32 %v10042_v10, 0.0  ;;  %v10045_v53 = vmax.f32 %v10044_v40, 0.0  ;;  %v10046_v28 = vld [vmem:[#allocation28_spill] sm:$0xff] }
 0x2a2   : > { %2857 = vmatpush1.msra.mxu1 %v10037_v1  ;;  %v10047_v21 = vmax.f32 %v10046_v28, 0.0  ;;  %v10048_v1 = vld [vmem:[#allocation33_spill] sm:$0xff] }
 0x2a3   : > { %2858 = vmatprep.subr.mxu1 %v10039_v46  ;;  %2727 = vmatmul.mubr.f32.gmra.mxu1 %v2597_v35  ;;  %v10049_v55 = vmax.f32 %v10048_v1, 0.0  ;;  %v2601_v35 = vld [vmem:[#allocation7 + $0x30] sm:$0xff]  ;;  %v10050_v46 = vld [vmem:[#allocation34_spill] sm:$0xff]  ;;  %v2606_v1 = vld [vmem:[#allocation7 + $0x58] sm:$0xff] }
 0x2a4   : > { %2859 = vmatpush1.msra.mxu1 %v10041_v14  ;;  %5735 = vmatprep.mubr.msk.f32.mxu1 %vm2619_vm5, %v2600_v43  ;;  %v10051_v43 = vmax.f32 %v10050_v46, 0.0  ;;  %v10052_v14 = vld [vmem:[#allocation61_spill] sm:$0xff] }
 0x2a5   : > { %2860 = vmatprep.subr.mxu1 %v10043_v20  ;;  %v10053_v10 = vmax.f32 %v10052_v14, 0.0  ;;  %v10054_v20 = vld [vmem:[#allocation63_spill] sm:$0xff] }
 0x2a6   : > { %2861 = vmatpush1.msra.mxu1 %v10045_v53  ;;  %v10055_v40 = vmax.f32 %v10054_v20, 0.0  ;;  %v10056_v53 = vld [vmem:[#allocation94_spill] sm:$0xff] }
 0x2a7   : > { %2862 = vmatprep.subr.mxu1 %v10047_v21  ;;  %2733 = vmatmul.mubr.f32.gmra.mxu1 %v2599_v41  ;;  %v10057_v28 = vmax.f32 %v10056_v53, 0.0  ;;  %v2603_v41 = vld [vmem:[#allocation7 + $0x40] sm:$0xff]  ;;  %v10058_v21 = vld [vmem:[#allocation95_spill] sm:$0xff] }
 0x2a8   : > { %2863 = vmatpush1.msra.mxu1 %v10049_v55  ;;  %5736 = vmatprep.mubr.msk.f32.mxu1 %vm2619_vm5, %v2602_v61  ;;  %v10059_v61 = vmax.f32 %v10058_v21, 0.0  ;;  %v10060_v55 = vld [vmem:[#allocation80_spill] sm:$0xff]  ;;  %v2608_v53 = vld [vmem:[#allocation7 + $0x68] sm:$0xff] }
 0x2a9   : > { %2864 = vmatprep.subr.mxu1 %v10051_v43  ;;  %v10061_v46 = vmax.f32 %v10060_v55, 0.0  ;;  %v10062_v43 = vld [vmem:[#allocation84_spill] sm:$0xff] }
 0x2aa   : > { %2865 = vmatpush1.msra.mxu1 %v10053_v10  ;;  %v10063_v14 = vmax.f32 %v10062_v43, 0.0  ;;  %v10064_v10 = vld [vmem:[#allocation93_spill] sm:$0xff] }
 0x2ab   : > { %2866 = vmatprep.subr.mxu1 %v10055_v40  ;;  %2739 = vmatmul.mubr.f32.gmra.mxu1 %v2601_v35  ;;  %v10065_v20 = vmax.f32 %v10064_v10, 0.0  ;;  %v2605_v35 = vld [vmem:[#allocation7 + $0x50] sm:$0xff]  ;;  %v2610_v10 = vld [vmem:[#allocation7 + $0x78] sm:$0xff] }
 0x2ac   : > { %2867 = vmatpush1.msra.mxu1 %v10057_v28  ;;  %5737 = vmatprep.mubr.msk.f32.mxu1 %vm2619_vm5, %v2604_v48  ;;  %v10066_v40 = vld [vmem:[#allocation92_spill] sm:$0xff] }
 0x2ad   : > { %2868 = vmatprep.subr.mxu1 %v10059_v61  ;;  %v10067_v48 = vmax.f32 %v10066_v40, 0.0  ;;  %v10068_v28 = vld [vmem:[#allocation88_spill] sm:$0xff]  ;;  %v10070_v61 = vld [vmem:[#allocation91_spill] sm:$0xff] }
 0x2ae   : > { %2869 = vmatpush1.msra.mxu1 %v10061_v46  ;;  %v10069_v21 = vmax.f32 %v10068_v28, 0.0  ;;  %v10071_v55 = vmax.f32 %v10070_v61, 0.0  ;;  %v10072_v46 = vld [vmem:[#allocation90_spill] sm:$0xff] }
 0x2af   : > { %2870 = vmatprep.subr.mxu1 %v10063_v14  ;;  %2745 = vmatmul.mubr.f32.gmra.mxu1 %v2603_v41  ;;  %v10073_v43 = vmax.f32 %v10072_v46, 0.0  ;;  %v2607_v41 = vld [vmem:[#allocation7 + $0x60] sm:$0xff]  ;;  %v10074_v14 = vld [vmem:[#allocation89_spill] sm:$0xff]  ;;  %v2612_v46 = vld [vmem:[#allocation7 + $0x88] sm:$0xff] }
 0x2b0   : > { %2871 = vmatpush1.msra.mxu1 %v10065_v20  ;;  %5738 = vmatprep.mubr.msk.f32.mxu1 %vm2619_vm5, %v2606_v1  ;;  %v10075_v1 = vmax.f32 %v10074_v14, 0.0  ;;  %v10076_v20 = vld [vmem:[#allocation85_spill] sm:$0xff] }
 0x2b1   : > { %2872 = vmatprep.subr.mxu1 %v10067_v48  ;;  %v10077_v40 = vmax.f32 %v10076_v20, 0.0  ;;  %v10078_v48 = vld [vmem:[#allocation87_spill] sm:$0xff] }
 0x2b2   : > { %2873 = vmatpush1.msra.mxu1 %v10069_v21  ;;  %v10079_v28 = vmax.f32 %v10078_v48, 0.0  ;;  %v10080_v21 = vld [vmem:[#allocation86_spill] sm:$0xff] }
 0x2b3   : > { %2874 = vmatprep.subr.mxu1 %v10071_v55  ;;  %2751 = vmatmul.mubr.f32.gmra.mxu1 %v2605_v35  ;;  %v10081_v61 = vmax.f32 %v10080_v21, 0.0  ;;  %v2609_v35 = vld [vmem:[#allocation7 + $0x70] sm:$0xff]  ;;  %v10082_v55 = vld [vmem:[#allocation83_spill] sm:$0xff]  ;;  %v2614_v21 = vld [vmem:[#allocation7 + $0x98] sm:$0xff] }
 0x2b4   : > { %2875 = vmatpush1.msra.mxu1 %v10073_v43  ;;  %5739 = vmatprep.mubr.msk.f32.mxu1 %vm2619_vm5, %v2608_v53  ;;  %v10083_v53 = vmax.f32 %v10082_v55, 0.0  ;;  %v10084_v43 = vld [vmem:[#allocation82_spill] sm:$0xff] }
 0x2b5   : > { %2876 = vmatprep.subr.mxu1 %v10075_v1  ;;  %v10085_v14 = vmax.f32 %v10084_v43, 0.0  ;;  %v10086_v1 = vld [vmem:[#allocation81_spill] sm:$0xff]  ;;  %v3199_v43 = vld [vmem:[#allocation8 + $0xa8] sm:$0xff] }
 0x2b6   : > { %2877 = vmatpush1.msra.mxu1 %v10077_v40  ;;  %v10087_v20 = vmax.f32 %v10086_v1, 0.0  ;;  %v10088_v40 = vld [vmem:[#allocation79_spill] sm:$0xff]  ;;  %v3198_v1 = vld [vmem:[#allocation8 + $0xa0] sm:$0xff] }
 0x2b7   : > { %2878 = vmatprep.subr.mxu1 %v10079_v28  ;;  %2757 = vmatmul.mubr.f32.gmra.mxu1 %v2607_v41  ;;  %v10089_v48 = vmax.f32 %v10088_v40, 0.0  ;;  %v2611_v41 = vld [vmem:[#allocation7 + $0x80] sm:$0xff]  ;;  %v3197_v40 = vld [vmem:[#allocation8 + $0x98] sm:$0xff] }
 0x2b8   : > { %2879 = vmatpush1.msra.mxu1 %v10081_v61  ;;  %5740 = vmatprep.mubr.msk.f32.mxu1 %vm2619_vm5, %v2610_v10  ;;  %v10090_v28 = vld [vmem:[#allocation78_spill] sm:$0xff]  ;;  %v10092_v61 = vld [vmem:[#allocation77_spill] sm:$0xff] }
 0x2b9   : > { %2880 = vmatprep.subr.mxu1 %v10083_v53  ;;  %v10091_v10 = vmax.f32 %v10090_v28, 0.0  ;;  %v10093_v55 = vmax.f32 %v10092_v61, 0.0  ;;  %v2616_v53 = vld [vmem:[#allocation7 + $0xa8] sm:$0xff]  ;;  %v3212_v61 = vld [vmem:[#allocation8 + $0x110] sm:$0xff] }
 0x2ba   : > { %2881 = vmatpush1.msra.mxu1 %v10085_v14  ;;  %v3017_v14 = vld [vmem:[#allocation8 + $0x10] sm:$0xff]  ;;  %v3032_v28 = vld [vmem:[#allocation8 + $0x88] sm:$0xff] }
 0x2bb   : > { %2882 = vmatprep.subr.mxu1 %v10087_v20  ;;  %2763 = vmatmul.mubr.f32.gmra.mxu1 %v2609_v35  ;;  %v2613_v35 = vld [vmem:[#allocation7 + $0x90] sm:$0xff]  ;;  %v3016_v20 = vld [vmem:[#allocation8 + $0x8] sm:$0xff] }
 0x2bc   : > { %2883 = vmatpush1.msra.mxu1 %v10089_v48  ;;  %5741 = vmatprep.mubr.msk.f32.mxu1 %vm2619_vm5, %v2612_v46  ;;  %v3018_v46 = vld [vmem:[#allocation8 + $0x18] sm:$0xff]  ;;  %v3015_v48 = vld [vmem:[#allocation8] sm:$0xff] }
 0x2bd   : > { %2884 = vmatprep.subr.mxu1 %v10091_v10  ;;  %v3213_v10 = vld [vmem:[#allocation8 + $0x118] sm:$0xff] }
 0x2be   : > { %2885 = vmatpush1.msra.mxu1 %v10093_v55  ;;  %v3359_v55 = vld [vmem:[#allocation5 + $0x40] sm:$0xff] }
 0x2bf   : > { %2894 = vmatprep.subr.mxu1 %v2594_v27  ;;  %2769 = vmatmul.mubr.f32.gmra.mxu1 %v2611_v41  ;;  %v2797_v27 = vld [vmem:[#allocation7 + $0xd8] sm:$0xff]  ;;  %v3196_v41 = vld [vmem:[#allocation8 + $0x90] sm:$0xff] }
 0x2c0   : > { %2895 = vmatpush2.msra.mxu1 %v2593_v11  ;;  %5742 = vmatprep.mubr.msk.f32.mxu1 %vm2619_vm5, %v2614_v21  ;;  %v2799_v11 = vld [vmem:[#allocation7 + $0xe8] sm:$0xff]  ;;  %v3031_v21 = vld [vmem:[#allocation8 + $0x80] sm:$0xff] }
 0x2c1   : > { %2896 = vmatprep.subr.mxu1 %v2592_v38  ;;  %v2801_v38 = vld [vmem:[#allocation7 + $0xf8] sm:$0xff] }
 0x2c2   : > { %2897 = vmatpush2.msra.mxu1 %v2591_v52  ;;  %v2800_v52 = vld [vmem:[#allocation7 + $0xf0] sm:$0xff] }
 0x2c3   : > { %2898 = vmatprep.subr.mxu1 %v2590_v3  ;;  %2775 = vmatmul.mubr.f32.gmra.mxu1 %v2613_v35  ;;  %v2802_v3 = vld [vmem:[#allocation7 + $0x100] sm:$0xff] }
 0x2c4   : > { %2899 = vmatpush2.msra.mxu1 %v2589_v29  ;;  %5743 = vmatprep.mubr.msk.f32.mxu1 %vm2619_vm5, %v2616_v53  ;;  %v3207_v29 = vld [vmem:[#allocation8 + $0xe8] sm:$0xff]  ;;  %v3407_v35 = vld [vmem:[#allocation5 + $0x88] sm:$0xff] }
 0x2c5   : > { %2900 = vmatprep.subr.mxu1 %v2588_v36  ;;  %3223 = vmatpush1.msra.mxu0 %v3207_v29  ;;  %v2807_v36 = vld [vmem:[#allocation7 + $0x128] sm:$0xff] }
 0x2c6   : > { %2901 = vmatpush2.msra.mxu1 %v2587_v2  ;;  %3224 = vmatprep.subr.mxu0 %v10011_v59  ;;  %v2809_v2 = vld [vmem:[#allocation7 + $0x138] sm:$0xff] }
 0x2c7   : > { %2902 = vmatprep.subr.mxu1 %v2586_v12  ;;  %2781 = vmatmul.mubr.f32.gmra.mxu1 %v2615_v31  ;;  %v2808_v12 = vld [vmem:[#allocation7 + $0x130] sm:$0xff] }
 0x2c8   : > { %2903 = vmatpush2.msra.mxu1 %v2585_v37  ;;  %5744 = vmatprep.mubr.msk.f32.mxu1 %vm2619_vm5, %v2618_v49  ;;  %v3030_v37 = vld [vmem:[#allocation8 + $0x78] sm:$0xff] }
 0x2c9   : > { %2904 = vmatprep.subr.mxu1 %v2584_v54  ;;  %3225 = vmatpush1.msra.mxu0 %v3206_v57  ;;  %v3029_v54 = vld [vmem:[#allocation8 + $0x70] sm:$0xff] }
 0x2ca   : > { %2905 = vmatpush2.msra.mxu1 %v2583_v60  ;;  %3226 = vmatprep.subr.mxu0 %v10011_v59  ;;  %v2813_v60 = vld [vmem:[#allocation7 + $0x158] sm:$0xff] }
 0x2cb   : > { %2906 = vmatprep.subr.mxu1 %v2582_v47  ;;  %2787 = vmatmul.mubr.f32.gmra.mxu1 %v2617_v51  ;;  %v3027_v47 = vld [vmem:[#allocation8 + $0x60] sm:$0xff] }
 0x2cc   : > { %2907 = vmatpush2.msra.mxu1 %v2581_v7  ;;  %5745 = vmatprep.mubr.msk.f32.mxu1 %vm2619_vm5, %v2795_v26  ;;  %v2815_v7 = vld [vmem:[#allocation7 + $0x168] sm:$0xff] }
 0x2cd   : > { %2908 = vmatprep.subr.mxu1 %v2580_v16  ;;  %3227 = vmatpush1.msra.mxu0 %v3205_v19  ;;  %v3026_v16 = vld [vmem:[#allocation8 + $0x58] sm:$0xff] }
 0x2ce   : > { %2909 = vmatpush2.msra.mxu1 %v2579_v58  ;;  %3228 = vmatprep.subr.mxu0 %v10011_v59  ;;  %v2814_v58 = vld [vmem:[#allocation7 + $0x160] sm:$0xff] }
 0x2cf   : > { %2910 = vmatprep.subr.mxu1 %v2578_v39  ;;  %3229 = vmatpush1.msra.mxu0 %v3204_v22  ;;  %v3024_v39 = vld [vmem:[#allocation8 + $0x48] sm:$0xff] }
 0x2d0   : > { %2911 = vmatpush2.msra.mxu1 %v2577_v13  ;;  %3230 = vmatprep.subr.mxu0 %v10011_v59  ;;  %v3023_v13 = vld [vmem:[#allocation8 + $0x40] sm:$0xff] }
 0x2d1   : > { %2912 = vmatprep.subr.mxu1 %v2576_v24  ;;  %3231 = vmatpush1.msra.mxu0 %v3203_v25  ;;  %v3022_v24 = vld [vmem:[#allocation8 + $0x38] sm:$0xff] }
 0x2d2   : > { %2913 = vmatpush2.msra.mxu1 %v2575_v33  ;;  %3232 = vmatprep.subr.mxu0 %v10011_v59  ;;  %v3202_v33 = vld [vmem:[#allocation8 + $0xc0] sm:$0xff] }
 0x2d3   : > { %2914 = vmatprep.subr.mxu1 %v2574_v50  ;;  %3233 = vmatpush1.msra.mxu0 %v3202_v33  ;;  %v3020_v50 = vld [vmem:[#allocation8 + $0x28] sm:$0xff] }
 0x2d4   : > { %2915 = vmatpush2.msra.mxu1 %v2573_v17  ;;  %3234 = vmatprep.subr.mxu0 %v10011_v59  ;;  %v3201_v17 = vld [vmem:[#allocation8 + $0xb8] sm:$0xff] }
 0x2d5   : > { %2916 = vmatprep.subr.mxu1 %v2572_v15  ;;  %3235 = vmatpush1.msra.mxu0 %v3201_v17  ;;  %v3019_v15 = vld [vmem:[#allocation8 + $0x20] sm:$0xff] }
 0x2d6   : > { %2917 = vmatpush2.msra.mxu1 %v2571_v34  ;;  %3236 = vmatprep.subr.mxu0 %v10011_v59  ;;  %v3200_v34 = vld [vmem:[#allocation8 + $0xb0] sm:$0xff] }
 0x2d7   : > { %2919 = vmatmul.mubr.f32.vlgmr.msra.gmra.mxu1 %v2794_v8  ;;  %3070 = vmatprep.subr.mxu1 %v10011_v59 }
 0x2d8   : > { %5746 = vmatprep.mubr.msk.f32.mxu1 %vm2619_vm5, %v2797_v27  ;;  %3071 = vmatpush1.msra.mxu1 %v3030_v37 }
 0x2d9   : > { %3072 = vmatprep.subr.mxu1 %v10011_v59  ;;  %3237 = vmatpush1.msra.mxu0 %v3200_v34 }
 0x2da   : > { %3073 = vmatpush1.msra.mxu1 %v3029_v54  ;;  %3238 = vmatprep.subr.mxu0 %v10011_v59 }
 0x2db   : > { %2925 = vmatmul.mubr.f32.gmra.mxu1 %v2796_v18  ;;  %3074 = vmatprep.subr.mxu1 %v10011_v59 }
 0x2dc   : > { %5747 = vmatprep.mubr.msk.f32.mxu1 %vm2619_vm5, %v2799_v11  ;;  %3075 = vmatpush1.msra.mxu1 %v3028_v42  ;;  %v3358_v42 = vld [vmem:[#allocation5 + $0x38] sm:$0xff] }
 0x2dd   : > { %3076 = vmatprep.subr.mxu1 %v10011_v59  ;;  %3239 = vmatpush1.msra.mxu0 %v3199_v43  ;;  %v3354_v43 = vld [vmem:[#allocation5 + $0x18] sm:$0xff] }
 0x2de   : > { %3077 = vmatpush1.msra.mxu1 %v3027_v47  ;;  %3240 = vmatprep.subr.mxu0 %v10011_v59  ;;  %v3406_v47 = vld [vmem:[#allocation5 + $0x80] sm:$0xff] }
 0x2df   : > { %2931 = vmatmul.mubr.f32.gmra.mxu1 %v2798_v5  ;;  %3078 = vmatprep.subr.mxu1 %v10011_v59 }
 0x2e0   : > { %5748 = vmatprep.mubr.msk.f32.mxu1 %vm2619_vm5, %v2801_v38  ;;  %3079 = vmatpush1.msra.mxu1 %v3026_v16 }
 0x2e1   : > { %3080 = vmatprep.subr.mxu1 %v10011_v59  ;;  %3241 = vmatpush1.msra.mxu0 %v3198_v1 }
 0x2e2   : > { %3081 = vmatpush1.msra.mxu1 %v3025_v23  ;;  %3242 = vmatprep.subr.mxu0 %v10011_v59  ;;  %v3357_v23 = vld [vmem:[#allocation5 + $0x30] sm:$0xff] }
 0x2e3   : > { %2937 = vmatmul.mubr.f32.gmra.mxu1 %v2800_v52  ;;  %3082 = vmatprep.subr.mxu1 %v10011_v59 }
 0x2e4   : > { %5749 = vmatprep.mubr.msk.f32.mxu1 %vm2619_vm5, %v2803_v30  ;;  %3083 = vmatpush1.msra.mxu1 %v3024_v39 }
 0x2e5   : > { %3084 = vmatprep.subr.mxu1 %v10011_v59  ;;  %3243 = vmatpush1.msra.mxu0 %v3197_v40 }
 0x2e6   : > { %3085 = vmatpush1.msra.mxu1 %v3023_v13  ;;  %3244 = vmatprep.subr.mxu0 %v10011_v59  ;;  %v3356_v13 = vld [vmem:[#allocation5 + $0x28] sm:$0xff] }
 0x2e7   : > { %2943 = vmatmul.mubr.f32.gmra.mxu1 %v2802_v3  ;;  %3086 = vmatprep.subr.mxu1 %v10011_v59 }
 0x2e8   : > { %5750 = vmatprep.mubr.msk.f32.mxu1 %vm2619_vm5, %v2805_v4  ;;  %3087 = vmatpush1.msra.mxu1 %v3022_v24 }
 0x2e9   : > { %3088 = vmatprep.subr.mxu1 %v10011_v59  ;;  %3245 = vmatpush1.msra.mxu0 %v3196_v41 }
 0x2ea   : > { %3089 = vmatpush1.msra.mxu1 %v3021_v44  ;;  %3274 = vmatprep.subr.mxu0 %v10011_v59 }
 0x2eb   : > { %2949 = vmatmul.mubr.f32.gmra.mxu1 %v2804_v0  ;;  %3090 = vmatprep.subr.mxu1 %v10011_v59 }
 0x2ec   : > { %5751 = vmatprep.mubr.msk.f32.mxu1 %vm2619_vm5, %v2807_v36  ;;  %3091 = vmatpush1.msra.mxu1 %v3020_v50  ;;  %v3355_v50 = vld [vmem:[#allocation5 + $0x20] sm:$0xff] }
 0x2ed   : > { %3092 = vmatprep.subr.mxu1 %v10011_v59  ;;  %3275 = vmatpush2.msra.mxu0 %v3213_v10 }
 0x2ee   : > { %3093 = vmatpush1.msra.mxu1 %v3019_v15  ;;  %3276 = vmatprep.subr.mxu0 %v10011_v59 }
 0x2ef   : > { %2955 = vmatmul.mubr.f32.gmra.mxu1 %v2806_v63  ;;  %3094 = vmatprep.subr.mxu1 %v10011_v59 }
 0x2f0   : > { %5752 = vmatprep.mubr.msk.f32.mxu1 %vm2619_vm5, %v2809_v2  ;;  %3095 = vmatpush1.msra.mxu1 %v3018_v46 }
 0x2f1   : > { %3096 = vmatprep.subr.mxu1 %v10011_v59  ;;  %3277 = vmatpush2.msra.mxu0 %v3212_v61 }
 0x2f2   : > { %3097 = vmatpush1.msra.mxu1 %v3017_v14  ;;  %6182 = vmatprep.subr.mxu0 %v3359_v55 }
 0x2f3   : > { %2961 = vmatmul.mubr.f32.gmra.mxu1 %v2808_v12  ;;  %3098 = vmatprep.subr.mxu1 %v10011_v59 }
 0x2f4   : > { %5753 = vmatprep.mubr.msk.f32.mxu1 %vm2619_vm5, %v2811_v6  ;;  %3099 = vmatpush1.msra.mxu1 %v3016_v20 }
 0x2f5   : > { %3100 = vmatprep.subr.mxu1 %v10011_v59 }
 0x2f6   : > { %3101 = vmatpush1.msra.mxu1 %v3015_v48 }
 0x2f7   : > { %2967 = vmatmul.mubr.f32.gmra.mxu1 %v2810_v9  ;;  %3130 = vmatprep.subr.mxu1 %v10011_v59 }
 0x2f8   : > { %5754 = vmatprep.mubr.msk.f32.mxu1 %vm2619_vm5, %v2813_v60  ;;  %3131 = vmatpush2.msra.mxu1 %v3032_v28 }
 0x2f9   : > { %3132 = vmatprep.subr.mxu1 %v10011_v59 }
 0x2fa   : > { %3133 = vmatpush2.msra.mxu1 %v3031_v21 }
 0x2fb   : > { %2973 = vmatmul.mubr.f32.gmra.mxu1 %v2812_v45  ;;  %6146 = vmatprep.subr.mxu1 %v3407_v35 }
 0x2fc   : > { %5755 = vmatprep.mubr.msk.f32.mxu1 %vm2619_vm5, %v2815_v7 }
 0x2ff   : > { %2979 = vmatmul.mubr.f32.gmra.mxu1 %v2814_v58 }
 0x300   : > { %5756 = vmatprep.mubr.msk.f32.mxu1 %vm2619_vm5, %v2817_v56 }
 0x303   : > { %2985 = vmatmul.mubr.f32.gmra.mxu1 %v2816_v62 }
 0x35f   : > { %v2722_v53 = vpop.f32.mrf.mxu1 }
 0x361   : > { %v2724_v31 = vpop.f32.mrf.mxu1 }
 0x363   : > { %v2728_v49 = vpop.f32.mrf.mxu1 }
 0x365   : > { %v2730_v51 = vpop.f32.mrf.mxu1 }
 0x367   : > { %v2734_v26 = vpop.f32.mrf.mxu1 }
 0x369   : > { %v2736_v8 = vpop.f32.mrf.mxu1 }
 0x36b   : > { %v2740_v27 = vpop.f32.mrf.mxu1 }
 0x36d   : > { %v2742_v18 = vpop.f32.mrf.mxu1 }
 0x36f   : > { %v8948_v11 = vpop.f32.mrf.mxu1 }
 0x371   : > { %v8950_v5 = vpop.f32.mrf.mxu1 }
 0x373   : > { %v8952_v38 = vpop.f32.mrf.mxu1 }
 0x375   : > { %v8954_v32 = vpop.f32.mrf.mxu1 }
 0x377   : > { %v8956_v52 = vpop.f32.mrf.mxu1 }
 0x379   : > { %v8958_v30 = vpop.f32.mrf.mxu1 }
 0x37b   : > { %v8960_v3 = vpop.f32.mrf.mxu1 }
 0x37d   : > { %v8962_v4 = vpop.f32.mrf.mxu1 }
 0x37f   : > { %v8964_v29 = vpop.f32.mrf.mxu1 }
 0x381   : > { %v8966_v0 = vpop.f32.mrf.mxu1 }
 0x383   : > { %v8968_v36 = vpop.f32.mrf.mxu1 }
 0x385   : > { %v8970_v63 = vpop.f32.mrf.mxu1 }
 0x387   : > { %v8972_v2 = vpop.f32.mrf.mxu1 }
 0x389   : > { %v8974_v57 = vpop.f32.mrf.mxu1 }
 0x38b   : > { %v8976_v12 = vpop.f32.mrf.mxu1 }
 0x38d   : > { %v8978_v6 = vpop.f32.mrf.mxu1 }
 0x397   : > { %v2920_v37 = vpop.f32.mrf.mxu1 }
 0x398   : > { %v2991_v9 = vmax.f32 %v2722_v53, %v2920_v37  ;;  %v3399_v37 = vld [vmem:[#allocation5 + $0x48] sm:$0xff] }
 0x399   : > { %v2922_v19 = vpop.f32.mrf.mxu1 }
 0x39a   : > { %v2992_v54 = vmax.f32 %v2724_v31, %v2922_v19  ;;  %v3941_v19 = vld [vmem:[#allocation5 + $0x118] sm:$0xff] }
 0x39b   : > { %v2926_v60 = vpop.f32.mrf.mxu1 }
 0x39c   : > { %5757 = vmatprep.mubr.msk.f32.mxu1 %vm3033_vm6, %v2992_v54  ;;  %5769 = vmatprep.mubr.msk.f32.mxu0 %vm3033_vm6, %v2992_v54  ;;  %v2993_v22 = vmax.f32 %v2728_v49, %v2926_v60  ;;  %v3743_v54 = vld [vmem:[#allocation5 + $0xd0] sm:$0xff] }
 0x39d   : > { %v2928_v45 = vpop.f32.mrf.mxu1  ;;  %3135 = vmatmul.mubr.f32.vlgmr.msra.gmra.mxu1 %v2991_v9  ;;  %3279 = vmatmul.mubr.f32.vlgmr.msra.gmra.mxu0 %v2991_v9 }
 0x39e   : > { %v2994_v7 = vmax.f32 %v2730_v51, %v2928_v45  ;;  %6183 = vmatpush3.msra.mxu0 %v3359_v55  ;;  %6147 = vmatpush3.msra.mxu1 %v3407_v35 }
 0x39f   : > { %v2932_v16 = vpop.f32.mrf.mxu1  ;;  %6184 = vmatprep.subr.mxu0 %v3358_v42  ;;  %6148 = vmatprep.subr.mxu1 %v3406_v47 }
 0x3a0   : > { %5758 = vmatprep.mubr.msk.f32.mxu1 %vm3033_vm6, %v2994_v7  ;;  %5770 = vmatprep.mubr.msk.f32.mxu0 %vm3033_vm6, %v2994_v7  ;;  %v2995_v39 = vmax.f32 %v2734_v26, %v2932_v16 }
 0x3a1   : > { %v2934_v58 = vpop.f32.mrf.mxu1  ;;  %3140 = vmatmul.mubr.f32.gmra.mxu1 %v2993_v22  ;;  %3284 = vmatmul.mubr.f32.gmra.mxu0 %v2993_v22 }
 0x3a2   : > { %v2996_v56 = vmax.f32 %v2736_v8, %v2934_v58  ;;  %6185 = vmatpush3.msra.mxu0 %v3358_v42  ;;  %6149 = vmatpush3.msra.mxu1 %v3406_v47 }
 0x3a3   : > { %v2938_v25 = vpop.f32.mrf.mxu1  ;;  %6186 = vmatprep.subr.mxu0 %v3357_v23 }
 0x3a4   : > { %5759 = vmatprep.mubr.msk.f32.mxu1 %vm3033_vm6, %v2996_v56  ;;  %5771 = vmatprep.mubr.msk.f32.mxu0 %vm3033_vm6, %v2996_v56  ;;  %v2997_v44 = vmax.f32 %v2740_v27, %v2938_v25  ;;  %v3940_v56 = vld [vmem:[#allocation5 + $0x110] sm:$0xff] }
 0x3a5   : > { %v2940_v62 = vpop.f32.mrf.mxu1  ;;  %3145 = vmatmul.mubr.f32.gmra.mxu1 %v2995_v39  ;;  %3289 = vmatmul.mubr.f32.gmra.mxu0 %v2995_v39 }
 0x3a6   : > { %v2998_v24 = vmax.f32 %v2742_v18, %v2940_v62  ;;  %6187 = vmatpush3.msra.mxu0 %v3357_v23 }
 0x3a7   : > { %v2944_v33 = vpop.f32.mrf.mxu1  ;;  %6188 = vmatprep.subr.mxu0 %v3356_v13 }
 0x3a8   : > { %5760 = vmatprep.mubr.msk.f32.mxu1 %vm3033_vm6, %v2998_v24  ;;  %5772 = vmatprep.mubr.msk.f32.mxu0 %vm3033_vm6, %v2998_v24  ;;  %v2999_v34 = vmax.f32 %v8948_v11, %v2944_v33 }
 0x3a9   : > { %v2946_v17 = vpop.f32.mrf.mxu1  ;;  %3150 = vmatmul.mubr.f32.gmra.mxu1 %v2997_v44  ;;  %3294 = vmatmul.mubr.f32.gmra.mxu0 %v2997_v44  ;;  %v3939_v44 = vld [vmem:[#allocation5 + $0x108] sm:$0xff] }
 0x3aa   : > { %v3000_v15 = vmax.f32 %v8950_v5, %v2946_v17  ;;  %6189 = vmatpush3.msra.mxu0 %v3356_v13 }
 0x3ab   : > { %v2950_v46 = vpop.f32.mrf.mxu1  ;;  %6190 = vmatprep.subr.mxu0 %v3355_v50 }
 0x3ac   : > { %5761 = vmatprep.mubr.msk.f32.mxu1 %vm3033_vm6, %v3000_v15  ;;  %5773 = vmatprep.mubr.msk.f32.mxu0 %vm3033_vm6, %v3000_v15  ;;  %v3001_v20 = vmax.f32 %v8952_v38, %v2950_v46  ;;  %v3938_v46 = vld [vmem:[#allocation5 + $0x100] sm:$0xff] }
 0x3ad   : > { %v2952_v14 = vpop.f32.mrf.mxu1  ;;  %3155 = vmatmul.mubr.f32.gmra.mxu1 %v2999_v34  ;;  %3299 = vmatmul.mubr.f32.gmra.mxu0 %v2999_v34 }
 0x3ae   : > { %v3002_v1 = vmax.f32 %v8954_v32, %v2952_v14  ;;  %6191 = vmatpush3.msra.mxu0 %v3355_v50 }
 0x3af   : > { %v2956_v40 = vpop.f32.mrf.mxu1  ;;  %6192 = vmatprep.subr.mxu0 %v3354_v43 }
 0x3b0   : > { %5762 = vmatprep.mubr.msk.f32.mxu1 %vm3033_vm6, %v3002_v1  ;;  %5774 = vmatprep.mubr.msk.f32.mxu0 %vm3033_vm6, %v3002_v1  ;;  %v3003_v28 = vmax.f32 %v8956_v52, %v2956_v40 }
 0x3b1   : > { %v2958_v48 = vpop.f32.mrf.mxu1  ;;  %3160 = vmatmul.mubr.f32.gmra.mxu1 %v3001_v20  ;;  %3304 = vmatmul.mubr.f32.gmra.mxu0 %v3001_v20 }
 0x3b2   : > { %v3004_v41 = vmax.f32 %v8958_v30, %v2958_v48  ;;  %6193 = vmatpush3.msra.mxu0 %v3354_v43 }
 0x3b3   : > { %v2962_v10 = vpop.f32.mrf.mxu1 }
 0x3b4   : > { %5763 = vmatprep.mubr.msk.f32.mxu1 %vm3033_vm6, %v3004_v41  ;;  %5775 = vmatprep.mubr.msk.f32.mxu0 %vm3033_vm6, %v3004_v41  ;;  %v3005_v55 = vmax.f32 %v8960_v3, %v2962_v10  ;;  %v3937_v10 = vld [vmem:[#allocation5 + $0xf8] sm:$0xff] }
 0x3b5   : > { %v2964_v21 = vpop.f32.mrf.mxu1  ;;  %3165 = vmatmul.mubr.f32.gmra.mxu1 %v3003_v28  ;;  %3309 = vmatmul.mubr.f32.gmra.mxu0 %v3003_v28  ;;  %v3742_v28 = vld [vmem:[#allocation5 + $0xc8] sm:$0xff] }
 0x3b6   : > { %v3006_v61 = vmax.f32 %v8962_v4, %v2964_v21  ;;  %v3405_v4 = vld [vmem:[#allocation5 + $0x78] sm:$0xff] }
 0x3b7   : > { %v2968_v35 = vpop.f32.mrf.mxu1  ;;  %6150 = vmatprep.subr.mxu1 %v3405_v4 }
 0x3b8   : > { %5764 = vmatprep.mubr.msk.f32.mxu1 %vm3033_vm6, %v3006_v61  ;;  %5776 = vmatprep.mubr.msk.f32.mxu0 %vm3033_vm6, %v3006_v61  ;;  %v3007_v49 = vmax.f32 %v8964_v29, %v2968_v35  ;;  %v3353_v29 = vld [vmem:[#allocation5 + $0x10] sm:$0xff] }
 0x3b9   : > { %v2970_v53 = vpop.f32.mrf.mxu1  ;;  %3170 = vmatmul.mubr.f32.gmra.mxu1 %v3005_v55  ;;  %3314 = vmatmul.mubr.f32.gmra.mxu0 %v3005_v55 }
 0x3ba   : > { %v3008_v31 = vmax.f32 %v8966_v0, %v2970_v53  ;;  %6151 = vmatpush3.msra.mxu1 %v3405_v4  ;;  %6194 = vmatprep.subr.mxu0 %v3353_v29  ;;  %v3404_v0 = vld [vmem:[#allocation5 + $0x70] sm:$0xff]  ;;  %v3741_v53 = vld [vmem:[#allocation5 + $0xc0] sm:$0xff]  ;;  %v3935_v4 = vld [vmem:[#allocation5 + $0xe8] sm:$0xff] }
 0x3bb   : > { %v2974_v51 = vpop.f32.mrf.mxu1  ;;  %6152 = vmatprep.subr.mxu1 %v3404_v0  ;;  %6195 = vmatpush3.msra.mxu0 %v3353_v29 }
 0x3bc   : > { %5765 = vmatprep.mubr.msk.f32.mxu1 %vm3033_vm6, %v3008_v31  ;;  %5777 = vmatprep.mubr.msk.f32.mxu0 %vm3033_vm6, %v3008_v31  ;;  %v3009_v27 = vmax.f32 %v8968_v36, %v2974_v51  ;;  %v3352_v36 = vld [vmem:[#allocation5 + $0x8] sm:$0xff] }
 0x3bd   : > { %v2976_v26 = vpop.f32.mrf.mxu1  ;;  %3175 = vmatmul.mubr.f32.gmra.mxu1 %v3007_v49  ;;  %3319 = vmatmul.mubr.f32.gmra.mxu0 %v3007_v49 }
 0x3be   : > { %v3010_v8 = vmax.f32 %v8970_v63, %v2976_v26  ;;  %6153 = vmatpush3.msra.mxu1 %v3404_v0  ;;  %6196 = vmatprep.subr.mxu0 %v3352_v36  ;;  %v3403_v63 = vld [vmem:[#allocation5 + $0x68] sm:$0xff] }
 0x3bf   : > { %v2980_v18 = vpop.f32.mrf.mxu1  ;;  %6154 = vmatprep.subr.mxu1 %v3403_v63  ;;  %6197 = vmatpush3.msra.mxu0 %v3352_v36 }
 0x3c0   : > { %5766 = vmatprep.mubr.msk.f32.mxu1 %vm3033_vm6, %v3010_v8  ;;  %5778 = vmatprep.mubr.msk.f32.mxu0 %vm3033_vm6, %v3010_v8  ;;  %v3011_v38 = vmax.f32 %v8972_v2, %v2980_v18  ;;  %v3351_v2 = vld [vmem:[#allocation5] sm:$0xff]  ;;  %v3936_v18 = vld [vmem:[#allocation5 + $0xf0] sm:$0xff] }
 0x3c1   : > { %v2982_v11 = vpop.f32.mrf.mxu1  ;;  %3180 = vmatmul.mubr.f32.gmra.mxu1 %v3009_v27  ;;  %3324 = vmatmul.mubr.f32.gmra.mxu0 %v3009_v27  ;;  %v3740_v27 = vld [vmem:[#allocation5 + $0xb8] sm:$0xff] }
 0x3c2   : > { %v3012_v5 = vmax.f32 %v8974_v57, %v2982_v11  ;;  %6155 = vmatpush3.msra.mxu1 %v3403_v63  ;;  %6198 = vmatprep.subr.mxu0 %v3351_v2  ;;  %v3402_v57 = vld [vmem:[#allocation5 + $0x60] sm:$0xff] }
 0x3c3   : > { %v2986_v32 = vpop.f32.mrf.mxu1  ;;  %6156 = vmatprep.subr.mxu1 %v3402_v57  ;;  %6199 = vmatpush3.msra.mxu0 %v3351_v2  ;;  %v3738_v2 = vld [vmem:[#allocation5 + $0xa8] sm:$0xff] }
 0x3c4   : > { %5767 = vmatprep.mubr.msk.f32.mxu1 %vm3033_vm6, %v3012_v5  ;;  %5779 = vmatprep.mubr.msk.f32.mxu0 %vm3033_vm6, %v3012_v5  ;;  %v3013_v3 = vmax.f32 %v8976_v12, %v2986_v32  ;;  %v3401_v12 = vld [vmem:[#allocation5 + $0x58] sm:$0xff] }
 0x3c5   : > { %v2988_v52 = vpop.f32.mrf.mxu1  ;;  %3185 = vmatmul.mubr.f32.gmra.mxu1 %v3011_v38  ;;  %3329 = vmatmul.mubr.f32.gmra.mxu0 %v3011_v38 }
 0x3c6   : > { %v3014_v30 = vmax.f32 %v8978_v6, %v2988_v52  ;;  %6157 = vmatpush3.msra.mxu1 %v3402_v57  ;;  %v3400_v6 = vld [vmem:[#allocation5 + $0x50] sm:$0xff]  ;;  %6254 = vmatprep.subr.mxu0 %v3941_v19  ;;  %v3934_v57 = vld [vmem:[#allocation5 + $0xe0] sm:$0xff] }
 0x3c7   : > { %6158 = vmatprep.subr.mxu1 %v3401_v12  ;;  %v3739_v52 = vld [vmem:[#allocation5 + $0xb0] sm:$0xff] }
 0x3c8   : > { %5768 = vmatprep.mubr.msk.f32.mxu1 %vm3033_vm6, %v3014_v30  ;;  %5780 = vmatprep.mubr.msk.f32.mxu0 %vm3033_vm6, %v3014_v30 }
 0x3c9   : > { %3190 = vmatmul.mubr.f32.gmra.mxu1 %v3013_v3  ;;  %3334 = vmatmul.mubr.f32.gmra.mxu0 %v3013_v3 }
 0x3ca   : > { %6159 = vmatpush3.msra.mxu1 %v3401_v12 }
 0x3cb   : > { %6160 = vmatprep.subr.mxu1 %v3400_v6 }
 0x3cc   : > { %6161 = vmatpush3.msra.mxu1 %v3400_v6 }
 0x3cd   : > { %6162 = vmatprep.subr.mxu1 %v3399_v37 }
 0x3ce   : > { %6163 = vmatpush3.msra.mxu1 %v3399_v37 }
 0x3cf   : > { %6218 = vmatprep.subr.mxu1 %v3743_v54 }
 0x45d   : > { %v3136_v9 = vpop.f32.mrf.mxu1  ;;  %v3280_v60 = vpop.f32.mrf.mxu0 }
 0x45e   : > { %v9020_v42 = vmax.f32 %v3136_v9, %v3280_v60  ;;  %v3737_v9 = vld [vmem:[#allocation5 + $0xa0] sm:$0xff]  ;;  %v3933_v60 = vld [vmem:[#allocation5 + $0xd8] sm:$0xff] }
 0x45f   : > { %v3138_v47 = vpop.f32.mrf.mxu1  ;;  %v3282_v45 = vpop.f32.mrf.mxu0 }
 0x460   : > { %6200 = vmatprep.mubr.msk.f32.mxu0 %vm3408_vm7, %v9020_v42  ;;  %v3372_v39 = vrot.slane %v9020_v42, 1  ;;  %v4104_v33 = vrot.slane %v9020_v42, 4 }
 0x461   : > { %v3141_v7 = vpop.f32.mrf.mxu1  ;;  %v3285_v22 = vpop.f32.mrf.mxu0 }
 0x462   : > { %v9024_v16 = vmax.f32 %v3141_v7, %v3285_v22  ;;  %v3736_v22 = vld [vmem:[#allocation5 + $0x98] sm:$0xff] }
 0x463   : > { %v3143_v23 = vpop.f32.mrf.mxu1  ;;  %v3287_v58 = vpop.f32.mrf.mxu0 }
 0x464   : > { %6201 = vmatmul.mubr.msk.f32.vlgmr.msra.gmra.mxu0 %vm3408_vm7, %v9024_v16  ;;  %v3373_v25 = vrot.slane %v9024_v16, 1  ;;  %v4105_v13 = vrot.slane %v9024_v16, 4 }
 0x465   : > { %v3146_v62 = vpop.f32.mrf.mxu1  ;;  %v3290_v24 = vpop.f32.mrf.mxu0  ;;  %6255 = vmatpush3.msra.mxu0 %v3941_v19 }
 0x466   : > { %v9032_v50 = vmax.f32 %v3146_v62, %v3290_v24  ;;  %v3374_v17 = vsel %vm551_vm1, %v3372_v39, %v3373_v25  ;;  %6256 = vmatprep.subr.mxu0 %v3940_v56  ;;  %v9041_v43 = vsel %vm677_vm0, %v4104_v33, %v4105_v13 }
 0x467   : > { %v3148_v15 = vpop.f32.mrf.mxu1  ;;  %v3292_v34 = vpop.f32.mrf.mxu0  ;;  %6164 = vmatprep.mubr.msk.f32.mxu1 %vm3408_vm7, %v3374_v17  ;;  %6257 = vmatpush3.msra.mxu0 %v3940_v56  ;;  %v9091_v17 = vld [vmem:[#allocation5 + $0x160] sm:$0xff] }
 0x468   : > { %v3375_v14 = vrot.slane %v9032_v50, 1  ;;  %v4107_v1 = vrot.slane %v9032_v50, 4  ;;  %6203 = vmatprep.mubr.msk.f32.mxu0 %vm3408_vm7, %v9032_v50  ;;  %6258 = vmatprep.subr.mxu0 %v3939_v44 }
 0x469   : > { %v3151_v20 = vpop.f32.mrf.mxu1  ;;  %v3295_v40 = vpop.f32.mrf.mxu0  ;;  %6259 = vmatpush3.msra.mxu0 %v3939_v44 }
 0x46a   : > { %v9047_v48 = vmax.f32 %v3151_v20, %v3295_v40  ;;  %v3376_v41 = vsel %vm551_vm1, %v3373_v25, %v3375_v14  ;;  %6260 = vmatprep.subr.mxu0 %v3938_v46  ;;  %v9052_v55 = vsel %vm677_vm0, %v4105_v13, %v4107_v1  ;;  %v3735_v13 = vld [vmem:[#allocation5 + $0x90] sm:$0xff] }
 0x46b   : > { %v3153_v21 = vpop.f32.mrf.mxu1  ;;  %v3297_v61 = vpop.f32.mrf.mxu0  ;;  %6165 = vmatmul.mubr.msk.f32.vlgmr.msra.gmra.mxu1 %vm3408_vm7, %v3376_v41  ;;  %6261 = vmatpush3.msra.mxu0 %v3938_v46 }
 0x46c   : > { %6204 = vmatmul.mubr.msk.f32.gmra.mxu0 %vm3408_vm7, %v9047_v48  ;;  %v3377_v35 = vrot.slane %v9047_v48, 1  ;;  %6219 = vmatpush3.msra.mxu1 %v3743_v54  ;;  %v4109_v31 = vrot.slane %v9047_v48, 4 }
 0x46d   : > { %v3156_v49 = vpop.f32.mrf.mxu1  ;;  %v3300_v51 = vpop.f32.mrf.mxu0  ;;  %6220 = vmatprep.subr.mxu1 %v3742_v28  ;;  %6262 = vmatprep.subr.mxu0 %v3937_v10 }
 0x46e   : > { %v9058_v26 = vmax.f32 %v3156_v49, %v3300_v51  ;;  %v3378_v8 = vsel %vm551_vm1, %v3375_v14, %v3377_v35  ;;  %6221 = vmatpush3.msra.mxu1 %v3742_v28  ;;  %6263 = vmatpush3.msra.mxu0 %v3937_v10  ;;  %v9065_v38 = vsel %vm677_vm0, %v4107_v1, %v4109_v31 }
 0x46f   : > { %v3158_v11 = vpop.f32.mrf.mxu1  ;;  %v3302_v5 = vpop.f32.mrf.mxu0  ;;  %6167 = vmatprep.mubr.msk.f32.mxu1 %vm3408_vm7, %v3378_v8  ;;  %6222 = vmatprep.subr.mxu1 %v3741_v53 }
 0x470   : > { %6206 = vmatprep.mubr.msk.f32.mxu0 %vm3408_vm7, %v9058_v26  ;;  %v3379_v32 = vrot.slane %v9058_v26, 1  ;;  %6223 = vmatpush3.msra.mxu1 %v3741_v53 }
 0x471   : > { %v3161_v30 = vpop.f32.mrf.mxu1  ;;  %v3305_v3 = vpop.f32.mrf.mxu0  ;;  %6224 = vmatprep.subr.mxu1 %v3740_v27  ;;  %6264 = vmatprep.subr.mxu0 %v3936_v18 }
 0x472   : > { %v9070_v29 = vmax.f32 %v3161_v30, %v3305_v3  ;;  %v3380_v0 = vsel %vm551_vm1, %v3377_v35, %v3379_v32  ;;  %6225 = vmatpush3.msra.mxu1 %v3740_v27  ;;  %6265 = vmatpush3.msra.mxu0 %v3936_v18 }
 0x473   : > { %v3163_v36 = vpop.f32.mrf.mxu1  ;;  %v3307_v63 = vpop.f32.mrf.mxu0  ;;  %6168 = vmatmul.mubr.msk.f32.gmra.mxu1 %vm3408_vm7, %v3380_v0  ;;  %6226 = vmatprep.subr.mxu1 %v3739_v52  ;;  %v3906_v0 = vrot.slane %v9020_v42, 3 }
 0x474   : > { %6207 = vmatmul.mubr.msk.f32.gmra.mxu0 %vm3408_vm7, %v9070_v29  ;;  %v3381_v12 = vrot.slane %v9070_v29, 1  ;;  %6266 = vmatprep.subr.mxu0 %v3935_v4  ;;  %v3909_v36 = vrot.slane %v9032_v50, 3 }
 0x475   : > { %v3166_v6 = vpop.f32.mrf.mxu1  ;;  %v3310_v37 = vpop.f32.mrf.mxu0  ;;  %6227 = vmatpush3.msra.mxu1 %v3739_v52  ;;  %6267 = vmatpush3.msra.mxu0 %v3935_v4 }
 0x476   : > { %v9077_v19 = vmax.f32 %v3166_v6, %v3310_v37  ;;  %v3382_v54 = vsel %vm551_vm1, %v3379_v32, %v3381_v12  ;;  %6228 = vmatprep.subr.mxu1 %v3738_v2  ;;  %6268 = vmatprep.subr.mxu0 %v3934_v57  ;;  %v3907_v32 = vrot.slane %v9024_v16, 3  ;;  %v3709_v6 = vrot.slane %v9024_v16, 2 }
 0x477   : > { %v3168_v47 = vpop.f32.mrf.mxu1  ;;  %v3312_v45 = vpop.f32.mrf.mxu0  ;;  %6170 = vmatprep.mubr.msk.f32.mxu1 %vm3408_vm7, %v3382_v54  ;;  %6229 = vmatpush3.msra.mxu1 %v3738_v2  ;;  %v3911_v37 = vrot.slane %v9047_v48, 3  ;;  %v3913_v16 = vrot.slane %v9058_v26, 3 }
 0x478   : > { %6209 = vmatprep.mubr.msk.f32.mxu0 %vm3408_vm7, %v9077_v19  ;;  %v3383_v7 = vrot.slane %v9077_v19, 1  ;;  %6269 = vmatpush3.msra.mxu0 %v3934_v57  ;;  %v3908_v57 = vsel %vm1632_vm4, %v3906_v0, %v3907_v32  ;;  %v3711_v47 = vrot.slane %v9032_v50, 2  ;;  %v3910_v45 = vsel %vm1632_vm4, %v3907_v32, %v3909_v36 }
 0x479   : > { %v3171_v23 = vpop.f32.mrf.mxu1  ;;  %v3315_v58 = vpop.f32.mrf.mxu0  ;;  %6230 = vmatprep.subr.mxu1 %v3737_v9  ;;  %6270 = vmatprep.subr.mxu0 %v3933_v60  ;;  %v3915_v50 = vrot.slane %v9070_v29, 3 }
 0x47a   : > { %v9084_v56 = vmax.f32 %v3171_v23, %v3315_v58  ;;  %v3384_v25 = vsel %vm551_vm1, %v3381_v12, %v3383_v7  ;;  %6231 = vmatpush3.msra.mxu1 %v3737_v9  ;;  %6271 = vmatpush3.msra.mxu0 %v3933_v60  ;;  %v3708_v60 = vrot.slane %v9020_v42, 2  ;;  %v3712_v23 = vsel %vm1212_vm3, %v3709_v6, %v3711_v47 }
 0x47b   : > { %v3173_v62 = vpop.f32.mrf.mxu1  ;;  %v3317_v24 = vpop.f32.mrf.mxu0  ;;  %6171 = vmatmul.mubr.msk.f32.gmra.mxu1 %vm3408_vm7, %v3384_v25  ;;  %6232 = vmatprep.subr.mxu1 %v3736_v22  ;;  %v3914_v58 = vsel %vm1632_vm4, %v3911_v37, %v3913_v16  ;;  %v3715_v25 = vrot.slane %v9058_v26, 2 }
 0x47c   : > { %6210 = vmatmul.mubr.msk.f32.gmra.mxu0 %vm3408_vm7, %v9084_v56  ;;  %v3385_v44 = vrot.slane %v9084_v56, 1  ;;  %6233 = vmatpush3.msra.mxu1 %v3736_v22  ;;  %v3713_v22 = vrot.slane %v9047_v48, 2  ;;  %v3916_v24 = vsel %vm1632_vm4, %v3913_v16, %v3915_v50  ;;  %v4111_v16 = vrot.slane %v9058_v26, 4 }
 0x47d   : > { %v3176_v15 = vpop.f32.mrf.mxu1  ;;  %v3320_v34 = vpop.f32.mrf.mxu0  ;;  %6234 = vmatprep.subr.mxu1 %v3735_v13  ;;  %v4117_v26 = vrot.slane %v9084_v56, 4 }
 0x47e   : > { %v9093_v46 = vmax.f32 %v3176_v15, %v3320_v34  ;;  %v3386_v14 = vsel %vm551_vm1, %v3383_v7, %v3385_v44  ;;  %6235 = vmatpush3.msra.mxu1 %v3735_v13  ;;  %v3710_v7 = vsel %vm1212_vm3, %v3708_v60, %v3709_v6  ;;  %v3917_v13 = vrot.slane %v9077_v19, 3  ;;  %v4138_v34 = vld [vmem:[#allocation5 + $0x158] sm:$0xff] }
 0x47f   : > { %v3178_v1 = vpop.f32.mrf.mxu1  ;;  %v3322_v20 = vpop.f32.mrf.mxu0  ;;  %6173 = vmatprep.mubr.msk.f32.mxu1 %vm3408_vm7, %v3386_v14  ;;  %6290 = vmatprep.subr.mxu1 %v9091_v17  ;;  %v3714_v62 = vsel %vm1212_vm3, %v3711_v47, %v3713_v22  ;;  %v3919_v15 = vrot.slane %v9084_v56, 3  ;;  %v3716_v14 = vsel %vm1212_vm3, %v3713_v22, %v3715_v25  ;;  %v4132_v47 = vld [vmem:[#allocation5 + $0x128] sm:$0xff] }
 0x480   : > { %6212 = vmatprep.mubr.msk.f32.mxu0 %vm3408_vm7, %v9093_v46  ;;  %v3387_v40 = vrot.slane %v9093_v46, 1  ;;  %v3918_v1 = vsel %vm1632_vm4, %v3915_v50, %v3917_v13  ;;  %v3719_v20 = vrot.slane %v9077_v19, 2  ;;  %v5846_v50 = vld [vmem:[%s9639_s7 + $0x20] sm:$0xff] }
 0x481   : > { %v3181_v41 = vpop.f32.mrf.mxu1  ;;  %v3325_v28 = vpop.f32.mrf.mxu0 }
 0x482   : > { %v9101_v10 = vmax.f32 %v3181_v41, %v3325_v28  ;;  %v3388_v21 = vsel %vm551_vm1, %v3385_v44, %v3387_v40  ;;  %v3717_v44 = vrot.slane %v9070_v29, 2  ;;  %v3920_v28 = vsel %vm1632_vm4, %v3917_v13, %v3919_v15 }
 0x483   : > { %v3183_v61 = vpop.f32.mrf.mxu1  ;;  %v3327_v35 = vpop.f32.mrf.mxu0  ;;  %6174 = vmatmul.mubr.msk.f32.gmra.mxu1 %vm3408_vm7, %v3388_v21  ;;  %v3721_v21 = vrot.slane %v9084_v56, 2 }
 0x484   : > { %6213 = vmatmul.mubr.msk.f32.gmra.mxu0 %vm3408_vm7, %v9101_v10  ;;  %v3389_v53 = vrot.slane %v9101_v10, 1  ;;  %v3718_v41 = vsel %vm1212_vm3, %v3715_v25, %v3717_v44  ;;  %v4137_v61 = vld [vmem:[#allocation5 + $0x150] sm:$0xff]  ;;  %v3720_v35 = vsel %vm1212_vm3, %v3717_v44, %v3719_v20 }
 0x485   : > { %v3186_v49 = vpop.f32.mrf.mxu1  ;;  %v3330_v51 = vpop.f32.mrf.mxu0 }
 0x486   : > { %v9108_v8 = vmax.f32 %v3186_v49, %v3330_v51  ;;  %v3390_v27 = vsel %vm551_vm1, %v3387_v40, %v3389_v53  ;;  %v3921_v40 = vrot.slane %v9093_v46, 3  ;;  %v3723_v49 = vrot.slane %v9093_v46, 2 }
 0x487   : > { %v3188_v18 = vpop.f32.mrf.mxu1  ;;  %v3332_v11 = vpop.f32.mrf.mxu0  ;;  %6176 = vmatprep.mubr.msk.f32.mxu1 %vm3408_vm7, %v3390_v27  ;;  %v3722_v27 = vsel %vm1212_vm3, %v3719_v20, %v3721_v21 }
 0x488   : > { %6215 = vmatprep.mubr.msk.f32.mxu0 %vm3408_vm7, %v9108_v8  ;;  %v3391_v5 = vrot.slane %v9108_v8, 1  ;;  %v3925_v51 = vrot.slane %v9108_v8, 3  ;;  %v4136_v11 = vld [vmem:[#allocation5 + $0x148] sm:$0xff] }
 0x489   : > { %v3191_v52 = vpop.f32.mrf.mxu1  ;;  %v3335_v30 = vpop.f32.mrf.mxu0 }
 0x48a   : > { %v9116_v3 = vmax.f32 %v3191_v52, %v3335_v30  ;;  %v3392_v4 = vsel %vm551_vm1, %v3389_v53, %v3391_v5  ;;  %v3922_v53 = vsel %vm1632_vm4, %v3919_v15, %v3921_v40  ;;  %v3724_v52 = vsel %vm1212_vm3, %v3721_v21, %v3723_v49 }
 0x48b   : > { %v3193_v63 = vpop.f32.mrf.mxu1  ;;  %v3337_v2 = vpop.f32.mrf.mxu0  ;;  %6177 = vmatmul.mubr.msk.f32.gmra.mxu1 %vm3408_vm7, %v3392_v4 }
 0x48c   : > { %6216 = vmatmul.mubr.msk.f32.gmra.mxu0 %vm3408_vm7, %v9116_v3  ;;  %v3393_v12 = vrot.slane %v9116_v3, 1  ;;  %v3927_v32 = vrot.slane %v9116_v3, 3  ;;  %v4135_v63 = vld [vmem:[#allocation5 + $0x140] sm:$0xff]  ;;  %v3727_v2 = vrot.slane %v9108_v8, 2  ;;  %v4125_v22 = vrot.slane %v9116_v3, 4 }
 0x48d   : > { %6272 = vmatprep.mubr.msk.f32.mxu0 %vm3408_vm7, %v3908_v57  ;;  %v3729_v57 = vrot.slane %v9116_v3, 2  ;;  %v4333_v3 = vld [vmem:[%s9639_s7] sm:$0xff] }
 0x48e   : > { %v3394_v54 = vsel %vm551_vm1, %v3391_v5, %v3393_v12  ;;  %v3397_v9 = vsel %vm551_vm1, %v3393_v12, %v3372_v39  ;;  %v3912_v39 = vsel %vm1632_vm4, %v3909_v36, %v3911_v37  ;;  %v3725_v5 = vrot.slane %v9101_v10, 2  ;;  %v4134_v12 = vld [vmem:[#allocation5 + $0x138] sm:$0xff] }
 0x48f   : > { %6179 = vmatprep.mubr.msk.f32.mxu1 %vm3408_vm7, %v3394_v54  ;;  %v3928_v36 = vsel %vm1632_vm4, %v3925_v51, %v3927_v32  ;;  %v3931_v6 = vsel %vm1632_vm4, %v3927_v32, %v3906_v0  ;;  %v4133_v54 = vld [vmem:[#allocation5 + $0x130] sm:$0xff]  ;;  %v3733_v0 = vsel %vm1212_vm3, %v3729_v57, %v3708_v60  ;;  %v4112_v60 = vsel %vm677_vm0, %v4109_v31, %v4111_v16 }
 0x490   : > { %6180 = vmatmul.mubr.msk.f32.gmra.mxu1 %vm3408_vm7, %v3397_v9  ;;  %6273 = vmatmul.mubr.msk.f32.vlgmr.msra.gmra.mxu0 %vm3408_vm7, %v3910_v45  ;;  %v3726_v4 = vsel %vm1212_vm3, %v3723_v49, %v3725_v5  ;;  %v3728_v37 = vsel %vm1212_vm3, %v3725_v5, %v3727_v2  ;;  %v3730_v9 = vsel %vm1212_vm3, %v3727_v2, %v3729_v57  ;;  %v4131_v45 = vld [vmem:[#allocation5 + $0x120] sm:$0xff]  ;;  %v4121_v31 = vrot.slane %v9101_v10, 4 }
 0x491   : > { %6236 = vmatprep.mubr.msk.f32.mxu1 %vm3408_vm7, %v3710_v7  ;;  %6275 = vmatprep.mubr.msk.f32.mxu0 %vm3408_vm7, %v3912_v39  ;;  %v4113_v7 = vrot.slane %v9070_v29, 4  ;;  %v4115_v39 = vrot.slane %v9077_v19, 4  ;;  %v4119_v29 = vrot.slane %v9093_v46, 4  ;;  %v4123_v19 = vrot.slane %v9108_v8, 4 }
 0x492   : > { %v4129_v8 = vsel %vm677_vm0, %v4125_v22, %v4104_v33 }
 0x493   : > { %v4118_v48 = vsel %vm677_vm0, %v4115_v39, %v4117_v26  ;;  %v4122_v56 = vsel %vm677_vm0, %v4119_v29, %v4121_v31  ;;  %v4124_v46 = vsel %vm677_vm0, %v4121_v31, %v4123_v19 }
 0x494   : > { %6237 = vmatmul.mubr.msk.f32.vlgmr.msra.gmra.mxu1 %vm3408_vm7, %v3712_v23  ;;  %6276 = vmatmul.mubr.msk.f32.gmra.mxu0 %vm3408_vm7, %v3914_v58 }
 0x495   : > { %6239 = vmatprep.mubr.msk.f32.mxu1 %vm3408_vm7, %v3714_v62  ;;  %6278 = vmatprep.mubr.msk.f32.mxu0 %vm3408_vm7, %v3916_v24 }
 0x496   : > { %6291 = vmatpush3.msra.mxu1 %v9091_v17  ;;  %v3923_v17 = vrot.slane %v9101_v10, 3  ;;  %v4126_v10 = vsel %vm677_vm0, %v4123_v19, %v4125_v22 }
 0x497   : > { %6292 = vmatprep.subr.mxu1 %v4138_v34 }
 0x498   : > { %6240 = vmatmul.mubr.msk.f32.gmra.mxu1 %vm3408_vm7, %v3716_v14  ;;  %6279 = vmatmul.mubr.msk.f32.gmra.mxu0 %vm3408_vm7, %v3918_v1  ;;  %v3924_v18 = vsel %vm1632_vm4, %v3921_v40, %v3923_v17  ;;  %v3926_v30 = vsel %vm1632_vm4, %v3923_v17, %v3925_v51 }
 0x499   : > { %6242 = vmatprep.mubr.msk.f32.mxu1 %vm3408_vm7, %v3718_v41  ;;  %6281 = vmatprep.mubr.msk.f32.mxu0 %vm3408_vm7, %v3920_v28 }
 0x49a   : > { %6293 = vmatpush3.msra.mxu1 %v4138_v34 }
 0x49b   : > { %6294 = vmatprep.subr.mxu1 %v4137_v61 }
 0x49c   : > { %6243 = vmatmul.mubr.msk.f32.gmra.mxu1 %vm3408_vm7, %v3720_v35  ;;  %6282 = vmatmul.mubr.msk.f32.gmra.mxu0 %vm3408_vm7, %v3922_v53 }
 0x49d   : > { %6245 = vmatprep.mubr.msk.f32.mxu1 %vm3408_vm7, %v3722_v27  ;;  %6284 = vmatprep.mubr.msk.f32.mxu0 %vm3408_vm7, %v3924_v18 }
 0x49e   : > { %6295 = vmatpush3.msra.mxu1 %v4137_v61 }
 0x49f   : > { %6296 = vmatprep.subr.mxu1 %v4136_v11 }
 0x4a0   : > { %6246 = vmatmul.mubr.msk.f32.gmra.mxu1 %vm3408_vm7, %v3724_v52  ;;  %6285 = vmatmul.mubr.msk.f32.gmra.mxu0 %vm3408_vm7, %v3926_v30 }
 0x4a1   : > { %6248 = vmatprep.mubr.msk.f32.mxu1 %vm3408_vm7, %v3726_v4  ;;  %6287 = vmatprep.mubr.msk.f32.mxu0 %vm3408_vm7, %v3928_v36 }
 0x4a2   : > { %6297 = vmatpush3.msra.mxu1 %v4136_v11 }
 0x4a3   : > { %6298 = vmatprep.subr.mxu1 %v4135_v63 }
 0x4a4   : > { %6299 = vmatpush3.msra.mxu1 %v4135_v63  ;;  %6288 = vmatmul.mubr.msk.f32.gmra.mxu0 %vm3408_vm7, %v3931_v6 }
 0x4a5   : > { %6249 = vmatmul.mubr.msk.f32.gmra.mxu1 %vm3408_vm7, %v3728_v37  ;;  %6300 = vmatprep.subr.mxu1 %v4134_v12 }
 0x4a6   : > { %6251 = vmatprep.mubr.msk.f32.mxu1 %vm3408_vm7, %v3730_v9  ;;  %6301 = vmatpush3.msra.mxu1 %v4134_v12 }
 0x4a7   : > { %6302 = vmatprep.subr.mxu1 %v4133_v54  ;;  %6350 = vmatprep.mubr.msk.f32.mxu0 %vm2619_vm5, %v4333_v3 }
 0x4a8   : > { %6303 = vmatpush3.msra.mxu1 %v4133_v54 }
 0x4a9   : > { %6252 = vmatmul.mubr.msk.f32.gmra.mxu1 %vm3408_vm7, %v3733_v0  ;;  %6304 = vmatprep.subr.mxu1 %v4132_v47 }
 0x4aa   : > { %6305 = vmatpush3.msra.mxu1 %v4132_v47  ;;  %6308 = vmatprep.mubr.msk.f32.mxu1 %vm3408_vm7, %v9041_v43  ;;  %v4114_v43 = vsel %vm677_vm0, %v4111_v16, %v4113_v7 }
 0x4ab   : > { %6306 = vmatprep.subr.mxu1 %v4131_v45 }
 0x4ac   : > { %6307 = vmatpush3.msra.mxu1 %v4131_v45 }
 0x4ad   : > { %6309 = vmatmul.mubr.msk.f32.vlgmr.msra.gmra.mxu1 %vm3408_vm7, %v9052_v55  ;;  %v4116_v55 = vsel %vm677_vm0, %v4113_v7, %v4115_v39 }
 0x4ae   : > { %6311 = vmatprep.mubr.msk.f32.mxu1 %vm3408_vm7, %v9065_v38  ;;  %v4120_v38 = vsel %vm677_vm0, %v4117_v26, %v4119_v29 }
 0x4b1   : > { %6312 = vmatmul.mubr.msk.f32.gmra.mxu1 %vm3408_vm7, %v4112_v60 }
 0x4b2   : > { %6314 = vmatprep.mubr.msk.f32.mxu1 %vm3408_vm7, %v4114_v43 }
 0x4b5   : > { %6315 = vmatmul.mubr.msk.f32.gmra.mxu1 %vm3408_vm7, %v4116_v55 }
 0x4b6   : > { %6317 = vmatprep.mubr.msk.f32.mxu1 %vm3408_vm7, %v4118_v48 }
 0x4b9   : > { %6318 = vmatmul.mubr.msk.f32.gmra.mxu1 %vm3408_vm7, %v4120_v38 }
 0x4ba   : > { %6320 = vmatprep.mubr.msk.f32.mxu1 %vm3408_vm7, %v4122_v56 }
 0x4bd   : > { %6321 = vmatmul.mubr.msk.f32.gmra.mxu1 %vm3408_vm7, %v4124_v46 }
 0x4be   : > { %6323 = vmatprep.mubr.msk.f32.mxu1 %vm3408_vm7, %v4126_v10 }
 0x4c1   : > { %6324 = vmatmul.mubr.msk.f32.gmra.mxu1 %vm3408_vm7, %v4129_v8 }
 0x4c2   : > { %6380 = vmatprep.mubr.msk.f32.mxu1 %vm2619_vm5, %v5846_v50 }
 0x524   : > { %v9253_v23 = vpop.f32.mrf.mxu0 }
 0x526   : > { %v9255_v58 = vpop.f32.mrf.mxu0 }
 0x52b   : > { %v9257_v42 = vpop.f32.mrf.mxu1 }
 0x52c   : > { %v9259_v33 = vpop.f32.mrf.mxu0 }
 0x52d   : > { %v9261_v25 = vpop.f32.mrf.mxu1 }
 0x52e   : > { %v9263_v13 = vpop.f32.mrf.mxu0 }
 0x533   : > { %v9265_v62 = vpop.f32.mrf.mxu1 }
 0x534   : > { %v9267_v24 = vpop.f32.mrf.mxu0 }
 0x535   : > { %v9269_v44 = vpop.f32.mrf.mxu1 }
 0x536   : > { %v9271_v15 = vpop.f32.mrf.mxu0 }
 0x53b   : > { %v6172_v34 = vpop.f32.mrf.mxu1 }
 0x53c   : > { %v6211_v14 = vpop.f32.mrf.mxu0 }
 0x53d   : > { %v9273_v1 = vpop.f32.mrf.mxu1 }
 0x53e   : > { %v3679_v20 = vpop.f32.mrf.mxu0 }
 0x543   : > { %v6175_v40 = vpop.f32.mrf.mxu1 }
 0x544   : > { %v6214_v41 = vpop.f32.mrf.mxu0  ;;  %v3685_v50 = vadd.f32 %v6211_v14, %v6175_v40 }
 0x545   : > { %v3530_v28 = vpop.f32.mrf.mxu1 }
 0x546   : > { %v3689_v21 = vpop.f32.mrf.mxu0 }
 0x54b   : > { %v6178_v17 = vpop.f32.mrf.mxu1 }
 0x54c   : > { %v6217_v61 = vpop.f32.mrf.mxu0  ;;  %v3695_v31 = vadd.f32 %v6214_v41, %v6178_v17 }
 0x54d   : > { %v3540_v35 = vpop.f32.mrf.mxu1 }
 0x54e   : > { %v3699_v49 = vpop.f32.mrf.mxu0  ;;  %v3690_v56 = vadd.f32 %v3689_v21, %v3540_v35 }
 0x550   : > { %v6181_v53 = vpop.f32.mrf.mxu1  ;;  %v9277_v18 = vpop.f32.mrf.mxu0 }
 0x551   : > { %10094 = vst [vmem:[#allocation76_spill] sm:$0xff] %v9277_v18  ;;  %v3705_v38 = vadd.f32 %v6217_v61, %v6181_v53 }
 0x552   : > { %v3550_v51 = vpop.f32.mrf.mxu1  ;;  %v9283_v32 = vpop.f32.mrf.mxu0 }
 0x553   : > { %10096 = vst [vmem:[#allocation74_spill] sm:$0xff] %v9283_v32  ;;  %v3700_v22 = vadd.f32 %v3699_v49, %v3550_v51  ;;  %v3680_v32 = vadd.f32 %v3679_v20, %v3530_v28  ;;  %v3670_v49 = vadd.f32 %v9271_v15, %v9273_v1  ;;  %v9309_v20 = vld [vmem:[%s9636_s4] ss:$0 sm:$0xff] }
 0x554   : > { %v9275_v27 = vpop.f32.mrf.mxu1  ;;  %v9287_v4 = vpop.f32.mrf.mxu0 }
 0x556   : > { %v9279_v11 = vpop.f32.mrf.mxu1  ;;  %v9289_v2 = vpop.f32.mrf.mxu0 }
 0x557   : > { %10095 = vst [vmem:[#allocation75_spill] sm:$0xff] %v9279_v11  ;;  %10097 = vst [vmem:[#allocation73_spill] sm:$0xff] %v9289_v2 }
 0x558   : > { %v9281_v5 = vpop.f32.mrf.mxu1  ;;  %v6280_v12 = vpop.f32.mrf.mxu0 }
 0x55a   : > { %v9285_v52 = vpop.f32.mrf.mxu1  ;;  %v9291_v54 = vpop.f32.mrf.mxu0 }
 0x55c   : > { %v6244_v30 = vpop.f32.mrf.mxu1  ;;  %v6283_v0 = vpop.f32.mrf.mxu0 }
 0x55e   : > { %v3855_v36 = vpop.f32.mrf.mxu1  ;;  %v4063_v7 = vpop.f32.mrf.mxu0 }
 0x560   : > { %v6247_v63 = vpop.f32.mrf.mxu1  ;;  %v6286_v43 = vpop.f32.mrf.mxu0 }
 0x562   : > { %v3865_v57 = vpop.f32.mrf.mxu1  ;;  %v4073_v29 = vpop.f32.mrf.mxu0 }
 0x563   : > { %v3900_v11 = vadd.f32 %v3865_v57, %v3680_v32 }
 0x564   : > { %v6289_v8 = vpop.f32.mrf.mxu0 }
 0x565   : > { %v6250_v6 = vpop.f32.mrf.mxu1  ;;  %v4098_v32 = vadd.f32 %v4063_v7, %v3900_v11 }
 0x566   : > { %v3903_v46 = vadd.f32 %v6250_v6, %v3695_v31  ;;  %v4083_v41 = vpop.f32.mrf.mxu0 }
 0x567   : > { %v3875_v37 = vpop.f32.mrf.mxu1 }
 0x568   : > { %v3902_v59 = vadd.f32 %v3875_v37, %v3690_v56  ;;  %v4101_v18 = vadd.f32 %v6286_v43, %v3903_v46 }
 0x569   : > { %v6253_v9 = vpop.f32.mrf.mxu1 }
 0x56a   : > { %v3905_v10 = vadd.f32 %v6253_v9, %v3705_v38  ;;  %v4100_v21 = vadd.f32 %v4073_v29, %v3902_v59  ;;  %v3665_v59 = vadd.f32 %v9259_v33, %v9265_v62  ;;  %v3655_v33 = vadd.f32 %v9253_v23, %v9257_v42  ;;  %v10108_v38 = vld [vmem:[#allocation74_spill] sm:$0xff] }
 0x56b   : > { %v3885_v47 = vpop.f32.mrf.mxu1 }
 0x56c   : > { %v4103_v2 = vadd.f32 %v6289_v8, %v3905_v10  ;;  %v3897_v57 = vadd.f32 %v9281_v5, %v3665_v59  ;;  %v3650_v5 = vadd.f32 %v9255_v58, %v9261_v25  ;;  %v10104_v58 = vld [vmem:[#allocation73_spill] sm:$0xff]  ;;  %v5868_v59 = vld [vmem:[%s9640_s8 + $0xb0] sm:$0xff] }
 0x56d   : > { %v9293_v45 = vpop.f32.mrf.mxu1 }
 0x56e   : > { %10098 = vst [vmem:[#allocation72_spill] sm:$0xff] %v9293_v45  ;;  %v4095_v23 = vadd.f32 %v9287_v4, %v3897_v57  ;;  %v10105_v4 = vld [vmem:[#allocation76_spill] sm:$0xff]  ;;  %v5864_v57 = vld [vmem:[%s9640_s8 + $0x90] sm:$0xff] }
 0x56f   : > { %v9295_v16 = vpop.f32.mrf.mxu1 }
 0x570   : > { %10099 = vst [vmem:[#allocation71_spill] sm:$0xff] %v9295_v16  ;;  %v3904_v16 = vadd.f32 %v3885_v47, %v3700_v22 }
 0x571   : > { %v9297_v60 = vpop.f32.mrf.mxu1 }
 0x572   : > { %10100 = vst [vmem:[#allocation70_spill] sm:$0xff] %v9297_v60  ;;  %v3675_v60 = vadd.f32 %v9267_v24, %v6172_v34  ;;  %v4102_v53 = vadd.f32 %v4083_v41, %v3904_v16 }
 0x573   : > { %v9299_v39 = vpop.f32.mrf.mxu1 }
 0x574   : > { %10101 = vst [vmem:[#allocation69_spill] sm:$0xff] %v9299_v39  ;;  %v3901_v39 = vadd.f32 %v6247_v63, %v3685_v50  ;;  %v3899_v14 = vadd.f32 %v6244_v30, %v3675_v60 }
 0x575   : > { %v6316_v26 = vpop.f32.mrf.mxu1 }
 0x576   : > { %v4099_v28 = vadd.f32 %v6283_v0, %v3901_v39  ;;  %v4097_v6 = vadd.f32 %v6280_v12, %v3899_v14  ;;  %v3895_v12 = vadd.f32 %v9275_v27, %v3655_v33  ;;  %v4335_v14 = vld [vmem:[%s9639_s7 + $0x10] sm:$0xff]  ;;  %v4543_v33 = vld [vmem:[%s9640_s8 + $0x18] sm:$0xff] }
 0x577   : > { %v9301_v55 = vpop.f32.mrf.mxu1  ;;  %v10109_v46 = vld [vmem:[#allocation71_spill] sm:$0xff] }
 0x578   : > { %v4295_v11 = vadd.f32 %v6316_v26, %v4097_v6  ;;  %v4093_v39 = vadd.f32 %v10105_v4, %v3895_v12  ;;  %v4545_v6 = vld [vmem:[%s9640_s8 + $0x28] sm:$0xff]  ;;  %v5858_v12 = vld [vmem:[%s9640_s8 + $0x60] sm:$0xff] }
 0x579   : > { %v6319_v48 = vpop.f32.mrf.mxu1  ;;  %v10103_v16 = vld [vmem:[#allocation70_spill] sm:$0xff] }
 0x57a   : > { %v4297_v63 = vadd.f32 %v6319_v48, %v4099_v28  ;;  %v4293_v7 = vadd.f32 %v10103_v16, %v4095_v23  ;;  %v4314_v27 = vadd.f32 %v9309_v20, %v4295_v11  ;;  %v10107_v48 = vld [vmem:[#allocation72_spill] sm:$0xff]  ;;  %v4542_v11 = vld [vmem:[%s9640_s8 + $0x10] sm:$0xff]  ;;  %v4758_v23 = vld [vmem:[%s9642_s10 + $0x28] sm:$0xff] }
 0x57b   : > { %v4261_v19 = vpop.f32.mrf.mxu1  ;;  %v10106_v43 = vld [vmem:[#allocation69_spill] sm:$0xff]  ;;  %v4291_v31 = vadd.f32 %v10107_v48, %v4093_v39  ;;  %v5869_v28 = vld [vmem:[%s9640_s8 + $0xb8] sm:$0xff]  ;;  %v4755_v48 = vld [vmem:[%s9642_s10 + $0x10] sm:$0xff] }
 0x57c   : > { %v4296_v37 = vadd.f32 %v4261_v19, %v4098_v32  ;;  %v4312_v56 = vadd.f32 %v9309_v20, %v4293_v7  ;;  %v4326_v22 = vmax.f32 %v4314_v27, 0.0  ;;  %v5867_v32 = vld [vmem:[%s9640_s8 + $0xa8] sm:$0xff] }
 0x57d   : > { %v6322_v3 = vpop.f32.mrf.mxu1  ;;  %v4310_v50 = vadd.f32 %v9309_v20, %v4291_v31  ;;  %v5882_v31 = vld [vmem:[%s9642_s10 + $0x40] sm:$0xff] }
 0x57e   : > { %v4299_v61 = vadd.f32 %v6322_v3, %v4101_v18  ;;  %v3898_v18 = vadd.f32 %v3855_v36, %v3670_v49  ;;  %v4324_v41 = vmax.f32 %v4312_v56, 0.0  ;;  %v5847_v49 = vld [vmem:[%s9639_s7 + $0x28] sm:$0xff]  ;;  %v4753_v56 = vld [vmem:[%s9642_s10] sm:$0xff] }
 0x57f   : > { %v4271_v45 = vpop.f32.mrf.mxu1 }
 0x580   : > { %v4298_v51 = vadd.f32 %v4271_v45, %v4100_v21  ;;  %v4318_v15 = vadd.f32 %v9309_v20, %v4299_v61  ;;  %v4096_v36 = vadd.f32 %v9291_v54, %v3898_v18  ;;  %v10102_v54 = vld [vmem:[#allocation75_spill] sm:$0xff]  ;;  %v4322_v21 = vmax.f32 %v4310_v50, 0.0  ;;  %v4549_v18 = vld [vmem:[%s9640_s8 + $0x48] sm:$0xff] }
 0x581   : > { %v6325_v17 = vpop.f32.mrf.mxu1  ;;  %v3894_v45 = vadd.f32 %v10102_v54, %v3650_v5  ;;  %v4540_v5 = vld [vmem:[%s9640_s8] sm:$0xff] }
 0x582   : > { %v4301_v35 = vadd.f32 %v6325_v17, %v4103_v2  ;;  %v3660_v2 = vadd.f32 %v9263_v13, %v9269_v44  ;;  %v4317_v9 = vadd.f32 %v9309_v20, %v4298_v51  ;;  %v4316_v13 = vadd.f32 %v9309_v20, %v4297_v63  ;;  %v4336_v51 = vld [vmem:[%s9639_s7 + $0x18] sm:$0xff]  ;;  %v4548_v63 = vld [vmem:[%s9640_s8 + $0x40] sm:$0xff] }
 0x583   : > { %v4281_v40 = vpop.f32.mrf.mxu1  ;;  %v4330_v44 = vmax.f32 %v4318_v15, 0.0  ;;  %v4294_v42 = vadd.f32 %v9301_v55, %v4096_v36  ;;  %v4092_v19 = vadd.f32 %v10108_v38, %v3894_v45  ;;  %v5866_v15 = vld [vmem:[%s9640_s8 + $0xa0] sm:$0xff]  ;;  %v5860_v36 = vld [vmem:[%s9640_s8 + $0x70] sm:$0xff]  ;;  %v4754_v38 = vld [vmem:[%s9642_s10 + $0x8] sm:$0xff] }
 0x584   : > { %v4320_v24 = vadd.f32 %v9309_v20, %v4301_v35  ;;  %v4300_v34 = vadd.f32 %v4281_v40, %v4102_v53  ;;  %v3896_v62 = vadd.f32 %v9285_v52, %v3660_v2  ;;  %v4315_v52 = vadd.f32 %v9309_v20, %v4296_v37  ;;  %v4334_v53 = vld [vmem:[%s9639_s7 + $0x8] sm:$0xff]  ;;  %v4551_v40 = vld [vmem:[%s9640_s8 + $0x58] sm:$0xff]  ;;  %v4546_v2 = vld [vmem:[%s9640_s8 + $0x30] sm:$0xff] }
 0x585   : > { %v4329_v0 = vmax.f32 %v4317_v9, 0.0  ;;  %v4328_v60 = vmax.f32 %v4316_v13, 0.0  ;;  %v4313_v55 = vadd.f32 %v9309_v20, %v4294_v42  ;;  %v4290_v10 = vadd.f32 %v10109_v46, %v4092_v19  ;;  %v5863_v37 = vld [vmem:[%s9640_s8 + $0x88] sm:$0xff]  ;;  %v4544_v9 = vld [vmem:[%s9640_s8 + $0x20] sm:$0xff]  ;;  %v5881_v19 = vld [vmem:[%s9642_s10 + $0x38] sm:$0xff] }
 0x586   : > { %v4332_v1 = vmax.f32 %v4320_v24, 0.0  ;;  %v4319_v30 = vadd.f32 %v9309_v20, %v4300_v34  ;;  %v4094_v25 = vadd.f32 %v10104_v58, %v3896_v62  ;;  %v4327_v29 = vmax.f32 %v4315_v52, 0.0  ;;  %v5849_v24 = vld [vmem:[%s9639_s7 + $0x38] sm:$0xff]  ;;  %v4550_v34 = vld [vmem:[%s9640_s8 + $0x50] sm:$0xff]  ;;  %v4541_v13 = vld [vmem:[%s9640_s8 + $0x8] sm:$0xff] }
 0x587   : > { %v4325_v3 = vmax.f32 %v4313_v55, 0.0  ;;  %v4309_v17 = vadd.f32 %v9309_v20, %v4290_v10  ;;  %v5861_v62 = vld [vmem:[%s9640_s8 + $0x78] sm:$0xff]  ;;  %v5884_v55 = vld [vmem:[%s9642_s10 + $0x50] sm:$0xff]  ;;  %v10110_v46 = vmov 0.0  }
 0x588   : > { %v4331_v47 = vmax.f32 %v4319_v30, 0.0  ;;  %6326 = vmatprep.subr.mxu0 %v4332_v1  ;;  %6356 = vmatprep.subr.mxu1 %v4332_v1  ;;  %v4292_v26 = vadd.f32 %v10106_v43, %v4094_v25  ;;  %v5865_v30 = vld [vmem:[%s9640_s8 + $0x98] sm:$0xff]  ;;  %v4757_v25 = vld [vmem:[%s9642_s10 + $0x20] sm:$0xff] }
 0x589   : > { %6327 = vmatpush3.msra.mxu0 %v4332_v1  ;;  %6357 = vmatpush3.msra.mxu1 %v4332_v1  ;;  %v4321_v35 = vmax.f32 %v4309_v17, 0.0  ;;  %v4547_v1 = vld [vmem:[%s9640_s8 + $0x38] sm:$0xff] }
 0x58a   : > { %6328 = vmatprep.subr.mxu0 %v4331_v47  ;;  %6358 = vmatprep.subr.mxu1 %v4331_v47  ;;  %v4311_v8 = vadd.f32 %v9309_v20, %v4292_v26  ;;  %v5848_v20 = vld [vmem:[%s9639_s7 + $0x30] sm:$0xff]  ;;  %v4756_v43 = vld [vmem:[%s9642_s10 + $0x18] sm:$0xff] }
 0x58b   : > { %6329 = vmatpush3.msra.mxu0 %v4331_v47  ;;  %6359 = vmatpush3.msra.mxu1 %v4331_v47  ;;  %v5862_v47 = vld [vmem:[%s9640_s8 + $0x80] sm:$0xff]  ;;  %v5885_v26 = vld [vmem:[%s9642_s10 + $0x58] sm:$0xff] }
 0x58c   : > { %6330 = vmatprep.subr.mxu0 %v4330_v44  ;;  %6360 = vmatprep.subr.mxu1 %v4330_v44  ;;  %v4323_v61 = vmax.f32 %v4311_v8, 0.0 }
 0x58d   : > { %6331 = vmatpush3.msra.mxu0 %v4330_v44  ;;  %6361 = vmatpush3.msra.mxu1 %v4330_v44  ;;  %v5859_v44 = vld [vmem:[%s9640_s8 + $0x68] sm:$0xff] }
 0x58e   : > { %6332 = vmatprep.subr.mxu0 %v4329_v0  ;;  %6362 = vmatprep.subr.mxu1 %v4329_v0 }
 0x58f   : > { %6333 = vmatpush3.msra.mxu0 %v4329_v0  ;;  %6363 = vmatpush3.msra.mxu1 %v4329_v0 }
 0x590   : > { %6334 = vmatprep.subr.mxu0 %v4328_v60  ;;  %6364 = vmatprep.subr.mxu1 %v4328_v60 }
 0x591   : > { %6335 = vmatpush3.msra.mxu0 %v4328_v60  ;;  %6365 = vmatpush3.msra.mxu1 %v4328_v60 }
 0x592   : > { %6336 = vmatprep.subr.mxu0 %v4327_v29  ;;  %6366 = vmatprep.subr.mxu1 %v4327_v29 }
 0x593   : > { %6337 = vmatpush3.msra.mxu0 %v4327_v29  ;;  %6367 = vmatpush3.msra.mxu1 %v4327_v29  ;;  %v5883_v29 = vld [vmem:[%s9642_s10 + $0x48] sm:$0xff] }
 0x594   : > { %6338 = vmatprep.subr.mxu0 %v4326_v22  ;;  %6368 = vmatprep.subr.mxu1 %v4326_v22 }
 0x595   : > { %6339 = vmatpush3.msra.mxu0 %v4326_v22  ;;  %6369 = vmatpush3.msra.mxu1 %v4326_v22  ;;  %v5880_v22 = vld [vmem:[%s9642_s10 + $0x30] sm:$0xff] }
 0x596   : > { %6340 = vmatprep.subr.mxu0 %v4325_v3  ;;  %6370 = vmatprep.subr.mxu1 %v4325_v3 }
 0x597   : > { %6341 = vmatpush3.msra.mxu0 %v4325_v3  ;;  %6371 = vmatpush3.msra.mxu1 %v4325_v3 }
 0x598   : > { %6342 = vmatprep.subr.mxu0 %v4324_v41  ;;  %6372 = vmatprep.subr.mxu1 %v4324_v41 }
 0x599   : > { %6343 = vmatpush3.msra.mxu0 %v4324_v41  ;;  %6373 = vmatpush3.msra.mxu1 %v4324_v41 }
 0x59a   : > { %6344 = vmatprep.subr.mxu0 %v4323_v61  ;;  %6374 = vmatprep.subr.mxu1 %v4323_v61 }
 0x59b   : > { %6345 = vmatpush3.msra.mxu0 %v4323_v61  ;;  %6375 = vmatpush3.msra.mxu1 %v4323_v61 }
 0x59c   : > { %6346 = vmatprep.subr.mxu0 %v4322_v21  ;;  %6376 = vmatprep.subr.mxu1 %v4322_v21 }
 0x59d   : > { %6347 = vmatpush3.msra.mxu0 %v4322_v21  ;;  %6377 = vmatpush3.msra.mxu1 %v4322_v21 }
 0x59e   : > { %6348 = vmatprep.subr.mxu0 %v4321_v35  ;;  %6378 = vmatprep.subr.mxu1 %v4321_v35 }
 0x59f   : > { %6349 = vmatpush3.msra.mxu0 %v4321_v35  ;;  %6379 = vmatpush3.msra.mxu1 %v4321_v35 }
 0x5a0   : > { %6351 = vmatmul.mubr.msk.f32.vlgmr.msra.gmra.mxu0 %vm2619_vm5, %v4334_v53  ;;  %6381 = vmatmul.mubr.msk.f32.vlgmr.msra.gmra.mxu1 %vm2619_vm5, %v5847_v49 }
 0x5a1   : > { %6353 = vmatprep.mubr.msk.f32.mxu0 %vm2619_vm5, %v4335_v14  ;;  %6383 = vmatprep.mubr.msk.f32.mxu1 %vm2619_vm5, %v5848_v20 }
 0x5a2   : > { %6386 = vmatprep.subr.mxu0 %v4551_v40  ;;  %6416 = vmatprep.subr.mxu1 %v5869_v28 }
 0x5a3   : > { %6387 = vmatpush3.msra.mxu0 %v4551_v40  ;;  %6417 = vmatpush3.msra.mxu1 %v5869_v28 }
 0x5a4   : > { %6354 = vmatmul.mubr.msk.f32.gmra.mxu0 %vm2619_vm5, %v4336_v51  ;;  %6384 = vmatmul.mubr.msk.f32.gmra.mxu1 %vm2619_vm5, %v5849_v24 }
 0x5a5   : > { %6388 = vmatprep.subr.mxu0 %v4550_v34  ;;  %6418 = vmatprep.subr.mxu1 %v5868_v59 }
 0x5a6   : > { %6389 = vmatpush3.msra.mxu0 %v4550_v34  ;;  %6419 = vmatpush3.msra.mxu1 %v5868_v59  ;;  %v4752_v59 = vld [vmem:[#allocation10] sm:$0xff] }
 0x5a7   : > { %6390 = vmatprep.subr.mxu0 %v4549_v18  ;;  %6420 = vmatprep.subr.mxu1 %v5867_v32 }
 0x5a8   : > { %6391 = vmatpush3.msra.mxu0 %v4549_v18  ;;  %6421 = vmatpush3.msra.mxu1 %v5867_v32 }
 0x5a9   : > { %6392 = vmatprep.subr.mxu0 %v4548_v63  ;;  %6422 = vmatprep.subr.mxu1 %v5866_v15 }
 0x5aa   : > { %6393 = vmatpush3.msra.mxu0 %v4548_v63  ;;  %6423 = vmatpush3.msra.mxu1 %v5866_v15  ;;  %v4939_v63 = vld [vmem:[#allocation10 + $0x8] sm:$0xff]  ;;  %v5896_v15 = vld [vmem:[%s9642_s10 + $0x88] sm:$0xff] }
 0x5ab   : > { %6394 = vmatprep.subr.mxu0 %v4547_v1  ;;  %6424 = vmatprep.subr.mxu1 %v5865_v30 }
 0x5ac   : > { %6395 = vmatpush3.msra.mxu0 %v4547_v1  ;;  %6425 = vmatpush3.msra.mxu1 %v5865_v30  ;;  %v5895_v1 = vld [vmem:[%s9642_s10 + $0x80] sm:$0xff]  ;;  %v5894_v30 = vld [vmem:[%s9642_s10 + $0x78] sm:$0xff] }
 0x5ad   : > { %6396 = vmatprep.subr.mxu0 %v4546_v2  ;;  %6426 = vmatprep.subr.mxu1 %v5864_v57 }
 0x5ae   : > { %6397 = vmatpush3.msra.mxu0 %v4546_v2  ;;  %6427 = vmatpush3.msra.mxu1 %v5864_v57  ;;  %v5893_v2 = vld [vmem:[%s9642_s10 + $0x70] sm:$0xff]  ;;  %v5892_v57 = vld [vmem:[%s9642_s10 + $0x68] sm:$0xff] }
 0x5af   : > { %6398 = vmatprep.subr.mxu0 %v4545_v6  ;;  %6428 = vmatprep.subr.mxu1 %v5863_v37 }
 0x5b0   : > { %6399 = vmatpush3.msra.mxu0 %v4545_v6  ;;  %6429 = vmatpush3.msra.mxu1 %v5863_v37  ;;  %v5891_v6 = vld [vmem:[%s9642_s10 + $0x60] sm:$0xff] }
 0x5b1   : > { %6400 = vmatprep.subr.mxu0 %v4544_v9  ;;  %6430 = vmatprep.subr.mxu1 %v5862_v47 }
 0x5b2   : > { %6401 = vmatpush3.msra.mxu0 %v4544_v9  ;;  %6431 = vmatpush3.msra.mxu1 %v5862_v47  ;;  %v5879_v47 = vld [vmem:[%s9643_s11] ss:$0 sm:$0xff] }
 0x5b3   : > { %6402 = vmatprep.subr.mxu0 %v4543_v33  ;;  %6432 = vmatprep.subr.mxu1 %v5861_v62 }
 0x5b4   : > { %6403 = vmatpush3.msra.mxu0 %v4543_v33  ;;  %6433 = vmatpush3.msra.mxu1 %v5861_v62 }
 0x5b5   : > { %6404 = vmatprep.subr.mxu0 %v4542_v11  ;;  %6434 = vmatprep.subr.mxu1 %v5860_v36 }
 0x5b6   : > { %6405 = vmatpush3.msra.mxu0 %v4542_v11  ;;  %6435 = vmatpush3.msra.mxu1 %v5860_v36 }
 0x5b7   : > { %6406 = vmatprep.subr.mxu0 %v4541_v13  ;;  %6436 = vmatprep.subr.mxu1 %v5859_v44 }
 0x5b8   : > { %6407 = vmatpush3.msra.mxu0 %v4541_v13  ;;  %6437 = vmatpush3.msra.mxu1 %v5859_v44 }
 0x5b9   : > { %6408 = vmatprep.subr.mxu0 %v4540_v5  ;;  %6438 = vmatprep.subr.mxu1 %v5858_v12 }
 0x5ba   : > { %6409 = vmatpush3.msra.mxu0 %v4540_v5  ;;  %6439 = vmatpush3.msra.mxu1 %v5858_v12 }
 0x5bb   : > { %6446 = vmatprep.subr.mxu0 %v4758_v23  ;;  %6475 = vmatprep.subr.mxu1 %v5885_v26 }
 0x660   : > { %v6352_v42 = vpop.f32.mrf.mxu0  ;;  %v6382_v52 = vpop.f32.mrf.mxu1 }
 0x661   : > { %v4537_v16 = vmax.f32 %v6352_v42, %v6382_v52  ;;  %v5907_v42 = vld [vmem:[%s9642_s10 + $0xb8] sm:$0xff]  ;;  %v5906_v52 = vld [vmem:[%s9642_s10 + $0xb0] sm:$0xff] }
 0x662   : > { %v4415_v0 = vpop.f32.mrf.mxu0  ;;  %v4517_v54 = vpop.f32.mrf.mxu1 }
 0x663   : > { %v4536_v45 = vmax.f32 %v4415_v0, %v4517_v54  ;;  %v5905_v0 = vld [vmem:[%s9642_s10 + $0xa8] sm:$0xff]  ;;  %v5904_v54 = vld [vmem:[%s9642_s10 + $0xa0] sm:$0xff] }
 0x664   : > { %v6355_v7 = vpop.f32.mrf.mxu0  ;;  %v6385_v58 = vpop.f32.mrf.mxu1 }
 0x665   : > { %6410 = vmatprep.mubr.msk.f32.mxu0 %vm2619_vm5, %v4536_v45  ;;  %6440 = vmatprep.mubr.msk.f32.mxu1 %vm2619_vm5, %v4536_v45  ;;  %v4539_v39 = vmax.f32 %v6355_v7, %v6385_v58  ;;  %v5903_v45 = vld [vmem:[%s9642_s10 + $0x98] sm:$0xff] }
 0x666   : > { %v4425_v27 = vpop.f32.mrf.mxu0  ;;  %v4527_v60 = vpop.f32.mrf.mxu1  ;;  %6411 = vmatmul.mubr.msk.f32.vlgmr.msra.gmra.mxu0 %vm2619_vm5, %v4537_v16  ;;  %6441 = vmatmul.mubr.msk.f32.vlgmr.msra.gmra.mxu1 %vm2619_vm5, %v4537_v16  ;;  %v5902_v16 = vld [vmem:[%s9642_s10 + $0x90] sm:$0xff] }
 0x667   : > { %v4538_v4 = vmax.f32 %v4425_v27, %v4527_v60  ;;  %6447 = vmatpush3.msra.mxu0 %v4758_v23  ;;  %6476 = vmatpush3.msra.mxu1 %v5885_v26  ;;  %v5107_v23 = vld [vmem:[#allocation10 + $0x10] sm:$0xff] }
 0x668   : > { %6448 = vmatprep.subr.mxu0 %v4757_v25  ;;  %6477 = vmatprep.subr.mxu1 %v5884_v55 }
 0x669   : > { %6413 = vmatprep.mubr.msk.f32.mxu0 %vm2619_vm5, %v4538_v4  ;;  %6443 = vmatprep.mubr.msk.f32.mxu1 %vm2619_vm5, %v4538_v4 }
 0x66a   : > { %6414 = vmatmul.mubr.msk.f32.gmra.mxu0 %vm2619_vm5, %v4539_v39  ;;  %6444 = vmatmul.mubr.msk.f32.gmra.mxu1 %vm2619_vm5, %v4539_v39 }
 0x66b   : > { %6449 = vmatpush3.msra.mxu0 %v4757_v25  ;;  %6478 = vmatpush3.msra.mxu1 %v5884_v55 }
 0x66c   : > { %6450 = vmatprep.subr.mxu0 %v4756_v43  ;;  %6479 = vmatprep.subr.mxu1 %v5883_v29 }
 0x66d   : > { %6451 = vmatpush3.msra.mxu0 %v4756_v43  ;;  %6480 = vmatpush3.msra.mxu1 %v5883_v29  ;;  %v5275_v43 = vld [vmem:[#allocation10 + $0x18] sm:$0xff] }
 0x66e   : > { %6452 = vmatprep.subr.mxu0 %v4755_v48  ;;  %6481 = vmatprep.subr.mxu1 %v5882_v31 }
 0x66f   : > { %6453 = vmatpush3.msra.mxu0 %v4755_v48  ;;  %6482 = vmatpush3.msra.mxu1 %v5882_v31 }
 0x670   : > { %6454 = vmatprep.subr.mxu0 %v4754_v38  ;;  %6483 = vmatprep.subr.mxu1 %v5881_v19 }
 0x671   : > { %6455 = vmatpush3.msra.mxu0 %v4754_v38  ;;  %6484 = vmatpush3.msra.mxu1 %v5881_v19 }
 0x672   : > { %6456 = vmatprep.subr.mxu0 %v4753_v56  ;;  %6485 = vmatprep.subr.mxu1 %v5880_v22 }
 0x673   : > { %6457 = vmatpush3.msra.mxu0 %v4753_v56  ;;  %6486 = vmatpush3.msra.mxu1 %v5880_v22 }
 0x674   : > { %6464 = vmatprep.subr.mxu0 %v10110_v46  ;;  %6522 = vmatprep.subr.mxu1 %v10110_v46 }
 0x726   : > { %v6412_v10 = vpop.f32.mrf.mxu0  ;;  %v6442_v8 = vpop.f32.mrf.mxu1 }
 0x727   : > { %v9489_v17 = vmax.f32 %v6412_v10, %v6442_v8 }
 0x728   : > { %v4630_v3 = vpop.f32.mrf.mxu0  ;;  %v4728_v50 = vpop.f32.mrf.mxu1 }
 0x729   : > { %v9487_v41 = vmax.f32 %v4630_v3, %v4728_v50 }
 0x72a   : > { %v6415_v61 = vpop.f32.mrf.mxu0  ;;  %v6445_v21 = vpop.f32.mrf.mxu1 }
 0x72b   : > { %6458 = vmatprep.mubr.msk.f32.mxu0 %vm4759_vm8, %v9487_v41  ;;  %6487 = vmatprep.mubr.msk.f32.mxu1 %vm4759_vm8, %v9487_v41  ;;  %v9501_v14 = vmax.f32 %v6415_v61, %v6445_v21 }
 0x72c   : > { %v4640_v35 = vpop.f32.mrf.mxu0  ;;  %v4738_v53 = vpop.f32.mrf.mxu1  ;;  %6459 = vmatmul.mubr.msk.f32.vlgmr.msra.gmra.mxu0 %vm4759_vm8, %v9489_v17  ;;  %6488 = vmatmul.mubr.msk.f32.vlgmr.msra.gmra.mxu1 %vm4759_vm8, %v9489_v17 }
 0x72d   : > { %v9499_v49 = vmax.f32 %v4640_v35, %v4738_v53 }
 0x72f   : > { %6461 = vmatprep.mubr.msk.f32.mxu0 %vm4759_vm8, %v9499_v49  ;;  %6490 = vmatprep.mubr.msk.f32.mxu1 %vm4759_vm8, %v9499_v49 }
 0x730   : > { %6462 = vmatmul.mubr.msk.f32.gmra.mxu0 %vm4759_vm8, %v9501_v14  ;;  %6491 = vmatmul.mubr.msk.f32.gmra.mxu1 %vm4759_vm8, %v9501_v14 }
 0x731   : > { %6472 = vmatprep.mubr.msk.f32.mxu0 %vm6882_vm9, %v10110_v46  ;;  %6530 = vmatprep.mubr.msk.f32.mxu1 %vm6882_vm9, %v10110_v46 }
 0x7ec   : > { %v6460_v20 = vpop.f32.mrf.mxu0  ;;  %v6489_v28 = vpop.f32.mrf.mxu1 }
 0x7ee   : > { %v4838_v40 = vpop.f32.mrf.mxu0  ;;  %v5013_v34 = vpop.f32.mrf.mxu1 }
 0x7f0   : > { %v6463_v51 = vpop.f32.mrf.mxu0  ;;  %v6492_v18 = vpop.f32.mrf.mxu1 }
 0x7f1   : > { %6465 = vmatpush3.msra.mxu0 %v6463_v51 }
 0x7f2   : > { %v4848_v24 = vpop.f32.mrf.mxu0  ;;  %6466 = vmatprep.subr.mxu0 %v10110_v46  ;;  %v5023_v32 = vpop.f32.mrf.mxu1 }
 0x7f3   : > { %6467 = vmatpush3.msra.mxu0 %v4848_v24 }
 0x7f4   : > { %6468 = vmatprep.subr.mxu0 %v10110_v46 }
 0x7f5   : > { %6469 = vmatpush3.msra.mxu0 %v6460_v20 }
 0x7f6   : > { %6470 = vmatprep.subr.mxu0 %v10110_v46 }
 0x7f7   : > { %6471 = vmatpush3.msra.mxu0 %v4838_v40 }
 0x7f8   : > { %6493 = vmatprep.subr.mxu0 %v10110_v46  ;;  %6473 = vmatmul.mubr.msk.f32.vlgmr.msra.gmra.mxu0 %vm4857_vm10, %v4752_v59 }
 0x7f9   : > { %6494 = vmatpush3.msra.mxu0 %v6492_v18  ;;  %6501 = vmatprep.mubr.msk.f32.mxu0 %vm6882_vm9, %v10110_v46 }
 0x7fa   : > { %6495 = vmatprep.subr.mxu0 %v10110_v46 }
 0x7fb   : > { %6496 = vmatpush3.msra.mxu0 %v5023_v32 }
 0x7fc   : > { %6497 = vmatprep.subr.mxu0 %v10110_v46 }
 0x7fd   : > { %6498 = vmatpush3.msra.mxu0 %v6489_v28 }
 0x7fe   : > { %6499 = vmatprep.subr.mxu0 %v10110_v46 }
 0x7ff   : > { %6500 = vmatpush3.msra.mxu0 %v5013_v34 }
 0x800   : > { %6502 = vmatmul.mubr.msk.f32.vlgmr.msra.gmra.mxu0 %vm4857_vm10, %v4939_v63  ;;  %6504 = vmatprep.subr.mxu0 %v5896_v15 }
 0x801   : > { %6505 = vmatpush3.msra.mxu0 %v5896_v15  ;;  %6516 = vmatprep.mubr.msk.f32.mxu0 %vm4759_vm8, %v9487_v41 }
 0x802   : > { %6506 = vmatprep.subr.mxu0 %v5895_v1 }
 0x803   : > { %6507 = vmatpush3.msra.mxu0 %v5895_v1 }
 0x804   : > { %6508 = vmatprep.subr.mxu0 %v5894_v30 }
 0x805   : > { %6509 = vmatpush3.msra.mxu0 %v5894_v30 }
 0x806   : > { %6510 = vmatprep.subr.mxu0 %v5893_v2 }
 0x807   : > { %6511 = vmatpush3.msra.mxu0 %v5893_v2 }
 0x808   : > { %6512 = vmatprep.subr.mxu0 %v5892_v57 }
 0x809   : > { %6513 = vmatpush3.msra.mxu0 %v5892_v57 }
 0x80a   : > { %6514 = vmatprep.subr.mxu0 %v5891_v6 }
 0x80b   : > { %6515 = vmatpush3.msra.mxu0 %v5891_v6 }
 0x80c   : > { %6517 = vmatmul.mubr.msk.f32.vlgmr.msra.gmra.mxu0 %vm4759_vm8, %v9489_v17  ;;  %6551 = vmatprep.subr.mxu0 %v10110_v46 }
 0x80d   : > { %6519 = vmatprep.mubr.msk.f32.mxu0 %vm4759_vm8, %v9499_v49 }
 0x810   : > { %6520 = vmatmul.mubr.msk.f32.gmra.mxu0 %vm4759_vm8, %v9501_v14 }
 0x811   : > { %6559 = vmatprep.mubr.msk.f32.mxu0 %vm6882_vm9, %v10110_v46 }
 0x8b8   : > { %v4927_v37 = vpop.f32.mrf.mxu0 }
 0x8b9   : > { %v4937_v33 = vadd.f32 %v5879_v47, %v4927_v37 }
 0x8ba   : > { %v6474_v9 = vpop.f32.mrf.mxu0 }
 0x8c0   : > { %v5101_v62 = vpop.f32.mrf.mxu0 }
 0x8c1   : > { %v5105_v11 = vadd.f32 %v5101_v62, %v4937_v33 }
 0x8c2   : > { %v6503_v36 = vpop.f32.mrf.mxu0 }
 0x8cc   : > { %v6518_v13 = vpop.f32.mrf.mxu0 }
 0x8ce   : > { %v5181_v44 = vpop.f32.mrf.mxu0 }
 0x8d0   : > { %v6521_v5 = vpop.f32.mrf.mxu0 }
 0x8d1   : > { %6523 = vmatpush3.msra.mxu1 %v6521_v5 }
 0x8d2   : > { %v5191_v12 = vpop.f32.mrf.mxu0  ;;  %6524 = vmatprep.subr.mxu1 %v10110_v46 }
 0x8d3   : > { %6525 = vmatpush3.msra.mxu1 %v5191_v12 }
 0x8d4   : > { %6526 = vmatprep.subr.mxu1 %v10110_v46 }
 0x8d5   : > { %6527 = vmatpush3.msra.mxu1 %v6518_v13 }
 0x8d6   : > { %6528 = vmatprep.subr.mxu1 %v10110_v46 }
 0x8d7   : > { %6529 = vmatpush3.msra.mxu1 %v5181_v44 }
 0x8d8   : > { %6531 = vmatmul.mubr.msk.f32.vlgmr.msra.gmra.mxu1 %vm4857_vm10, %v5107_v23  ;;  %6533 = vmatprep.subr.mxu1 %v5907_v42 }
 0x8d9   : > { %6534 = vmatpush3.msra.mxu1 %v5907_v42  ;;  %6545 = vmatprep.mubr.msk.f32.mxu1 %vm4759_vm8, %v9487_v41 }
 0x8da   : > { %6535 = vmatprep.subr.mxu1 %v5906_v52 }
 0x8db   : > { %6536 = vmatpush3.msra.mxu1 %v5906_v52 }
 0x8dc   : > { %6537 = vmatprep.subr.mxu1 %v5905_v0 }
 0x8dd   : > { %6538 = vmatpush3.msra.mxu1 %v5905_v0 }
 0x8de   : > { %6539 = vmatprep.subr.mxu1 %v5904_v54 }
 0x8df   : > { %6540 = vmatpush3.msra.mxu1 %v5904_v54 }
 0x8e0   : > { %6541 = vmatprep.subr.mxu1 %v5903_v45 }
 0x8e1   : > { %6542 = vmatpush3.msra.mxu1 %v5903_v45 }
 0x8e2   : > { %6543 = vmatprep.subr.mxu1 %v5902_v16 }
 0x8e3   : > { %6544 = vmatpush3.msra.mxu1 %v5902_v16 }
 0x8e4   : > { %6546 = vmatmul.mubr.msk.f32.vlgmr.msra.gmra.mxu1 %vm4759_vm8, %v9489_v17 }
 0x8e5   : > { %6548 = vmatprep.mubr.msk.f32.mxu1 %vm4759_vm8, %v9499_v49 }
 0x8e8   : > { %6549 = vmatmul.mubr.msk.f32.gmra.mxu1 %vm4759_vm8, %v9501_v14 }
 0x998   : > { %v5269_v7 = vpop.f32.mrf.mxu1 }
 0x999   : > { %v5273_v58 = vadd.f32 %v5269_v7, %v5105_v11 }
 0x99a   : > { %v6532_v25 = vpop.f32.mrf.mxu1 }
 0x9a4   : > { %v6547_v27 = vpop.f32.mrf.mxu1 }
 0x9a6   : > { %v5349_v60 = vpop.f32.mrf.mxu1 }
 0x9a8   : > { %v6550_v4 = vpop.f32.mrf.mxu1 }
 0x9a9   : > { %6552 = vmatpush3.msra.mxu0 %v6550_v4 }
 0x9aa   : > { %v5359_v39 = vpop.f32.mrf.mxu1  ;;  %6553 = vmatprep.subr.mxu0 %v10110_v46 }
 0x9ab   : > { %6554 = vmatpush3.msra.mxu0 %v5359_v39 }
 0x9ac   : > { %6555 = vmatprep.subr.mxu0 %v10110_v46 }
 0x9ad   : > { %6556 = vmatpush3.msra.mxu0 %v6547_v27 }
 0x9ae   : > { %6557 = vmatprep.subr.mxu0 %v10110_v46 }
 0x9af   : > { %6558 = vmatpush3.msra.mxu0 %v5349_v60 }
 0x9b0   : > { %6560 = vmatmul.mubr.msk.f32.vlgmr.msra.gmra.mxu0 %vm4857_vm10, %v5275_v43 }
 0xa70   : > { %v5437_v26 = vpop.f32.mrf.mxu0 }
 0xa71   : > { %v5441_v55 = vadd.f32 %v5437_v26, %v5273_v58 }
 0xa72   : > { %v6561_v29 = vpop.f32.mrf.mxu0 }
 0xa73   : > { %5443 = vst.msk [vmem:[%s480_s15] sm:$0xff] %vm5442_vm11, %v5441_v55 }
 0xa74   : > { %6811 = shalt.err (!%p6808_p13)
}
 0xa75   : > { %s6812_s28 = scalar_lea.hbm %s9597_s27, 128  ;;  %s6816_s14 = scalar_lea.hbm %s9644_s12, 256 }
 0xa76   : > { %p6813_p8 = scmp.ne.s32.totalorder %s9597_s27, %s6812_s28  ;;  %p6817_p10 = scmp.lt.s32.totalorder %s9597_s27, %s9644_s12 }
 0xa77   : > { %p6818_p12 = scmp.lt.s32.totalorder %s6816_s14, %s6812_s28 }
 0xa78   : > { %p6814_p5 = pnand %p6813_p8, %p10111_p3 }
 0xa79   : > { %p6819_p11 = por %p6818_p12, %p6817_p10 }
 0xa7a   : > { %p6815_p6 = pneg %p6814_p5 }
 0xa7c   : > { %p6820_p0 = pnand %p6819_p11, %p6815_p6 }
 0xa7e   : > { %6823 = shalt.err (!%p6820_p0)
}
 0xa7f   : > { %6582 = dma.vmem_to_hbm [thread:$0]  (%p10111_p3), %s5459_s18, 128, %s9597_s27, %s5445_s30  }
 0xa80 PF: > { %s10112_s29 = sld [smem:[#allocation19_spill]]  ;;  %p6614_p1 = scmp.ge.s32.totalorder %s6870_s24, 2 }
 0xa81   : > { %s5470_s26 = sand.u32 1, %s6858_s21  }
 0xa82   : > { %s5471_s16 = scalar_lea.sflag [#allocation4], %s5470_s26 }
 0xa86   : > { %p10113_p2 = scmp.ne.s32.totalorder %s10112_s29, 0 }
 0xa88   : > { %p6601_p4 = pnand %p6614_p1, %p10113_p2 }
 0xa8a   : > { %p6602_p9 = pneg %p6601_p4 }
 0xa8c   : > { %6853 = dma.done.wait (%p6602_p9), %s5471_s16, 128  }
 0xa8d   : > { %6855 = vsyncadd (%p6602_p9), %s5471_s16, 4294967168  ;;  %s10114_s24 = sld [smem:[#allocation17_spill]]  ;;  %s10117_s21 = smov %s6862_s22 }
 0xa8e   : > { %s10115_s25 = sld [smem:[#allocation16_spill]] }
 0xa8f   : > { %s10116_s23 = sld [smem:[#allocation18_spill]] }
 0xa93   : > { %p25_p7 = scmp.ge.s32.totalorder %s10114_s24, 4  }
 0xa94   : > { %s10118_s22 = smov %s10115_s25 }
 0xa95   :  { %27 = sbr.rel (!%p25_p7) target bundleno = 8 (0x8), region = 142 }
 0xa9a   :  { %5476 = vsyncpa [#allocation3], 1 }
 0xa9b   :  { %5478 = vsyncpa [#allocation3 + $0x1], 1 }
 0xa9c   :  { %5479 = vsyncpa [#allocation6], 1 }
 0xa9d   :  { %5480 = vsyncpa [#allocation9], 1 }
 0xa9e   :  { %5481 = vsyncpa [#allocation4], 1 }
 0xa9f   :  { %5483 = vsyncpa [#allocation4 + $0x1], 1 }

</bundles_post_ra>
